<compile_context>
chip_gen: v7x
topology: tpu7x:2x2x1
jax: 0.10.0
libtpu: 0.0.40
codegen_flags: <defaults>
</compile_context>

<pallas_src>
import jax
import jax.numpy as jnp
from jax.experimental import pallas as pl
from jax.experimental.pallas import tpu as pltpu

D_IN = 768
DIMS = [D_IN, 1024, 128, 64, 16, 1]


def mlp_kernel(x_ref, w1_ref, b1_ref, w2_ref, b2_ref, wt_ref, bt_ref, o_ref):
    """Fused eval-mode MLP on one [tile_b, 768] batch tile.

    x_ref  : [tile_b, 768] bf16
    w1_ref : [768, 1024]   bf16      b1_ref : [1, 1024] f32
    w2_ref : [1024, 128]   bf16      b2_ref : [1, 128]  f32
    wt_ref : [8, 128]      bf16  (row 0 = folded W3@W4@W5, rows 1-7 zero)
    bt_ref : [1]           f32   (folded tail bias, SMEM scalar)
    o_ref  : [8, tile_b]   f32   (row 0 = outputs, batch along lanes)
    """
    h1 = jnp.dot(x_ref[...], w1_ref[...],
                 preferred_element_type=jnp.float32) + b1_ref[...]
    h2 = jnp.dot(h1.astype(jnp.bfloat16), w2_ref[...],
                 preferred_element_type=jnp.float32) + b2_ref[...]
    # Folded affine tail, computed transposed so the batch dim is lane-dense:
    # [8,128] @ [128, tile_b] -> [8, tile_b].
    yt = jnp.dot(wt_ref[...], h2.astype(jnp.bfloat16).T,
                 preferred_element_type=jnp.float32)
    o_ref[...] = yt + bt_ref[0]


def fold_tail(params):
    """Fold the purely-affine tail (layers 3..5) into one weight/bias (eval mode)."""
    (w1, b1), (w2, b2), (w3, b3), (w4, b4), (w5, b5) = params
    w_t = w3 @ w4 @ w5                     # [128, 1]
    b_t = (b3 @ w4 + b4) @ w5 + b5         # [1, 1]
    return (w1, b1), (w2, b2), (w_t, b_t)


def prepare_params(params):
    """Host-side prep: fold the tail, cast weights to bf16, shape for the kernel."""
    (w1, b1), (w2, b2), (w_t, b_t) = fold_tail(params)
    w1p = w1.astype(jnp.bfloat16)                         # [768, 1024]
    b1p = b1.astype(jnp.float32)                          # [1, 1024]
    w2p = w2.astype(jnp.bfloat16)                         # [1024, 128]
    b2p = b2.astype(jnp.float32)                          # [1, 128]
    # Folded tail as a sublane-padded *row* matrix: row 0 = w_t, rows 1-7 = 0.
    wtp = jnp.zeros((8, 128), jnp.float32).at[0, :].set(w_t[:, 0])
    wtp = wtp.astype(jnp.bfloat16)                        # [8, 128]
    btp = b_t.reshape((1,)).astype(jnp.float32)           # SMEM scalar
    return w1p, b1p, w2p, b2p, wtp, btp


def _round_up(x, m):
    return (x + m - 1) // m * m


def mlp_forward(x, params, *, tile_b=None):
    """x: [B, 768] f32.  params: 5 x (W [in, out] f32, b [1, out] f32).

    Returns [B, 1] f32 (eval-mode forward: dropout is identity).
    """
    B, d_in = x.shape
    assert d_in == D_IN

    if tile_b is None:
        # Cap at 1024 rows (fits the 32 MiB scoped-VMEM budget requested below
        # on every generation) and keep >= 2 grid steps whenever B allows so
        # the "parallel" batch axis shards across both v7x TensorCores.
        tile_b = min(1024, max(128, _round_up(pl.cdiv(B, 2), 128)))
    b_pad = _round_up(B, tile_b)
    n_tiles = b_pad // tile_b

    if b_pad != B:
        x = jnp.pad(x, ((0, b_pad - B), (0, 0)))
    x_bf = x.astype(jnp.bfloat16)

    w1p, b1p, w2p, b2p, wtp, btp = prepare_params(params)

    def const(shape):
        # Same (whole-array) block every grid step -> fetched once, VMEM resident.
        return pl.BlockSpec(shape, lambda i: (0,) * len(shape))

    in_specs = [
        pl.BlockSpec((tile_b, D_IN), lambda i: (i, 0)),        # x batch tile
        const(w1p.shape), const(b1p.shape),
        const(w2p.shape), const(b2p.shape),
        const(wtp.shape),
        pl.BlockSpec(memory_space=pltpu.MemorySpace.SMEM),     # folded tail bias
    ]
    out_spec = pl.BlockSpec((8, tile_b), lambda i: (i, 0))

    out = pl.pallas_call(
        mlp_kernel,
        out_shape=jax.ShapeDtypeStruct((n_tiles * 8, tile_b), jnp.float32),
        grid=(n_tiles,),
        in_specs=in_specs,
        out_specs=out_spec,
        compiler_params=pltpu.CompilerParams(
            dimension_semantics=("parallel",),
            vmem_limit_bytes=32 * 1024 * 1024),
    )(x_bf, w1p, b1p, w2p, b2p, wtp, btp)

    # Row 0 of each 8-row group holds the real outputs (batch along lanes).
    y = out.reshape(n_tiles, 8, tile_b)[:, 0, :].reshape(b_pad, 1)
    return y[:B]


def init_params(key):
    """Deterministic init matching nn.Linear shapes (stored as [in, out], f32)."""
    params = []
    for idx in range(len(DIMS) - 1):
        din, dout = DIMS[idx], DIMS[idx + 1]
        key, kw, kb = jax.random.split(key, 3)
        bound = 1.0 / (din ** 0.5)
        w = jax.random.uniform(kw, (din, dout), jnp.float32, -bound, bound)
        b = jax.random.uniform(kb, (1, dout), jnp.float32, -bound, bound)
        params.append((w, b))
    return params


def mlp_reference_matched(x, params):
    """Pure-JAX reference using the kernel's recipe (bf16 operands, f32 acc, folded tail)."""
    (w1, b1), (w2, b2), (w_t, b_t) = fold_tail(params)
    bf = jnp.bfloat16
    h1 = jnp.dot(x.astype(bf), w1.astype(bf), preferred_element_type=jnp.float32) + b1
    h2 = jnp.dot(h1.astype(bf), w2.astype(bf), preferred_element_type=jnp.float32) + b2
    return jnp.dot(h2.astype(bf), w_t.astype(bf), preferred_element_type=jnp.float32) + b_t


def mlp_reference_f32(x, params):
    """Exact f32 per-layer forward (module semantics, eval mode)."""
    h = x
    for w, b in params:
        h = h @ w + b
    return h


if __name__ == "__main__":
    key = jax.random.PRNGKey(0)
    key, kx = jax.random.split(key)

    # 384 rows: exercises batch padding (tile_b -> 256, b_pad -> 512) and gives
    # a 2-step "parallel" grid (both v7x TensorCores get work).
    B = 384
    x = jax.random.normal(kx, (B, D_IN), jnp.float32)
    params = init_params(key)

    out = jax.block_until_ready(mlp_forward(x, params))
    assert out.shape == (B, 1), out.shape

    ref = jax.block_until_ready(mlp_reference_matched(x, params))
    max_err = float(jnp.max(jnp.abs(out - ref)))
    assert jnp.allclose(out, ref, atol=1e-4, rtol=1e-4), max_err

    # Loose sanity check against the exact f32 per-layer forward (bf16 MXU
    # recipe introduces ~1e-3-level differences).
    ref32 = mlp_reference_f32(x, params)
    max_err32 = float(jnp.max(jnp.abs(out - ref32)))
    assert max_err32 < 5e-2, max_err32

    print("KERNEL_OK")
</pallas_src>

<mosaic_0001>
module attributes {stable_mosaic.version = 11 : i64} {
  func.func @mlp_kernel(%arg0: i32, %arg1: memref<256x768xbf16, #tpu.memory_space<vmem>>, %arg2: memref<768x1024xbf16, #tpu.memory_space<vmem>>, %arg3: memref<1x1024xf32, #tpu.memory_space<vmem>>, %arg4: memref<1024x128xbf16, #tpu.memory_space<vmem>>, %arg5: memref<1x128xf32, #tpu.memory_space<vmem>>, %arg6: memref<8x128xbf16, #tpu.memory_space<vmem>>, %arg7: memref<1xf32, #tpu.memory_space<smem>>, %arg8: memref<8x256xf32, #tpu.memory_space<vmem>>) attributes {dimension_semantics = [#tpu.dimension_semantics<parallel>], iteration_bounds = array<i64: 2>, scalar_prefetch = 0 : i64, scratch_operands = 0 : i64, tpu.core_type = #tpu.core_type<tc>, window_params = [{transform_indices = @transform_0, window_bounds = array<i64: 256, 768>}, {pipeline_mode = #tpu.pipeline_mode<synchronous>, transform_indices = @transform_1, window_bounds = array<i64: 768, 1024>}, {pipeline_mode = #tpu.pipeline_mode<synchronous>, transform_indices = @transform_2, window_bounds = array<i64: 1, 1024>}, {pipeline_mode = #tpu.pipeline_mode<synchronous>, transform_indices = @transform_3, window_bounds = array<i64: 1024, 128>}, {pipeline_mode = #tpu.pipeline_mode<synchronous>, transform_indices = @transform_4, window_bounds = array<i64: 1, 128>}, {pipeline_mode = #tpu.pipeline_mode<synchronous>, transform_indices = @transform_5, window_bounds = array<i64: 8, 128>}, {transform_indices = @transform_6, window_bounds = array<i64: 1>}, {transform_indices = @transform_7, window_bounds = array<i64: 8, 256>}]} {
    %c0 = arith.constant 0 : index
    %c0_0 = arith.constant 0 : index
    %0 = vector.load %arg1[%c0, %c0_0] : memref<256x768xbf16, #tpu.memory_space<vmem>>, vector<256x768xbf16>
    %c0_1 = arith.constant 0 : index
    %c0_2 = arith.constant 0 : index
    %1 = vector.load %arg2[%c0_1, %c0_2] : memref<768x1024xbf16, #tpu.memory_space<vmem>>, vector<768x1024xbf16>
    %cst = arith.constant dense<0.000000e+00> : vector<256x1024xf32>
    %2 = tpu.matmul %0, %1, %cst {dimension_numbers = #tpu.dot_dimension_numbers<[1], [0], [0], [1], [0, 0, 1, 1], [], []>} : vector<256x768xbf16>, vector<768x1024xbf16>, vector<256x1024xf32> -> vector<256x1024xf32>
    %c0_3 = arith.constant 0 : index
    %c0_4 = arith.constant 0 : index
    %3 = vector.load %arg3[%c0_3, %c0_4] : memref<1x1024xf32, #tpu.memory_space<vmem>>, vector<1x1024xf32>
    %4 = vector.broadcast %3 : vector<1x1024xf32> to vector<256x1024xf32>
    %5 = arith.addf %2, %4 : vector<256x1024xf32>
    %6 = arith.truncf %5 : vector<256x1024xf32> to vector<256x1024xbf16>
    %c0_5 = arith.constant 0 : index
    %c0_6 = arith.constant 0 : index
    %7 = vector.load %arg4[%c0_5, %c0_6] : memref<1024x128xbf16, #tpu.memory_space<vmem>>, vector<1024x128xbf16>
    %cst_7 = arith.constant dense<0.000000e+00> : vector<256x128xf32>
    %8 = tpu.matmul %6, %7, %cst_7 {dimension_numbers = #tpu.dot_dimension_numbers<[1], [0], [0], [1], [0, 0, 1, 1], [], []>} : vector<256x1024xbf16>, vector<1024x128xbf16>, vector<256x128xf32> -> vector<256x128xf32>
    %c0_8 = arith.constant 0 : index
    %c0_9 = arith.constant 0 : index
    %9 = vector.load %arg5[%c0_8, %c0_9] : memref<1x128xf32, #tpu.memory_space<vmem>>, vector<1x128xf32>
    %10 = vector.broadcast %9 : vector<1x128xf32> to vector<256x128xf32>
    %11 = arith.addf %8, %10 : vector<256x128xf32>
    %c0_10 = arith.constant 0 : index
    %c0_11 = arith.constant 0 : index
    %12 = vector.load %arg6[%c0_10, %c0_11] : memref<8x128xbf16, #tpu.memory_space<vmem>>, vector<8x128xbf16>
    %13 = arith.truncf %11 : vector<256x128xf32> to vector<256x128xbf16>
    %14 = tpu.transpose %13, [1, 0] : vector<256x128xbf16> -> vector<128x256xbf16>
    %cst_12 = arith.constant dense<0.000000e+00> : vector<8x256xf32>
    %15 = tpu.matmul %12, %14, %cst_12 {dimension_numbers = #tpu.dot_dimension_numbers<[1], [0], [0], [1], [0, 0, 1, 1], [], []>} : vector<8x128xbf16>, vector<128x256xbf16>, vector<8x256xf32> -> vector<8x256xf32>
    %c0_13 = arith.constant 0 : index
    %16 = memref.load %arg7[%c0_13] : memref<1xf32, #tpu.memory_space<smem>>
    %17 = vector.broadcast %16 : f32 to vector<8x256xf32>
    %18 = arith.addf %15, %17 : vector<8x256xf32>
    %c0_14 = arith.constant 0 : index
    %c0_15 = arith.constant 0 : index
    %19 = vector.load %arg8[%c0_14, %c0_15] : memref<8x256xf32, #tpu.memory_space<vmem>>, vector<8x256xf32>
    tpu.vector_store %arg8[%c0_14, %c0_15], %18 {strides = array<i32>} : memref<8x256xf32, #tpu.memory_space<vmem>>, vector<8x256xf32>,
    return
  }
  func.func @transform_0(%arg0: i32) -> (i32, i32) {
    %c0_i32 = arith.constant 0 : i32
    %c0_i32_0 = arith.constant 0 : i32
    return %arg0, %c0_i32 : i32, i32
  }
  func.func @transform_1(%arg0: i32) -> (i32, i32) {
    %c0_i32 = arith.constant 0 : i32
    %c0_i32_0 = arith.constant 0 : i32
    %c0_i32_1 = arith.constant 0 : i32
    return %c0_i32, %c0_i32_0 : i32, i32
  }
  func.func @transform_2(%arg0: i32) -> (i32, i32) {
    %c0_i32 = arith.constant 0 : i32
    %c0_i32_0 = arith.constant 0 : i32
    %c0_i32_1 = arith.constant 0 : i32
    return %c0_i32, %c0_i32_0 : i32, i32
  }
  func.func @transform_3(%arg0: i32) -> (i32, i32) {
    %c0_i32 = arith.constant 0 : i32
    %c0_i32_0 = arith.constant 0 : i32
    %c0_i32_1 = arith.constant 0 : i32
    return %c0_i32, %c0_i32_0 : i32, i32
  }
  func.func @transform_4(%arg0: i32) -> (i32, i32) {
    %c0_i32 = arith.constant 0 : i32
    %c0_i32_0 = arith.constant 0 : i32
    %c0_i32_1 = arith.constant 0 : i32
    return %c0_i32, %c0_i32_0 : i32, i32
  }
  func.func @transform_5(%arg0: i32) -> (i32, i32) {
    %c0_i32 = arith.constant 0 : i32
    %c0_i32_0 = arith.constant 0 : i32
    %c0_i32_1 = arith.constant 0 : i32
    return %c0_i32, %c0_i32_0 : i32, i32
  }
  func.func @transform_6(%arg0: i32) -> i32 {
    %c0_i32 = arith.constant 0 : i32
    %c0_i32_0 = arith.constant 0 : i32
    return %c0_i32 : i32
  }
  func.func @transform_7(%arg0: i32) -> (i32, i32) {
    %c0_i32 = arith.constant 0 : i32
    %c0_i32_0 = arith.constant 0 : i32
    return %arg0, %c0_i32 : i32, i32
  }
}

</mosaic_0001>

<bundles_post_ra>
// kernel: tpu_custom_call.1
= control target key start
LH: loop header
LB: loop body
LE: loop exit
PB: predicated region body
PF: predicated region fallthrough
CT: control target
= control target key end

     0   :  { %s11926_s0 = inlined_call_operand.hbm [shape: bf16[512,768], index: 0, kind: input, shape index: {}]   ;;  %s11927_s1 = inlined_call_operand.hbm [shape: bf16[768,1024], index: 1, kind: input, shape index: {}]   ;;  %s11928_s2 = inlined_call_operand.hbm [shape: f32[1,1024], index: 2, kind: input, shape index: {}]   ;;  %s11929_s3 = inlined_call_operand.hbm [shape: bf16[1024,128], index: 3, kind: input, shape index: {}]   ;;  %s11930_s4 = inlined_call_operand.hbm [shape: f32[1,128], index: 4, kind: input, shape index: {}]   ;;  %s11931_s5 = inlined_call_operand.hbm [shape: bf16[8,128], index: 5, kind: input, shape index: {}]   ;;  %s11932_s6 = inlined_call_operand.<no memory space> [shape: f32[1], index: 6, kind: input, shape index: {}]   ;;  %s11933_s7 = inlined_call_operand.hbm [shape: f32[16,256], index: 7, kind: output, shape index: {}]  }
   0x1   :  { %12 = sst [smem:[#allocation2]] %s11932_s6 }
   0x2   :  { %13 = vsyncpa [#allocation4], 0 }
   0x3   :  { %15 = vsyncpa [#allocation4 + $0x1], 0 }
   0x4   :  { %16 = vsyncpa [#allocation7], 0 }
   0x5   :  { %17 = vsyncpa [#allocation10], 0 }
   0x6   :  { %18 = vsyncpa [#allocation13], 0 }
   0x7   :  { %19 = vsyncpa [#allocation5], 0 }
   0x8   :  { %21 = vsyncpa [#allocation5 + $0x1], 0  ;;  %s9612_s26 = smov 0   ;;  %s9614_s27 = smov 0  }
   0x9   :  { %s9616_s28 = smov 0   ;;  %s9618_s29 = smov 0  }
   0xa LB: > { %s9556_s6 = smov [#allocation6]   ;;  %s9633_s8 = sadd.s32 4294967295, %s9554_s29   ;;  %s9554_s29 = sphi %s9618_s29, %s12289_s29   ;;  %s9550_s28 = sphi %s9616_s28, %s12288_s28   ;;  %s9546_s27 = sphi %s9614_s27, %s12287_s27   ;;  %s9542_s26 = sphi %s9612_s26, %s12286_s26  }
   0xb   : > { %s222_s30 = sshll.u32 %s9556_s6, 4  ;;  %p7093_p0 = scmp.ge.s32.totalorder %s9554_s29, 1  ;;  %s9638_s30 = int_to_ptr.vmem [resolvable:$true] %s222_s30 }
   0xc   : > { %p11934_p1 = scmp.eq.s32.totalorder %s9633_s8, 0  ;;  %p210_p2 = scmp.lt.s32.totalorder %s9554_s29, 3 }
   0xd   : > { %s9557_s10 = smov [#allocation9]   ;;  %s9558_s13 = smov [#allocation8]  }
   0xe   : > { %p9640_p3 = pnand %p7093_p0, %p210_p2  ;;  %s246_s11 = sshll.u32 %s9557_s10, 4  ;;  %s9653_s11 = int_to_ptr.vmem [resolvable:$true] %s246_s11 }
   0xf   : > { %s9655_s14 = sshll.u32 %s9558_s13, 4  ;;  %s9306_s17 = scalar_lea.hbm %s11927_s1, 49152  ;;  %s237_s14 = int_to_ptr.vmem [resolvable:$true] %s9655_s14 }
  0x10   : > { %s12017_s9 = scalar_select %p9640_p3, 1, 0 }
  0x11   : > { %p8922_p5 = pneg %p9640_p3  ;;  %p9307_p7 = scmp.ne.s32.totalorder %s11927_s1, %s9306_s17 }
  0x12   : > { %p9313_p11 = scmp.lt.u32.totalorder %s9306_s17, %s11927_s1 }
  0x13   : > { %p9649_p6 = pnand %p8922_p5, %p11934_p1 }
  0x15   : > { %p9665_p8 = pneg %p9649_p6 }
  0x17   : > { %p9309_p9 = pnand %p9665_p8, %p9307_p7 }
  0x19   : > { %p9310_p10 = pneg %p9309_p9 }
  0x1b   : > { %p9315_p12 = pnand %p9313_p11, %p9310_p10 }
  0x1d   : > { %9318 = shalt.err (!%p9315_p12)
}
  0x1e   : > { %s9319_s23 = scalar_lea.vmem %s9638_s30, 49152  ;;  %p9327_p5 = scmp.lt.s32.totalorder %s9638_s30, %s9638_s30 }
  0x1f   : > { %p9320_p13 = scmp.ne.s32.totalorder %s9638_s30, %s9319_s23  ;;  %p9328_p4 = scmp.lt.s32.totalorder %s9319_s23, %s9319_s23 }
  0x21   : > { %p9322_p0 = pnand %p9320_p13, %p9665_p8  ;;  %p9329_p7 = por %p9328_p4, %p9327_p5 }
  0x23   : > { %p9323_p2 = pneg %p9322_p0 }
  0x25   : > { %p9330_p9 = pnand %p9329_p7, %p9323_p2 }
  0x27   : > { %9333 = shalt.err (!%p9330_p9)
}
  0x28   : > { %s9559_s24 = smov 512   ;;  %s9560_s25 = smov 32  }
  0x29   : > { %8925 = dma.hbm_to_vmem [thread:$0]  (!%p9649_p6), %s11927_s1, 49152, %s9638_s30, [#allocation7], %s9559_s24, %s9559_s24, %s9560_s25  }
  0x2a   : > { %s9334_s16 = scalar_lea.hbm %s11929_s3, 8192 }
  0x2b   : > { %p9335_p4 = scmp.ne.s32.totalorder %s11929_s3, %s9334_s16  ;;  %p9341_p12 = scmp.lt.u32.totalorder %s9334_s16, %s11929_s3 }
  0x2d   : > { %p9337_p10 = pnand %p9335_p4, %p9665_p8 }
  0x2f   : > { %p9338_p11 = pneg %p9337_p10 }
  0x31   : > { %p9343_p13 = pnand %p9341_p12, %p9338_p11 }
  0x33   : > { %9346 = shalt.err (!%p9343_p13)
}
  0x34   : > { %s9347_s30 = scalar_lea.vmem %s9653_s11, 8192  ;;  %p9355_p7 = scmp.lt.s32.totalorder %s9653_s11, %s9653_s11 }
  0x35   : > { %p9348_p0 = scmp.ne.s32.totalorder %s9653_s11, %s9347_s30  ;;  %p9356_p9 = scmp.lt.s32.totalorder %s9347_s30, %s9347_s30 }
  0x37   : > { %p9350_p2 = pnand %p9348_p0, %p9665_p8  ;;  %p9357_p4 = por %p9356_p9, %p9355_p7 }
  0x39   : > { %p9351_p5 = pneg %p9350_p2 }
  0x3b   : > { %p9358_p10 = pnand %p9357_p4, %p9351_p5 }
  0x3d   : > { %9361 = shalt.err (!%p9358_p10)
}
  0x3e   : > { %s9561_s22 = smov 64   ;;  %s9562_s23 = smov 4  }
  0x3f   : > { %8931 = dma.hbm_to_vmem [thread:$0]  (!%p9649_p6), %s11929_s3, 8192, %s9653_s11, [#allocation10], %s9561_s22, %s9561_s22, %s9562_s23  }
  0x40   : > { %s9362_s13 = scalar_lea.hbm %s11928_s2, 128 }
  0x41   : > { %p9363_p11 = scmp.ne.s32.totalorder %s11928_s2, %s9362_s13  ;;  %p9369_p0 = scmp.lt.u32.totalorder %s9362_s13, %s11928_s2 }
  0x43   : > { %p9365_p12 = pnand %p9363_p11, %p9665_p8 }
  0x45   : > { %p9366_p13 = pneg %p9365_p12 }
  0x47   : > { %p9371_p2 = pnand %p9369_p0, %p9366_p13 }
  0x49   : > { %9374 = shalt.err (!%p9371_p2)
}
  0x4a   : > { %s9375_s19 = scalar_lea.vmem %s237_s14, 128  ;;  %p9383_p4 = scmp.lt.s32.totalorder %s237_s14, %s237_s14 }
  0x4b   : > { %p9376_p5 = scmp.ne.s32.totalorder %s237_s14, %s9375_s19  ;;  %p9384_p10 = scmp.lt.s32.totalorder %s9375_s19, %s9375_s19 }
  0x4d   : > { %p9378_p7 = pnand %p9376_p5, %p9665_p8  ;;  %p9385_p1 = por %p9384_p10, %p9383_p4 }
  0x4f   : > { %p9379_p9 = pneg %p9378_p7 }
  0x51   : > { %p9386_p3 = pnand %p9385_p1, %p9379_p9 }
  0x53   : > { %9389 = shalt.err (!%p9386_p3)
}
  0x54   : > { %8928 = dma.hbm_to_vmem [thread:$0]  (!%p9649_p6), %s11928_s2, 128, %s237_s14, [#allocation7]  }
  0x55   : > { %s9563_s30 = smov [#allocation11]   ;;  %s9564_s23 = smov [#allocation12]  }
  0x56   : > { %s260_s22 = sshll.u32 %s9563_s30, 4  ;;  %s271_s24 = sshll.u32 %s9564_s23, 4  ;;  %s261_s22 = int_to_ptr.vmem [resolvable:$true] %s260_s22  ;;  %s272_s24 = int_to_ptr.vmem [resolvable:$true] %s271_s24 }
  0x57   : > { %s9390_s10 = scalar_lea.hbm %s11930_s4, 16 }
  0x58   : > { %p9391_p1 = scmp.ne.s32.totalorder %s11930_s4, %s9390_s10  ;;  %p9397_p12 = scmp.lt.u32.totalorder %s9390_s10, %s11930_s4 }
  0x5a   : > { %p9393_p3 = pnand %p9391_p1, %p9665_p8 }
  0x5c   : > { %p9394_p11 = pneg %p9393_p3 }
  0x5e   : > { %p9399_p13 = pnand %p9397_p12, %p9394_p11 }
  0x60   : > { %9402 = shalt.err (!%p9399_p13)
}
  0x61   : > { %s9403_s14 = scalar_lea.vmem %s261_s22, 16  ;;  %s9410_s18 = scalar_lea.vmem %s261_s22, 32 }
  0x62   : > { %p9404_p0 = scmp.ne.s32.totalorder %s261_s22, %s9403_s14  ;;  %p9411_p7 = scmp.lt.s32.totalorder %s261_s22, %s261_s22 }
  0x63   : > { %p9412_p9 = scmp.lt.s32.totalorder %s9410_s18, %s9403_s14 }
  0x64   : > { %p9406_p2 = pnand %p9404_p0, %p9665_p8 }
  0x65   : > { %p9413_p4 = por %p9412_p9, %p9411_p7 }
  0x66   : > { %p9407_p5 = pneg %p9406_p2 }
  0x68   : > { %p9414_p10 = pnand %p9413_p4, %p9407_p5 }
  0x6a   : > { %9417 = shalt.err (!%p9414_p10)
}
  0x6b   : > { %8934 = dma.hbm_to_vmem [thread:$0]  (!%p9649_p6), %s11930_s4, 16, %s261_s22, [#allocation10]  }
  0x6c   : > { %s9418_s23 = scalar_lea.hbm %s11931_s5, 64 }
  0x6d   : > { %p9419_p1 = scmp.ne.s32.totalorder %s11931_s5, %s9418_s23  ;;  %p9425_p12 = scmp.lt.u32.totalorder %s9418_s23, %s11931_s5 }
  0x6f   : > { %p9421_p3 = pnand %p9419_p1, %p9665_p8 }
  0x71   : > { %p9422_p11 = pneg %p9421_p3 }
  0x73   : > { %p9427_p13 = pnand %p9425_p12, %p9422_p11 }
  0x75   : > { %9430 = shalt.err (!%p9427_p13)
}
  0x76   : > { %s9431_s15 = scalar_lea.vmem %s272_s24, 64  ;;  %p9439_p7 = scmp.lt.s32.totalorder %s272_s24, %s272_s24 }
  0x77   : > { %p9432_p0 = scmp.ne.s32.totalorder %s272_s24, %s9431_s15  ;;  %p9440_p9 = scmp.lt.s32.totalorder %s9431_s15, %s9431_s15 }
  0x79   : > { %p9434_p2 = pnand %p9432_p0, %p9665_p8  ;;  %p9441_p4 = por %p9440_p9, %p9439_p7 }
  0x7b   : > { %p9435_p5 = pneg %p9434_p2 }
  0x7d   : > { %p9442_p10 = pnand %p9441_p4, %p9435_p5 }
  0x7f   : > { %9445 = shalt.err (!%p9442_p10)
}
  0x80   : > { %8937 = dma.hbm_to_vmem [thread:$0]  (!%p9649_p6), %s11931_s5, 64, %s272_s24, [#allocation13]  }
  0x81   : > { %s7092_s20 = sadd.s32 4294967294, %s9554_s29   ;;  %s9766_s12 = sadd.s32 1, %s9554_s29  }
  0x82   : > { %s34_s17 = sadd.s32 1, %s9550_s28  ;;  %s31_s14 = ssub.s32 %s9554_s29, %s9766_s12 }
  0x83   : > { %p41_p8 = scmp.ne.s32.totalorder %s9550_s28, %s9546_s27  ;;  %p32_p1 = scmp.eq.s32.totalorder %s31_s14, 0 }
  0x84   : > { %p42_p3 = scmp.eq.s32.totalorder %s9554_s29, 0  ;;  %p47_p11 = scmp.ne.s32.totalorder %s9546_s27, %s9542_s26 }
  0x85   : > { %p197_p12 = scmp.eq.s32.totalorder %s9633_s8, 1  ;;  %p12020_p0 = scmp.eq.s32.totalorder %s9633_s8, 0 }
  0x86   : > { %s9778_s18 = scalar_select %p32_p1, %s9550_s28, %s34_s17  }
  0x87   : > { %p43_p13 = por %p42_p3, %p41_p8  ;;  %p9782_p2 = por %p12020_p0, %p47_p11 }
  0x88   : > { %p9786_p6 = por %p197_p12, %p41_p8  ;;  %p203_p5 = scmp.eq.s32.totalorder %s7092_s20, 1 }
  0x89   : > { %p8951_p7 = scmp.lt.s32.totalorder %s9554_s29, 2  ;;  %s285_s11 = sand.u32 1, %s9550_s28  }
  0x8a   : > { %s12022_s24 = scalar_select %p9786_p6, 1, 0 }
  0x8b   : > { %p9792_p9 = por %p203_p5, %p47_p11  ;;  %s8895_s30 = smul.u32 768, %s285_s11 }
  0x8c   : > { %p9796_p4 = pnand %p8951_p7, %p43_p13  ;;  %s8896_s25 = smul.u32 12288, %s9554_s29 }
  0x8d   : > { %s12023_s21 = scalar_select %p9792_p9, 1, 0 }
  0x8e   : > { %s9804_s13 = scalar_lea.hbm %s11926_s0, %s8896_s25  ;;  %s289_s15 = scalar_lea.vmem [#allocation3], %s8895_s30 }
  0x8f   : > { %s297_s22 = sshll.u32 %s289_s15, 4  ;;  %s9808_s16 = scalar_lea.sflag [#allocation4], %s285_s11  ;;  %s9806_s22 = int_to_ptr.vmem [resolvable:$true] %s297_s22 }
  0x90   : > { %s9446_s20 = scalar_lea.hbm %s9804_s13, 12288  ;;  %p9448_p8 = pneg %p9796_p4 }
  0x91   : > { %p9447_p10 = scmp.ne.s32.totalorder %s9804_s13, %s9446_s20  ;;  %s9451_s25 = scalar_lea.hbm %s11926_s0, 24576 }
  0x92   : > { %p9452_p11 = scmp.lt.u32.totalorder %s9804_s13, %s11926_s0  ;;  %p9453_p12 = scmp.lt.u32.totalorder %s9451_s25, %s9446_s20 }
  0x93   : > { %p9449_p1 = pnand %p9448_p8, %p9447_p10  ;;  %p9455_p0 = scmp.lt.u32.totalorder %s9446_s20, %s9804_s13 }
  0x94   : > { %p9454_p13 = por %p9453_p12, %p9452_p11 }
  0x95   : > { %p9450_p3 = pneg %p9449_p1 }
  0x96   : > { %p9456_p5 = por %p9455_p0, %p9454_p13 }
  0x98   : > { %p9457_p7 = pnand %p9456_p5, %p9450_p3 }
  0x9a   : > { %9460 = shalt.err (!%p9457_p7)
}
  0x9b   : > { %s9461_s11 = scalar_lea.vmem %s9806_s22, 12288  ;;  %s9565_s30 = smov [#allocation3]  }
  0x9c   : > { %p9462_p10 = scmp.ne.s32.totalorder %s9806_s22, %s9461_s11  ;;  %s9466_s15 = sshll.u32 %s9565_s30, 4  ;;  %s9467_s15 = int_to_ptr.vmem [resolvable:$false] %s9466_s15 }
  0x9d   : > { %s9468_s17 = scalar_lea.vmem %s9467_s15, 24576  ;;  %p9469_p6 = scmp.lt.s32.totalorder %s9806_s22, %s9467_s15 }
  0x9e   : > { %p9464_p1 = pnand %p9462_p10, %p9448_p8  ;;  %p9470_p11 = scmp.lt.s32.totalorder %s9468_s17, %s9461_s11 }
  0xa0   : > { %p9465_p9 = pneg %p9464_p1  ;;  %p9471_p12 = por %p9470_p11, %p9469_p6 }
  0xa2   : > { %p9472_p13 = pnand %p9471_p12, %p9465_p9 }
  0xa4   : > { %9475 = shalt.err (!%p9472_p13)
}
  0xa5   : > { %s9566_s20 = smov 384   ;;  %s9567_s14 = smov 24  }
  0xa6   : > { %8941 = dma.hbm_to_vmem [thread:$0]  (!%p9796_p4), %s9804_s13, 12288, %s9806_s22, %s9808_s16, %s9566_s20, %s9566_s20, %s9567_s14  }
  0xa7   : > { %p12025_p8 = scmp.ne.s32.totalorder %s12017_s9, 0 }
  0xa9   : > { %309 = sbr.rel (%p12025_p8) target bundleno = 1735 (0x6c7), region = 48 }
  0xb0   : > { %s9839_s25 = sand.u32 1, %s9546_s27  }
  0xb1   : > { %s8897_s6 = smul.u32 768, %s9839_s25  ;;  %s312_s10 = scalar_lea.sflag [#allocation4], %s9839_s25 }
  0xb3   : > { %s9843_s11 = scalar_lea.vmem [#allocation3], %s8897_s6 }
  0xb4   : > { %9521 = dma.done.wait (%p9782_p2), %s312_s10, 12288  }
  0xb5   : > { %9523 = vsyncadd (%p9782_p2), %s312_s10, 4294955008  ;;  %p12026_p6 = scmp.eq.s32.totalorder %s9633_s8, 0 }
  0xb7   : > { %9525 = dma.done.wait (%p12026_p6), [#allocation7], 49280   ;;  %p12027_p9 = pmov %p12026_p6 }
  0xb8   : > { %p12028_p4 = pmov %p12026_p6 }
  0xb9   : > { %9527 = vsyncadd (%p12027_p9), [#allocation7], 4294918016 }
  0xba   : > { %9529 = dma.done.wait (%p12028_p4), [#allocation10], 8208   ;;  %p12029_p3 = pmov %p12028_p4 }
  0xbc   : > { %9531 = vsyncadd (%p12029_p3), [#allocation10], 4294959088  ;;  %p12030_p0 = pmov %p12029_p3 }
  0xbe   : > { %9533 = dma.done.wait (%p12030_p0), [#allocation13], 64   ;;  %p12031_p5 = pmov %p12030_p0 }
  0xbf   : > { %v464_v0 = vld [vmem:[#allocation6] sm:$0xff]  ;;  %v465_v2 = vld [vmem:[#allocation6 + $0x8] sm:$0xff]  ;;  %s6914_s9 = sld [smem:[#allocation2]]  ;;  %s7109_s19 = sshll.u32 %s9839_s25, 4 }
  0xc0   : > { %9535 = vsyncadd (%p12031_p5), [#allocation13], 4294967232  ;;  %v468_v1 = vld [vmem:[#allocation6 + $0x20] sm:$0xff]  ;;  %v469_v4 = vld [vmem:[#allocation6 + $0x28] sm:$0xff]  ;;  %s7660_s23 = sshll.u32 %s9633_s8, 8  ;;  %s365_s13 = scalar_lea.vmem [#allocation14], %s7109_s19 }
  0xc1   : > { %v7207_v3 = vcombine.high %v464_v0, %v468_v1  ;;  %v7206_v5 = vcombine.low %v464_v0, %v468_v1  ;;  %v472_v6 = vld [vmem:[#allocation6 + $0x40] sm:$0xff]  ;;  %v7209_v8 = vcombine.high %v465_v2, %v469_v4  ;;  %v7208_v9 = vcombine.low %v465_v2, %v469_v4  ;;  %v473_v11 = vld [vmem:[#allocation6 + $0x48] sm:$0xff]  ;;  %s6974_s22 = sshll.u32 %s365_s13, 4  ;;  %s11882_s15 = scalar_lea.hbm %s11933_s7, %s7660_s23  ;;  %s11884_s22 = int_to_ptr.vmem [resolvable:$true] %s6974_s22 }
  0xc2   : > { %v476_v7 = vld [vmem:[#allocation6 + $0x60] sm:$0xff]  ;;  %v477_v12 = vld [vmem:[#allocation6 + $0x68] sm:$0xff]  ;;  %s6960_s8 = scalar_lea.sflag [#allocation5], %s9839_s25  ;;  %s9476_s17 = scalar_lea.vmem %s11884_s22, 256 }
  0xc3   : > { %v7215_v10 = vcombine.high %v472_v6, %v476_v7  ;;  %v480_v13 = vld [vmem:[#allocation6 + $0x80] sm:$0xff]  ;;  %3290 = vmatprep.subr.bf16.mxu0 %v7207_v3  ;;  %v7217_v14 = vcombine.high %v473_v11, %v477_v12  ;;  %v481_v16 = vld [vmem:[#allocation6 + $0x88] sm:$0xff]  ;;  %3869 = vmatprep.subr.bf16.mxu1 %v7209_v8  ;;  %v7214_v18 = vcombine.low %v472_v6, %v476_v7  ;;  %p9477_p2 = scmp.ne.s32.totalorder %s11884_s22, %s9476_s17  ;;  %p12283_p7 = scmp.ne.s32.totalorder %s12022_s24, 0 }
  0xc4   : > { %v484_v15 = vld [vmem:[#allocation6 + $0xa0] sm:$0xff]  ;;  %v485_v17 = vld [vmem:[#allocation6 + $0xa8] sm:$0xff]  ;;  %3291 = vmatpush1.bf16.msra.mxu0 %v7206_v5  ;;  %3870 = vmatpush1.bf16.msra.mxu1 %v7208_v9  ;;  %v7216_v19 = vcombine.low %v473_v11, %v477_v12  ;;  %s9568_s20 = smov [#allocation14]  }
  0xc5   : > { %3292 = vmatprep.subr.bf16.mxu0 %v7215_v10  ;;  %v7223_v20 = vcombine.high %v480_v13, %v484_v15  ;;  %3871 = vmatprep.subr.bf16.mxu1 %v7217_v14  ;;  %v7225_v21 = vcombine.high %v481_v16, %v485_v17  ;;  %v488_v22 = vld [vmem:[#allocation6 + $0xc0] sm:$0xff]  ;;  %v489_v24 = vld [vmem:[#allocation6 + $0xc8] sm:$0xff]  ;;  %v7222_v26 = vcombine.low %v480_v13, %v484_v15  ;;  %p9478_p10 = pnand %p9477_p2, %p12283_p7  ;;  %s9480_s14 = sshll.u32 %s9568_s20, 4  ;;  %s9481_s14 = int_to_ptr.vmem [resolvable:$false] %s9480_s14 }
  0xc6   : > { %v492_v23 = vld [vmem:[#allocation6 + $0xe0] sm:$0xff]  ;;  %v493_v25 = vld [vmem:[#allocation6 + $0xe8] sm:$0xff]  ;;  %v7224_v27 = vcombine.low %v481_v16, %v485_v17  ;;  %s9482_s6 = scalar_lea.vmem %s9481_s14, 512  ;;  %p9483_p11 = scmp.lt.s32.totalorder %s11884_s22, %s9481_s14 }
  0xc7   : > { %v7231_v28 = vcombine.high %v488_v22, %v492_v23  ;;  %v7233_v29 = vcombine.high %v489_v24, %v493_v25  ;;  %v496_v30 = vld [vmem:[#allocation6 + $0x100] sm:$0xff]  ;;  %v497_v32 = vld [vmem:[#allocation6 + $0x108] sm:$0xff]  ;;  %v7230_v34 = vcombine.low %v488_v22, %v492_v23  ;;  %v7232_v35 = vcombine.low %v489_v24, %v493_v25  ;;  %p9479_p1 = pneg %p9478_p10  ;;  %p9484_p12 = scmp.lt.s32.totalorder %s9482_s6, %s9476_s17 }
  0xc8   : > { %3293 = vmatpush1.bf16.msra.mxu0 %v7214_v18  ;;  %3872 = vmatpush1.bf16.msra.mxu1 %v7216_v19  ;;  %v500_v31 = vld [vmem:[#allocation6 + $0x120] sm:$0xff]  ;;  %v501_v33 = vld [vmem:[#allocation6 + $0x128] sm:$0xff] }
  0xc9   : > { %3294 = vmatprep.subr.bf16.mxu0 %v7223_v20  ;;  %3873 = vmatprep.subr.bf16.mxu1 %v7225_v21  ;;  %v7239_v36 = vcombine.high %v496_v30, %v500_v31  ;;  %v7241_v37 = vcombine.high %v497_v32, %v501_v33  ;;  %v504_v38 = vld [vmem:[#allocation6 + $0x140] sm:$0xff]  ;;  %v505_v40 = vld [vmem:[#allocation6 + $0x148] sm:$0xff]  ;;  %v7238_v42 = vcombine.low %v496_v30, %v500_v31  ;;  %p9485_p13 = por %p9484_p12, %p9483_p11 }
  0xca   : > { %v508_v39 = vld [vmem:[#allocation6 + $0x160] sm:$0xff]  ;;  %v509_v41 = vld [vmem:[#allocation6 + $0x168] sm:$0xff]  ;;  %v7240_v43 = vcombine.low %v497_v32, %v501_v33 }
  0xcb   : > { %v7247_v44 = vcombine.high %v504_v38, %v508_v39  ;;  %v7249_v45 = vcombine.high %v505_v40, %v509_v41  ;;  %v512_v46 = vld [vmem:[#allocation6 + $0x180] sm:$0xff]  ;;  %v513_v48 = vld [vmem:[#allocation6 + $0x188] sm:$0xff]  ;;  %v7246_v50 = vcombine.low %v504_v38, %v508_v39  ;;  %v7248_v51 = vcombine.low %v505_v40, %v509_v41  ;;  %p9486_p8 = pnand %p9485_p13, %p9479_p1 }
  0xcc   : > { %3295 = vmatpush1.bf16.msra.mxu0 %v7222_v26  ;;  %3874 = vmatpush1.bf16.msra.mxu1 %v7224_v27  ;;  %v516_v47 = vld [vmem:[#allocation6 + $0x1a0] sm:$0xff]  ;;  %v517_v49 = vld [vmem:[#allocation6 + $0x1a8] sm:$0xff] }
  0xcd   : > { %3296 = vmatprep.subr.bf16.mxu0 %v7231_v28  ;;  %3875 = vmatprep.subr.bf16.mxu1 %v7233_v29  ;;  %v7255_v52 = vcombine.high %v512_v46, %v516_v47  ;;  %v520_v53 = vld [vmem:[#allocation6 + $0x1c0] sm:$0xff]  ;;  %v7257_v54 = vcombine.high %v513_v48, %v517_v49  ;;  %v521_v57 = vld [vmem:[#allocation6 + $0x1c8] sm:$0xff]  ;;  %v7254_v59 = vcombine.low %v512_v46, %v516_v47 }
  0xce   : > { %v524_v55 = vld [vmem:[#allocation6 + $0x1e0] sm:$0xff]  ;;  %v525_v58 = vld [vmem:[#allocation6 + $0x1e8] sm:$0xff]  ;;  %v7256_v60 = vcombine.low %v513_v48, %v517_v49 }
  0xcf   : > { %v9001_v56 = vld [vmem:[%s9843_s11 + $0x4] ss:$24 sps:$4 sm:$0xff]   ;;  %v7263_v61 = vcombine.high %v520_v53, %v524_v55  ;;  %v7265_v62 = vcombine.high %v521_v57, %v525_v58  ;;  %v529_v1 = vld [vmem:[#allocation6 + $0x208] sm:$0xff]  ;;  %v7262_v3 = vcombine.low %v520_v53, %v524_v55  ;;  %v7264_v4 = vcombine.low %v521_v57, %v525_v58 }
  0xd0   : > { %3297 = vmatpush1.bf16.msra.mxu0 %v7230_v34  ;;  %3876 = vmatpush1.bf16.msra.mxu1 %v7232_v35  ;;  %v528_v63 = vld [vmem:[#allocation6 + $0x200] sm:$0xff]  ;;  %v533_v2 = vld [vmem:[#allocation6 + $0x228] sm:$0xff] }
  0xd1   : > { %3298 = vmatprep.subr.bf16.mxu0 %v7239_v36  ;;  %3877 = vmatprep.subr.bf16.mxu1 %v7241_v37  ;;  %v532_v0 = vld [vmem:[#allocation6 + $0x220] sm:$0xff]  ;;  %v7273_v6 = vcombine.high %v529_v1, %v533_v2  ;;  %v537_v9 = vld [vmem:[#allocation6 + $0x248] sm:$0xff]  ;;  %v7272_v12 = vcombine.low %v529_v1, %v533_v2 }
  0xd2   : > { %3322 = vmatprep.mubr.bf16.mxu0 %v9001_v56  ;;  %3901 = vmatprep.mubr.bf16.mxu1 %v9001_v56  ;;  %v7271_v5 = vcombine.high %v528_v63, %v532_v0  ;;  %v536_v7 = vld [vmem:[#allocation6 + $0x240] sm:$0xff]  ;;  %v541_v10 = vld [vmem:[#allocation6 + $0x268] sm:$0xff]  ;;  %v7270_v11 = vcombine.low %v528_v63, %v532_v0 }
  0xd3   : > { %v540_v8 = vld [vmem:[#allocation6 + $0x260] sm:$0xff]  ;;  %v7281_v14 = vcombine.high %v537_v9, %v541_v10  ;;  %v545_v17 = vld [vmem:[#allocation6 + $0x288] sm:$0xff]  ;;  %v7280_v20 = vcombine.low %v537_v9, %v541_v10 }
  0xd4   : > { %3299 = vmatpush1.bf16.msra.mxu0 %v7238_v42  ;;  %3878 = vmatpush1.bf16.msra.mxu1 %v7240_v43  ;;  %v7279_v13 = vcombine.high %v536_v7, %v540_v8  ;;  %v544_v15 = vld [vmem:[#allocation6 + $0x280] sm:$0xff]  ;;  %v549_v18 = vld [vmem:[#allocation6 + $0x2a8] sm:$0xff]  ;;  %v7278_v19 = vcombine.low %v536_v7, %v540_v8 }
  0xd5   : > { %3300 = vmatprep.subr.bf16.mxu0 %v7247_v44  ;;  %3879 = vmatprep.subr.bf16.mxu1 %v7249_v45  ;;  %v548_v16 = vld [vmem:[#allocation6 + $0x2a0] sm:$0xff]  ;;  %v7289_v22 = vcombine.high %v545_v17, %v549_v18  ;;  %v553_v25 = vld [vmem:[#allocation6 + $0x2c8] sm:$0xff]  ;;  %v7288_v28 = vcombine.low %v545_v17, %v549_v18 }
  0xd6   : > { %v7287_v21 = vcombine.high %v544_v15, %v548_v16  ;;  %v552_v23 = vld [vmem:[#allocation6 + $0x2c0] sm:$0xff]  ;;  %v557_v26 = vld [vmem:[#allocation6 + $0x2e8] sm:$0xff]  ;;  %v7286_v27 = vcombine.low %v544_v15, %v548_v16 }
  0xd7   : > { %v556_v24 = vld [vmem:[#allocation6 + $0x2e0] sm:$0xff]  ;;  %v7297_v30 = vcombine.high %v553_v25, %v557_v26  ;;  %v561_v33 = vld [vmem:[#allocation6 + $0x308] sm:$0xff]  ;;  %v7296_v36 = vcombine.low %v553_v25, %v557_v26 }
  0xd8   : > { %3301 = vmatpush1.bf16.msra.mxu0 %v7246_v50  ;;  %3880 = vmatpush1.bf16.msra.mxu1 %v7248_v51  ;;  %v7295_v29 = vcombine.high %v552_v23, %v556_v24  ;;  %v560_v31 = vld [vmem:[#allocation6 + $0x300] sm:$0xff]  ;;  %v565_v34 = vld [vmem:[#allocation6 + $0x328] sm:$0xff]  ;;  %v7294_v35 = vcombine.low %v552_v23, %v556_v24 }
  0xd9   : > { %3302 = vmatprep.subr.bf16.mxu0 %v7255_v52  ;;  %3881 = vmatprep.subr.bf16.mxu1 %v7257_v54  ;;  %v564_v32 = vld [vmem:[#allocation6 + $0x320] sm:$0xff]  ;;  %v7305_v38 = vcombine.high %v561_v33, %v565_v34  ;;  %v569_v41 = vld [vmem:[#allocation6 + $0x348] sm:$0xff]  ;;  %v7304_v44 = vcombine.low %v561_v33, %v565_v34 }
  0xda   : > { %v7303_v37 = vcombine.high %v560_v31, %v564_v32  ;;  %v568_v39 = vld [vmem:[#allocation6 + $0x340] sm:$0xff]  ;;  %v573_v42 = vld [vmem:[#allocation6 + $0x368] sm:$0xff]  ;;  %v7302_v43 = vcombine.low %v560_v31, %v564_v32 }
  0xdb   : > { %v572_v40 = vld [vmem:[#allocation6 + $0x360] sm:$0xff]  ;;  %v7313_v46 = vcombine.high %v569_v41, %v573_v42  ;;  %v577_v49 = vld [vmem:[#allocation6 + $0x388] sm:$0xff]  ;;  %v7312_v52 = vcombine.low %v569_v41, %v573_v42 }
  0xdc   : > { %3303 = vmatpush1.bf16.msra.mxu0 %v7254_v59  ;;  %3882 = vmatpush1.bf16.msra.mxu1 %v7256_v60  ;;  %v7311_v45 = vcombine.high %v568_v39, %v572_v40  ;;  %v576_v47 = vld [vmem:[#allocation6 + $0x380] sm:$0xff]  ;;  %v581_v50 = vld [vmem:[#allocation6 + $0x3a8] sm:$0xff]  ;;  %v7310_v51 = vcombine.low %v568_v39, %v572_v40 }
  0xdd   : > { %3304 = vmatprep.subr.bf16.mxu0 %v7263_v61  ;;  %3883 = vmatprep.subr.bf16.mxu1 %v7265_v62  ;;  %v580_v48 = vld [vmem:[#allocation6 + $0x3a0] sm:$0xff]  ;;  %v7321_v54 = vcombine.high %v577_v49, %v581_v50  ;;  %v585_v57 = vld [vmem:[#allocation6 + $0x3c8] sm:$0xff]  ;;  %v7320_v60 = vcombine.low %v577_v49, %v581_v50 }
  0xde   : > { %v7319_v53 = vcombine.high %v576_v47, %v580_v48  ;;  %v584_v55 = vld [vmem:[#allocation6 + $0x3c0] sm:$0xff]  ;;  %v589_v58 = vld [vmem:[#allocation6 + $0x3e8] sm:$0xff]  ;;  %v7318_v59 = vcombine.low %v576_v47, %v580_v48 }
  0xdf   : > { %v588_v56 = vld [vmem:[#allocation6 + $0x3e0] sm:$0xff]  ;;  %v7329_v62 = vcombine.high %v585_v57, %v589_v58  ;;  %v593_v1 = vld [vmem:[#allocation6 + $0x408] sm:$0xff] }
  0xe0   : > { %3305 = vmatpush1.bf16.msra.mxu0 %v7262_v3  ;;  %3884 = vmatpush1.bf16.msra.mxu1 %v7264_v4  ;;  %v7327_v61 = vcombine.high %v584_v55, %v588_v56  ;;  %v592_v63 = vld [vmem:[#allocation6 + $0x400] sm:$0xff]  ;;  %v597_v2 = vld [vmem:[#allocation6 + $0x428] sm:$0xff]  ;;  %v7326_v3 = vcombine.low %v584_v55, %v588_v56  ;;  %v7328_v4 = vcombine.low %v585_v57, %v589_v58 }
  0xe1   : > { %3306 = vmatprep.subr.bf16.mxu0 %v7271_v5  ;;  %3885 = vmatprep.subr.bf16.mxu1 %v7273_v6  ;;  %v596_v0 = vld [vmem:[#allocation6 + $0x420] sm:$0xff]  ;;  %v9004_v7 = vld [vmem:[%s9843_s11 + $0x34] ss:$24 sps:$4 sm:$0xff]   ;;  %v7337_v8 = vcombine.high %v593_v1, %v597_v2  ;;  %v7336_v16 = vcombine.low %v593_v1, %v597_v2  ;;  %v9012_v57 = vld [vmem:[%s9843_s11 + $0x90] ss:$24 sps:$4 sm:$0xff]  }
  0xe2   : > { %v7335_v5 = vcombine.high %v592_v63, %v596_v0  ;;  %v9003_v6 = vld [vmem:[%s9843_s11] ss:$24 sps:$4 sm:$0xff]   ;;  %v609_v18 = vld [vmem:[#allocation6 + $0x488] sm:$0xff]  ;;  %v9007_v25 = vld [vmem:[%s9843_s11 + $0x64] ss:$24 sps:$4 sm:$0xff]  }
  0xe3   : > { %v600_v9 = vld [vmem:[#allocation6 + $0x440] sm:$0xff]  ;;  %v637_v47 = vld [vmem:[#allocation6 + $0x568] sm:$0xff] }
  0xe4   : > { %3307 = vmatpush1.bf16.msra.mxu0 %v7270_v11  ;;  %3886 = vmatpush1.bf16.msra.mxu1 %v7272_v12  ;;  %v604_v10 = vld [vmem:[#allocation6 + $0x460] sm:$0xff]  ;;  %v601_v11 = vld [vmem:[#allocation6 + $0x448] sm:$0xff] }
  0xe5   : > { %3308 = vmatprep.subr.bf16.mxu0 %v7279_v13  ;;  %3887 = vmatprep.subr.bf16.mxu1 %v7281_v14  ;;  %v605_v12 = vld [vmem:[#allocation6 + $0x468] sm:$0xff]  ;;  %v7334_v13 = vcombine.low %v592_v63, %v596_v0  ;;  %v608_v14 = vld [vmem:[#allocation6 + $0x480] sm:$0xff]  ;;  %v7343_v17 = vcombine.high %v600_v9, %v604_v10 }
  0xe6   : > { %v612_v15 = vld [vmem:[#allocation6 + $0x4a0] sm:$0xff]  ;;  %v7344_v26 = vcombine.low %v601_v11, %v605_v12  ;;  %v645_v56 = vld [vmem:[#allocation6 + $0x5a8] sm:$0xff] }
  0xe7   : > { %v616_v23 = vld [vmem:[#allocation6 + $0x4c0] sm:$0xff]  ;;  %v7350_v31 = vcombine.low %v608_v14, %v612_v15  ;;  %v649_v0 = vld [vmem:[#allocation6 + $0x5c8] sm:$0xff] }
  0xe8   : > { %3309 = vmatpush1.bf16.msra.mxu0 %v7278_v19  ;;  %3888 = vmatpush1.bf16.msra.mxu1 %v7280_v20  ;;  %v7345_v19 = vcombine.high %v601_v11, %v605_v12  ;;  %v613_v20 = vld [vmem:[#allocation6 + $0x4a8] sm:$0xff]  ;;  %v620_v24 = vld [vmem:[#allocation6 + $0x4e0] sm:$0xff] }
  0xe9   : > { %3310 = vmatprep.subr.bf16.mxu0 %v7287_v21  ;;  %3889 = vmatprep.subr.bf16.mxu1 %v7289_v22  ;;  %v9006_v21 = vld [vmem:[%s9843_s11 + $0x30] ss:$24 sps:$4 sm:$0xff]   ;;  %v7342_v22 = vcombine.low %v600_v9, %v604_v10  ;;  %v624_v32 = vld [vmem:[#allocation6 + $0x500] sm:$0xff]  ;;  %v7352_v34 = vcombine.low %v609_v18, %v613_v20  ;;  %v7358_v40 = vcombine.low %v616_v23, %v620_v24 }
  0xea   : > { %v628_v33 = vld [vmem:[#allocation6 + $0x520] sm:$0xff]  ;;  %v653_v1 = vld [vmem:[#allocation6 + $0x5e8] sm:$0xff] }
  0xeb   : > { %v9009_v39 = vld [vmem:[%s9843_s11 + $0x60] ss:$24 sps:$4 sm:$0xff]   ;;  %v7366_v49 = vcombine.low %v624_v32, %v628_v33  ;;  %v7393_v9 = vcombine.high %v649_v0, %v653_v1  ;;  %v661_v10 = vld [vmem:[#allocation6 + $0x628] sm:$0xff] }
  0xec   : > { %3311 = vmatpush1.bf16.msra.mxu0 %v7286_v27  ;;  %3890 = vmatpush1.bf16.msra.mxu1 %v7288_v28  ;;  %v7351_v27 = vcombine.high %v608_v14, %v612_v15  ;;  %v617_v28 = vld [vmem:[#allocation6 + $0x4c8] sm:$0xff]  ;;  %v632_v41 = vld [vmem:[#allocation6 + $0x540] sm:$0xff] }
  0xed   : > { %3312 = vmatprep.subr.bf16.mxu0 %v7295_v29  ;;  %3891 = vmatprep.subr.bf16.mxu1 %v7297_v30  ;;  %v621_v29 = vld [vmem:[#allocation6 + $0x4e8] sm:$0xff]  ;;  %v7353_v30 = vcombine.high %v609_v18, %v613_v20  ;;  %v636_v42 = vld [vmem:[#allocation6 + $0x560] sm:$0xff] }
  0xee   : > { %v640_v50 = vld [vmem:[#allocation6 + $0x580] sm:$0xff]  ;;  %v7374_v58 = vcombine.low %v632_v41, %v636_v42  ;;  %v9016_v15 = vld [vmem:[%s9843_s11 + $0xf4] ss:$24 sps:$4 sm:$0xff]  }
  0xef   : > { %v9015_v11 = vld [vmem:[%s9843_s11 + $0xc0] ss:$24 sps:$4 sm:$0xff]   ;;  %v665_v18 = vld [vmem:[#allocation6 + $0x648] sm:$0xff] }
  0xf0   : > { %3313 = vmatpush1.bf16.msra.mxu0 %v7294_v35  ;;  %3892 = vmatpush1.bf16.msra.mxu1 %v7296_v36  ;;  %v7359_v35 = vcombine.high %v616_v23, %v620_v24  ;;  %v625_v36 = vld [vmem:[#allocation6 + $0x508] sm:$0xff]  ;;  %v668_v14 = vld [vmem:[#allocation6 + $0x660] sm:$0xff] }
  0xf1   : > { %3314 = vmatprep.subr.bf16.mxu0 %v7303_v37  ;;  %3893 = vmatprep.subr.bf16.mxu1 %v7305_v38  ;;  %v7361_v37 = vcombine.high %v617_v28, %v621_v29  ;;  %v629_v38 = vld [vmem:[#allocation6 + $0x528] sm:$0xff]  ;;  %v676_v23 = vld [vmem:[#allocation6 + $0x6a0] sm:$0xff] }
  0xf2   : > { %v7369_v48 = vcombine.high %v625_v36, %v629_v38 }
  0xf4   : > { %3315 = vmatpush1.bf16.msra.mxu0 %v7302_v43  ;;  %3894 = vmatpush1.bf16.msra.mxu1 %v7304_v44  ;;  %v9010_v43 = vld [vmem:[%s9843_s11 + $0x94] ss:$24 sps:$4 sm:$0xff]   ;;  %v7360_v44 = vcombine.low %v617_v28, %v621_v29  ;;  %v9018_v29 = vld [vmem:[%s9843_s11 + $0xf0] ss:$24 sps:$4 sm:$0xff]  }
  0xf5   : > { %3316 = vmatprep.subr.bf16.mxu0 %v7311_v45  ;;  %3895 = vmatprep.subr.bf16.mxu1 %v7313_v46  ;;  %v7367_v45 = vcombine.high %v624_v32, %v628_v33  ;;  %v633_v46 = vld [vmem:[#allocation6 + $0x548] sm:$0xff]  ;;  %v684_v32 = vld [vmem:[#allocation6 + $0x6e0] sm:$0xff] }
  0xf6   : > { %v7377_v55 = vcombine.high %v633_v46, %v637_v47  ;;  %v677_v28 = vld [vmem:[#allocation6 + $0x6a8] sm:$0xff]  ;;  %v9019_v33 = vld [vmem:[%s9843_s11 + $0x124] ss:$24 sps:$4 sm:$0xff]  }
  0xf8   : > { %3317 = vmatpush1.bf16.msra.mxu0 %v7310_v51  ;;  %3896 = vmatpush1.bf16.msra.mxu1 %v7312_v52  ;;  %v644_v51 = vld [vmem:[#allocation6 + $0x5a0] sm:$0xff]  ;;  %v7368_v52 = vcombine.low %v625_v36, %v629_v38  ;;  %v681_v36 = vld [vmem:[#allocation6 + $0x6c8] sm:$0xff] }
  0xf9   : > { %3318 = vmatprep.subr.bf16.mxu0 %v7319_v53  ;;  %3897 = vmatprep.subr.bf16.mxu1 %v7321_v54  ;;  %v7375_v53 = vcombine.high %v632_v41, %v636_v42  ;;  %v641_v54 = vld [vmem:[#allocation6 + $0x588] sm:$0xff]  ;;  %v7383_v63 = vcombine.high %v640_v50, %v644_v51  ;;  %v692_v41 = vld [vmem:[#allocation6 + $0x720] sm:$0xff] }
  0xfa   : > { %v7385_v2 = vcombine.high %v641_v54, %v645_v56 }
  0xfc   : > { %3319 = vmatpush1.bf16.msra.mxu0 %v7318_v59  ;;  %3898 = vmatpush1.bf16.msra.mxu1 %v7320_v60  ;;  %v648_v59 = vld [vmem:[#allocation6 + $0x5c0] sm:$0xff] }
  0xfd   : > { %3320 = vmatprep.subr.bf16.mxu0 %v7327_v61  ;;  %3899 = vmatprep.subr.bf16.mxu1 %v7329_v62  ;;  %v652_v60 = vld [vmem:[#allocation6 + $0x5e0] sm:$0xff]  ;;  %v7376_v62 = vcombine.low %v633_v46, %v637_v47  ;;  %v693_v46 = vld [vmem:[#allocation6 + $0x728] sm:$0xff] }
  0xfe   : > { %v9013_v61 = vld [vmem:[%s9843_s11 + $0xc4] ss:$24 sps:$4 sm:$0xff]   ;;  %v7390_v12 = vcombine.low %v648_v59, %v652_v60  ;;  %v9021_v47 = vld [vmem:[%s9843_s11 + $0x120] ss:$24 sps:$4 sm:$0xff]  }
 0x100   : > { %3321 = vmatpush1.bf16.msra.mxu0 %v7326_v3  ;;  %3900 = vmatpush1.bf16.msra.mxu1 %v7328_v4  ;;  %v7382_v3 = vcombine.low %v640_v50, %v644_v51  ;;  %v656_v4 = vld [vmem:[#allocation6 + $0x600] sm:$0xff]  ;;  %v9022_v51 = vld [vmem:[%s9843_s11 + $0x154] ss:$24 sps:$4 sm:$0xff]  }
 0x101   : > { %3483 = vmatprep.subr.bf16.mxu0 %v7335_v5  ;;  %4062 = vmatprep.subr.bf16.mxu1 %v7337_v8  ;;  %v660_v5 = vld [vmem:[#allocation6 + $0x620] sm:$0xff]  ;;  %v657_v8 = vld [vmem:[#allocation6 + $0x608] sm:$0xff] }
 0x102   : > { %v7401_v20 = vcombine.high %v657_v8, %v661_v10  ;;  %v7400_v24 = vcombine.low %v657_v8, %v661_v10  ;;  %v700_v50 = vld [vmem:[#allocation6 + $0x760] sm:$0xff]  ;;  %v713_v8 = vld [vmem:[#allocation6 + $0x7c8] sm:$0xff] }
 0x103   : > { %3323 = vmatmul.mubr.bf16.vlgmr.msra.gmra.mrb[0].mxu0 %v9003_v6  ;;  %3902 = vmatmul.mubr.bf16.vlgmr.msra.gmra.mrb[0].mxu1 %v9003_v6  ;;  %v7384_v6 = vcombine.low %v641_v54, %v645_v56  ;;  %v697_v54 = vld [vmem:[#allocation6 + $0x748] sm:$0xff] }
 0x104   : > { %3332 = vmatprep.mubr.bf16.mxu0 %v9004_v7  ;;  %3911 = vmatprep.mubr.bf16.mxu1 %v9004_v7  ;;  %v7391_v7 = vcombine.high %v648_v59, %v652_v60  ;;  %v708_v59 = vld [vmem:[#allocation6 + $0x7a0] sm:$0xff] }
 0x105   : > { %3484 = vmatpush1.bf16.msra.mxu0 %v7334_v13  ;;  %4063 = vmatpush1.bf16.msra.mxu1 %v7336_v16  ;;  %v664_v13 = vld [vmem:[#allocation6 + $0x640] sm:$0xff]  ;;  %v7392_v16 = vcombine.low %v649_v0, %v653_v1  ;;  %v709_v0 = vld [vmem:[#allocation6 + $0x7a8] sm:$0xff] }
 0x106   : > { %3485 = vmatprep.subr.bf16.mxu0 %v7343_v17  ;;  %4064 = vmatprep.subr.bf16.mxu1 %v7345_v19  ;;  %v7399_v17 = vcombine.high %v656_v4, %v660_v5  ;;  %v669_v19 = vld [vmem:[#allocation6 + $0x668] sm:$0xff] }
 0x107   : > { %v9024_v1 = vld [vmem:[%s9843_s11 + $0x150] ss:$24 sps:$4 sm:$0xff]  }
 0x109   : > { %3486 = vmatpush1.bf16.msra.mxu0 %v7342_v22  ;;  %4065 = vmatpush1.bf16.msra.mxu1 %v7344_v26  ;;  %v672_v22 = vld [vmem:[#allocation6 + $0x680] sm:$0xff]  ;;  %v673_v26 = vld [vmem:[#allocation6 + $0x688] sm:$0xff] }
 0x10a   : > { %3487 = vmatprep.subr.bf16.mxu0 %v7351_v27  ;;  %4066 = vmatprep.subr.bf16.mxu1 %v7353_v30  ;;  %v7409_v27 = vcombine.high %v665_v18, %v669_v19  ;;  %v7406_v30 = vcombine.low %v664_v13, %v668_v14  ;;  %v7417_v38 = vcombine.high %v673_v26, %v677_v28 }
 0x10b   : > { %3333 = vmatmul.mubr.bf16.gmra.mrb[4].mxu0 %v9006_v21  ;;  %3912 = vmatmul.mubr.bf16.gmra.mrb[4].mxu1 %v9006_v21  ;;  %v7398_v21 = vcombine.low %v656_v4, %v660_v5  ;;  %v7416_v42 = vcombine.low %v673_v26, %v677_v28  ;;  %v716_v4 = vld [vmem:[#allocation6 + $0x7e0] sm:$0xff] }
 0x10c   : > { %3342 = vmatprep.mubr.bf16.mxu0 %v9007_v25  ;;  %3921 = vmatprep.mubr.bf16.mxu1 %v9007_v25  ;;  %v7407_v25 = vcombine.high %v664_v13, %v668_v14  ;;  %v9025_v5 = vld [vmem:[%s9843_s11 + $0x184] ss:$24 sps:$4 sm:$0xff]  }
 0x10d   : > { %3488 = vmatpush1.bf16.msra.mxu0 %v7350_v31  ;;  %4067 = vmatpush1.bf16.msra.mxu1 %v7352_v34  ;;  %v680_v31 = vld [vmem:[#allocation6 + $0x6c0] sm:$0xff]  ;;  %v7408_v34 = vcombine.low %v665_v18, %v669_v19 }
 0x10e   : > { %3489 = vmatprep.subr.bf16.mxu0 %v7359_v35  ;;  %4068 = vmatprep.subr.bf16.mxu1 %v7361_v37  ;;  %v7415_v35 = vcombine.high %v672_v22, %v676_v23  ;;  %v685_v37 = vld [vmem:[#allocation6 + $0x6e8] sm:$0xff]  ;;  %v9880_v19 = vld [vmem:[#allocation6 + $0x800] sm:$0xff] }
 0x10f   : > { %v9031_v28 = vld [vmem:[%s9843_s11 + $0x1e4] ss:$24 sps:$4 sm:$0xff]  }
 0x111   : > { %3490 = vmatpush1.bf16.msra.mxu0 %v7358_v40  ;;  %4069 = vmatpush1.bf16.msra.mxu1 %v7360_v44  ;;  %v688_v40 = vld [vmem:[#allocation6 + $0x700] sm:$0xff]  ;;  %v689_v44 = vld [vmem:[#allocation6 + $0x708] sm:$0xff] }
 0x112   : > { %3491 = vmatprep.subr.bf16.mxu0 %v7367_v45  ;;  %4070 = vmatprep.subr.bf16.mxu1 %v7369_v48  ;;  %v7425_v45 = vcombine.high %v681_v36, %v685_v37  ;;  %v7422_v48 = vcombine.low %v680_v31, %v684_v32  ;;  %v7433_v56 = vcombine.high %v689_v44, %v693_v46 }
 0x113   : > { %3343 = vmatmul.mubr.bf16.gmra.mrb[8].mxu0 %v9009_v39  ;;  %3922 = vmatmul.mubr.bf16.gmra.mrb[8].mxu1 %v9009_v39  ;;  %v7414_v39 = vcombine.low %v672_v22, %v676_v23  ;;  %v7432_v60 = vcombine.low %v689_v44, %v693_v46  ;;  %v9888_v23 = vld [vmem:[#allocation6 + $0x828] sm:$0xff]  ;;  %v9052_v44 = vld [vmem:[%s9843_s11 + $0x3c] ss:$24 sps:$4 sm:$0xff]  }
 0x114   : > { %3352 = vmatprep.mubr.bf16.mxu0 %v9010_v43  ;;  %3931 = vmatprep.mubr.bf16.mxu1 %v9010_v43  ;;  %v7423_v43 = vcombine.high %v680_v31, %v684_v32  ;;  %v9036_v31 = vld [vmem:[%s9843_s11 + $0x210] ss:$24 sps:$4 sm:$0xff]   ;;  %v9037_v32 = vld [vmem:[%s9843_s11 + $0x244] ss:$24 sps:$4 sm:$0xff]  }
 0x115   : > { %3492 = vmatpush1.bf16.msra.mxu0 %v7366_v49  ;;  %4071 = vmatpush1.bf16.msra.mxu1 %v7368_v52  ;;  %v696_v49 = vld [vmem:[#allocation6 + $0x740] sm:$0xff]  ;;  %v7424_v52 = vcombine.low %v681_v36, %v685_v37  ;;  %v733_v46 = vld [vmem:[#allocation6 + $0x868] sm:$0xff] }
 0x116   : > { %3493 = vmatprep.subr.bf16.mxu0 %v7375_v53  ;;  %4072 = vmatprep.subr.bf16.mxu1 %v7377_v55  ;;  %v7431_v53 = vcombine.high %v688_v40, %v692_v41  ;;  %v701_v55 = vld [vmem:[#allocation6 + $0x768] sm:$0xff]  ;;  %v9043_v36 = vld [vmem:[%s9843_s11 + $0x2a4] ss:$24 sps:$4 sm:$0xff]   ;;  %v9045_v37 = vld [vmem:[%s9843_s11 + $0x2a0] ss:$24 sps:$4 sm:$0xff]  }
 0x119   : > { %3494 = vmatpush1.bf16.msra.mxu0 %v7374_v58  ;;  %4073 = vmatpush1.bf16.msra.mxu1 %v7376_v62  ;;  %v704_v58 = vld [vmem:[#allocation6 + $0x780] sm:$0xff]  ;;  %v705_v62 = vld [vmem:[#allocation6 + $0x788] sm:$0xff] }
 0x11a   : > { %3495 = vmatprep.subr.bf16.mxu0 %v7383_v63  ;;  %4074 = vmatprep.subr.bf16.mxu1 %v7385_v2  ;;  %v7441_v63 = vcombine.high %v697_v54, %v701_v55  ;;  %v7438_v2 = vcombine.low %v696_v49, %v700_v50  ;;  %v7449_v10 = vcombine.high %v705_v62, %v709_v0 }
 0x11b   : > { %3353 = vmatmul.mubr.bf16.gmra.mrb[12].mxu0 %v9012_v57  ;;  %3932 = vmatmul.mubr.bf16.gmra.mrb[12].mxu1 %v9012_v57  ;;  %v7430_v57 = vcombine.low %v688_v40, %v692_v41  ;;  %v9051_v40 = vld [vmem:[%s9843_s11 + $0xc] ss:$24 sps:$4 sm:$0xff]   ;;  %v9049_v41 = vld [vmem:[%s9843_s11 + $0x8] ss:$24 sps:$4 sm:$0xff]  }
 0x11c   : > { %3362 = vmatprep.mubr.bf16.mxu0 %v9013_v61  ;;  %3941 = vmatprep.mubr.bf16.mxu1 %v9013_v61  ;;  %v7439_v61 = vcombine.high %v696_v49, %v700_v50  ;;  %v736_v49 = vld [vmem:[#allocation6 + $0x880] sm:$0xff] }
 0x11d   : > { %3496 = vmatpush1.bf16.msra.mxu0 %v7382_v3  ;;  %4075 = vmatpush1.bf16.msra.mxu1 %v7384_v6  ;;  %v712_v3 = vld [vmem:[#allocation6 + $0x7c0] sm:$0xff]  ;;  %v7440_v6 = vcombine.low %v697_v54, %v701_v55 }
 0x11e   : > { %3497 = vmatprep.subr.bf16.mxu0 %v7391_v7  ;;  %4076 = vmatprep.subr.bf16.mxu1 %v7393_v9  ;;  %v7447_v7 = vcombine.high %v704_v58, %v708_v59  ;;  %v717_v9 = vld [vmem:[#allocation6 + $0x7e8] sm:$0xff]  ;;  %v7455_v13 = vcombine.high %v712_v3, %v716_v4  ;;  %v740_v50 = vld [vmem:[#allocation6 + $0x8a0] sm:$0xff] }
 0x11f   : > { %v7457_v14 = vcombine.high %v713_v8, %v717_v9  ;;  %v7456_v18 = vcombine.low %v713_v8, %v717_v9  ;;  %v7479_v55 = vcombine.high %v736_v49, %v740_v50 }
 0x121   : > { %3498 = vmatpush1.bf16.msra.mxu0 %v7390_v12  ;;  %4077 = vmatpush1.bf16.msra.mxu1 %v7392_v16  ;;  %v7448_v12 = vcombine.low %v705_v62, %v709_v0  ;;  %v7454_v16 = vcombine.low %v712_v3, %v716_v4  ;;  %v749_v62 = vld [vmem:[#allocation6 + $0x8e8] sm:$0xff]  ;;  %v752_v3 = vld [vmem:[#allocation6 + $0x900] sm:$0xff] }
 0x122   : > { %3499 = vmatprep.subr.bf16.mxu0 %v7399_v17  ;;  %4078 = vmatprep.subr.bf16.mxu1 %v7401_v20  ;;  %v9028_v17 = vld [vmem:[%s9843_s11 + $0x1b4] ss:$24 sps:$4 sm:$0xff]   ;;  %v9882_v20 = vld [vmem:[#allocation6 + $0x820] sm:$0xff] }
 0x123   : > { %3363 = vmatmul.mubr.bf16.gmra.mrb[16].mxu0 %v9015_v11  ;;  %3942 = vmatmul.mubr.bf16.gmra.mrb[16].mxu1 %v9015_v11  ;;  %v7446_v11 = vcombine.low %v704_v58, %v708_v59  ;;  %v7463_v22 = vcombine.high %v9880_v19, %v9882_v20  ;;  %v744_v58 = vld [vmem:[#allocation6 + $0x8c0] sm:$0xff] }
 0x124   : > { %3372 = vmatprep.mubr.bf16.mxu0 %v9016_v15  ;;  %3951 = vmatprep.mubr.bf16.mxu1 %v9016_v15  ;;  %v9027_v15 = vld [vmem:[%s9843_s11 + $0x180] ss:$24 sps:$4 sm:$0xff]  }
 0x125   : > { %3500 = vmatpush1.bf16.msra.mxu0 %v7398_v21  ;;  %4079 = vmatpush1.bf16.msra.mxu1 %v7400_v24  ;;  %v9884_v21 = vld [vmem:[#allocation6 + $0x808] sm:$0xff]  ;;  %v7462_v24 = vcombine.low %v9880_v19, %v9882_v20  ;;  %v748_v59 = vld [vmem:[#allocation6 + $0x8e0] sm:$0xff] }
 0x126   : > { %3501 = vmatprep.subr.bf16.mxu0 %v7407_v25  ;;  %4080 = vmatprep.subr.bf16.mxu1 %v7409_v27  ;;  %v7464_v25 = vcombine.low %v9884_v21, %v9888_v23  ;;  %v7465_v26 = vcombine.high %v9884_v21, %v9888_v23  ;;  %v9030_v27 = vld [vmem:[%s9843_s11 + $0x1b0] ss:$24 sps:$4 sm:$0xff]   ;;  %v756_v4 = vld [vmem:[#allocation6 + $0x920] sm:$0xff] }
 0x127   : > { %v7495_v9 = vcombine.high %v752_v3, %v756_v4  ;;  %v768_v21 = vld [vmem:[#allocation6 + $0x980] sm:$0xff]  ;;  %v769_v23 = vld [vmem:[#allocation6 + $0x988] sm:$0xff] }
 0x129   : > { %3502 = vmatpush1.bf16.msra.mxu0 %v7406_v30  ;;  %4081 = vmatpush1.bf16.msra.mxu1 %v7408_v34  ;;  %v9034_v30 = vld [vmem:[%s9843_s11 + $0x214] ss:$24 sps:$4 sm:$0xff]  }
 0x12a   : > { %3503 = vmatprep.subr.bf16.mxu0 %v7415_v35  ;;  %4082 = vmatprep.subr.bf16.mxu1 %v7417_v38  ;;  %v9040_v34 = vld [vmem:[%s9843_s11 + $0x274] ss:$24 sps:$4 sm:$0xff]   ;;  %v9042_v35 = vld [vmem:[%s9843_s11 + $0x270] ss:$24 sps:$4 sm:$0xff]  }
 0x12b   : > { %3373 = vmatmul.mubr.bf16.gmra.mrb[20].mxu0 %v9018_v29  ;;  %3952 = vmatmul.mubr.bf16.gmra.mrb[20].mxu1 %v9018_v29  ;;  %v9033_v29 = vld [vmem:[%s9843_s11 + $0x1e0] ss:$24 sps:$4 sm:$0xff]   ;;  %v9046_v38 = vld [vmem:[%s9843_s11 + $0x2d4] ss:$24 sps:$4 sm:$0xff]  }
 0x12c   : > { %3382 = vmatprep.mubr.bf16.mxu0 %v9019_v33  ;;  %3961 = vmatprep.mubr.bf16.mxu1 %v9019_v33  ;;  %v9039_v33 = vld [vmem:[%s9843_s11 + $0x240] ss:$24 sps:$4 sm:$0xff]  }
 0x12d   : > { %3504 = vmatpush1.bf16.msra.mxu0 %v7414_v39  ;;  %4083 = vmatpush1.bf16.msra.mxu1 %v7416_v42  ;;  %v9048_v39 = vld [vmem:[%s9843_s11 + $0x2d0] ss:$24 sps:$4 sm:$0xff]   ;;  %v728_v42 = vld [vmem:[#allocation6 + $0x840] sm:$0xff] }
 0x12e   : > { %3505 = vmatprep.subr.bf16.mxu0 %v7423_v43  ;;  %4084 = vmatprep.subr.bf16.mxu1 %v7425_v45  ;;  %v732_v43 = vld [vmem:[#allocation6 + $0x860] sm:$0xff]  ;;  %v729_v45 = vld [vmem:[#allocation6 + $0x848] sm:$0xff] }
 0x12f   : > { %v7472_v54 = vcombine.low %v729_v45, %v733_v46 }
 0x131   : > { %3506 = vmatpush1.bf16.msra.mxu0 %v7422_v48  ;;  %4085 = vmatpush1.bf16.msra.mxu1 %v7424_v52  ;;  %v7473_v48 = vcombine.high %v729_v45, %v733_v46  ;;  %v741_v52 = vld [vmem:[#allocation6 + $0x8a8] sm:$0xff] }
 0x132   : > { %3507 = vmatprep.subr.bf16.mxu0 %v7431_v53  ;;  %4086 = vmatprep.subr.bf16.mxu1 %v7433_v56  ;;  %v7470_v53 = vcombine.low %v728_v42, %v732_v43  ;;  %v9054_v56 = vld [vmem:[%s9843_s11 + $0x38] ss:$24 sps:$4 sm:$0xff]   ;;  %v9063_v46 = vld [vmem:[%s9843_s11 + $0xc8] ss:$24 sps:$4 sm:$0xff]  }
 0x133   : > { %3383 = vmatmul.mubr.bf16.gmra.mrb[24].mxu0 %v9021_v47  ;;  %3962 = vmatmul.mubr.bf16.gmra.mrb[24].mxu1 %v9021_v47  ;;  %v7471_v47 = vcombine.high %v728_v42, %v732_v43  ;;  %v789_v42 = vld [vmem:[#allocation6 + $0xa28] sm:$0xff] }
 0x134   : > { %3392 = vmatprep.mubr.bf16.mxu0 %v9022_v51  ;;  %3971 = vmatprep.mubr.bf16.mxu1 %v9022_v51  ;;  %v737_v51 = vld [vmem:[#allocation6 + $0x888] sm:$0xff] }
 0x135   : > { %3508 = vmatpush1.bf16.msra.mxu0 %v7430_v57  ;;  %4087 = vmatpush1.bf16.msra.mxu1 %v7432_v60  ;;  %v7481_v57 = vcombine.high %v737_v51, %v741_v52  ;;  %v9055_v60 = vld [vmem:[%s9843_s11 + $0x6c] ss:$24 sps:$4 sm:$0xff]   ;;  %v7480_v0 = vcombine.low %v737_v51, %v741_v52 }
 0x136   : > { %3509 = vmatprep.subr.bf16.mxu0 %v7439_v61  ;;  %4088 = vmatprep.subr.bf16.mxu1 %v7441_v63  ;;  %v745_v61 = vld [vmem:[#allocation6 + $0x8c8] sm:$0xff]  ;;  %v7478_v63 = vcombine.low %v736_v49, %v740_v50  ;;  %v796_v49 = vld [vmem:[#allocation6 + $0xa60] sm:$0xff]  ;;  %v9064_v50 = vld [vmem:[%s9843_s11 + $0xfc] ss:$24 sps:$4 sm:$0xff]  }
 0x137   : > { %v7488_v8 = vcombine.low %v745_v61, %v749_v62  ;;  %v793_v51 = vld [vmem:[#allocation6 + $0xa48] sm:$0xff] }
 0x138   : > { %v797_v52 = vld [vmem:[#allocation6 + $0xa68] sm:$0xff] }
 0x139   : > { %3510 = vmatpush1.bf16.msra.mxu0 %v7438_v2  ;;  %4089 = vmatpush1.bf16.msra.mxu1 %v7440_v6  ;;  %v7489_v2 = vcombine.high %v745_v61, %v749_v62  ;;  %v757_v6 = vld [vmem:[#allocation6 + $0x928] sm:$0xff]  ;;  %v7536_v62 = vcombine.low %v793_v51, %v797_v52 }
 0x13a   : > { %3511 = vmatprep.subr.bf16.mxu0 %v7447_v7  ;;  %4090 = vmatprep.subr.bf16.mxu1 %v7449_v10  ;;  %v7486_v7 = vcombine.low %v744_v58, %v748_v59  ;;  %v9057_v10 = vld [vmem:[%s9843_s11 + $0x68] ss:$24 sps:$4 sm:$0xff]  }
 0x13b   : > { %3393 = vmatmul.mubr.bf16.gmra.mrb[28].mxu0 %v9024_v1  ;;  %3972 = vmatmul.mubr.bf16.gmra.mrb[28].mxu1 %v9024_v1  ;;  %v7487_v1 = vcombine.high %v744_v58, %v748_v59  ;;  %v804_v58 = vld [vmem:[#allocation6 + $0xaa0] sm:$0xff]  ;;  %v801_v59 = vld [vmem:[#allocation6 + $0xa88] sm:$0xff] }
 0x13c   : > { %3402 = vmatprep.mubr.bf16.mxu0 %v9025_v5  ;;  %3981 = vmatprep.mubr.bf16.mxu1 %v9025_v5  ;;  %v753_v5 = vld [vmem:[#allocation6 + $0x908] sm:$0xff] }
 0x13d   : > { %3512 = vmatpush1.bf16.msra.mxu0 %v7446_v11  ;;  %4091 = vmatpush1.bf16.msra.mxu1 %v7448_v12  ;;  %v7497_v11 = vcombine.high %v753_v5, %v757_v6  ;;  %v760_v12 = vld [vmem:[#allocation6 + $0x940] sm:$0xff] }
 0x13e   : > { %3513 = vmatprep.subr.bf16.mxu0 %v7455_v13  ;;  %4092 = vmatprep.subr.bf16.mxu1 %v7457_v14  ;;  %v764_v13 = vld [vmem:[#allocation6 + $0x960] sm:$0xff]  ;;  %v9058_v14 = vld [vmem:[%s9843_s11 + $0x9c] ss:$24 sps:$4 sm:$0xff]  }
 0x13f   : > { %v7503_v19 = vcombine.high %v760_v12, %v764_v13 }
 0x141   : > { %3514 = vmatpush1.bf16.msra.mxu0 %v7454_v16  ;;  %4093 = vmatpush1.bf16.msra.mxu1 %v7456_v18  ;;  %v765_v16 = vld [vmem:[#allocation6 + $0x968] sm:$0xff]  ;;  %v7496_v18 = vcombine.low %v753_v5, %v757_v6 }
 0x142   : > { %3676 = vmatprep.subr.bf16.mxu0 %v7463_v22  ;;  %4255 = vmatprep.subr.bf16.mxu1 %v7465_v26  ;;  %v772_v22 = vld [vmem:[#allocation6 + $0x9a0] sm:$0xff]  ;;  %v809_v5 = vld [vmem:[#allocation6 + $0xac8] sm:$0xff] }
 0x143   : > { %3403 = vmatmul.mubr.bf16.gmra.mrb[32].mxu0 %v9027_v15  ;;  %3982 = vmatmul.mubr.bf16.gmra.mrb[32].mxu1 %v9027_v15  ;;  %v761_v15 = vld [vmem:[#allocation6 + $0x948] sm:$0xff] }
 0x144   : > { %3412 = vmatprep.mubr.bf16.mxu0 %v9028_v17  ;;  %3991 = vmatprep.mubr.bf16.mxu1 %v9028_v17  ;;  %v7494_v17 = vcombine.low %v752_v3, %v756_v4  ;;  %v7505_v20 = vcombine.high %v761_v15, %v765_v16  ;;  %v7504_v26 = vcombine.low %v761_v15, %v765_v16  ;;  %v812_v3 = vld [vmem:[#allocation6 + $0xae0] sm:$0xff]  ;;  %v813_v6 = vld [vmem:[#allocation6 + $0xae8] sm:$0xff] }
 0x145   : > { %v9067_v4 = vld [vmem:[%s9843_s11 + $0x12c] ss:$24 sps:$4 sm:$0xff]   ;;  %v7552_v16 = vcombine.low %v809_v5, %v813_v6 }
 0x14b   : > { %3413 = vmatmul.mubr.bf16.gmra.mrb[36].mxu0 %v9030_v27  ;;  %3992 = vmatmul.mubr.bf16.gmra.mrb[36].mxu1 %v9030_v27  ;;  %v7511_v27 = vcombine.high %v768_v21, %v772_v22 }
 0x14c   : > { %3422 = vmatprep.mubr.bf16.mxu0 %v9031_v28  ;;  %4001 = vmatprep.mubr.bf16.mxu1 %v9031_v28  ;;  %v9060_v28 = vld [vmem:[%s9843_s11 + $0x98] ss:$24 sps:$4 sm:$0xff]  }
 0x153   : > { %3423 = vmatmul.mubr.bf16.gmra.mrb[40].mxu0 %v9033_v29  ;;  %4002 = vmatmul.mubr.bf16.gmra.mrb[40].mxu1 %v9033_v29 }
 0x154   : > { %3432 = vmatprep.mubr.bf16.mxu0 %v9034_v30  ;;  %4011 = vmatprep.mubr.bf16.mxu1 %v9034_v30  ;;  %v776_v30 = vld [vmem:[#allocation6 + $0x9c0] sm:$0xff] }
 0x15b   : > { %3433 = vmatmul.mubr.bf16.gmra.mrb[44].mxu0 %v9036_v31  ;;  %4012 = vmatmul.mubr.bf16.gmra.mrb[44].mxu1 %v9036_v31  ;;  %v780_v31 = vld [vmem:[#allocation6 + $0x9e0] sm:$0xff] }
 0x15c   : > { %3442 = vmatprep.mubr.bf16.mxu0 %v9037_v32  ;;  %4021 = vmatprep.mubr.bf16.mxu1 %v9037_v32  ;;  %v9061_v32 = vld [vmem:[%s9843_s11 + $0xcc] ss:$24 sps:$4 sm:$0xff]   ;;  %v7518_v43 = vcombine.low %v776_v30, %v780_v31 }
 0x163   : > { %3443 = vmatmul.mubr.bf16.gmra.mrb[48].mxu0 %v9039_v33  ;;  %4022 = vmatmul.mubr.bf16.gmra.mrb[48].mxu1 %v9039_v33  ;;  %v777_v33 = vld [vmem:[#allocation6 + $0x9c8] sm:$0xff] }
 0x164   : > { %3452 = vmatprep.mubr.bf16.mxu0 %v9040_v34  ;;  %4031 = vmatprep.mubr.bf16.mxu1 %v9040_v34  ;;  %v781_v34 = vld [vmem:[#allocation6 + $0x9e8] sm:$0xff] }
 0x16b   : > { %3453 = vmatmul.mubr.bf16.gmra.mrb[52].mxu0 %v9042_v35  ;;  %4032 = vmatmul.mubr.bf16.gmra.mrb[52].mxu1 %v9042_v35  ;;  %v7510_v35 = vcombine.low %v768_v21, %v772_v22  ;;  %v828_v21 = vld [vmem:[#allocation6 + $0xb60] sm:$0xff]  ;;  %v9070_v22 = vld [vmem:[%s9843_s11 + $0x15c] ss:$24 sps:$4 sm:$0xff]  }
 0x16c   : > { %3462 = vmatprep.mubr.bf16.mxu0 %v9043_v36  ;;  %4041 = vmatprep.mubr.bf16.mxu1 %v9043_v36 }
 0x173   : > { %3463 = vmatmul.mubr.bf16.gmra.mrb[56].mxu0 %v9045_v37  ;;  %4042 = vmatmul.mubr.bf16.gmra.mrb[56].mxu1 %v9045_v37  ;;  %v7519_v37 = vcombine.high %v776_v30, %v780_v31  ;;  %v836_v30 = vld [vmem:[#allocation6 + $0xba0] sm:$0xff]  ;;  %v833_v31 = vld [vmem:[#allocation6 + $0xb88] sm:$0xff] }
 0x174   : > { %3472 = vmatprep.mubr.bf16.mxu0 %v9046_v38  ;;  %4051 = vmatprep.mubr.bf16.mxu1 %v9046_v38  ;;  %v7521_v38 = vcombine.high %v777_v33, %v781_v34 }
 0x17b   : > { %3473 = vmatmul.mubr.bf16.gmra.mrb[60].mxu0 %v9048_v39  ;;  %4052 = vmatmul.mubr.bf16.gmra.mrb[60].mxu1 %v9048_v39  ;;  %v784_v39 = vld [vmem:[#allocation6 + $0xa00] sm:$0xff] }
 0x17c   : > { %3515 = vmatprep.mubr.bf16.mxu0 %v9051_v40  ;;  %4094 = vmatprep.mubr.bf16.mxu1 %v9051_v40  ;;  %v788_v40 = vld [vmem:[#allocation6 + $0xa20] sm:$0xff] }
 0x17d   : > { %v7527_v45 = vcombine.high %v784_v39, %v788_v40 }
 0x183   : > { %3516 = vmatmul.mubr.bf16.vlgmr.msra.gmra.mrb[0].mxu0 %v9049_v41  ;;  %4095 = vmatmul.mubr.bf16.vlgmr.msra.gmra.mrb[0].mxu1 %v9049_v41  ;;  %v785_v41 = vld [vmem:[#allocation6 + $0xa08] sm:$0xff] }
 0x184   : > { %3525 = vmatprep.mubr.bf16.mxu0 %v9052_v44  ;;  %4104 = vmatprep.mubr.bf16.mxu1 %v9052_v44  ;;  %v7520_v44 = vcombine.low %v777_v33, %v781_v34 }
 0x185   : > { %3677 = vmatpush1.bf16.msra.mxu0 %v7462_v24  ;;  %4256 = vmatpush1.bf16.msra.mxu1 %v7464_v25  ;;  %v773_v24 = vld [vmem:[#allocation6 + $0x9a8] sm:$0xff]  ;;  %v7502_v25 = vcombine.low %v760_v12, %v764_v13  ;;  %v820_v12 = vld [vmem:[#allocation6 + $0xb20] sm:$0xff] }
 0x186   : > { %3678 = vmatprep.subr.bf16.mxu0 %v7471_v47  ;;  %4257 = vmatprep.subr.bf16.mxu1 %v7473_v48  ;;  %v7513_v29 = vcombine.high %v769_v23, %v773_v24  ;;  %v7512_v36 = vcombine.low %v769_v23, %v773_v24  ;;  %v7529_v47 = vcombine.high %v785_v41, %v789_v42  ;;  %v792_v48 = vld [vmem:[#allocation6 + $0xa40] sm:$0xff]  ;;  %v817_v13 = vld [vmem:[#allocation6 + $0xb08] sm:$0xff] }
 0x187   : > { %v7534_v61 = vcombine.low %v792_v48, %v796_v49  ;;  %v825_v23 = vld [vmem:[#allocation6 + $0xb48] sm:$0xff] }
 0x188   : > { %v829_v24 = vld [vmem:[#allocation6 + $0xb68] sm:$0xff] }
 0x189   : > { %3679 = vmatpush1.bf16.msra.mxu0 %v7470_v53  ;;  %4258 = vmatpush1.bf16.msra.mxu1 %v7472_v54  ;;  %v7526_v53 = vcombine.low %v784_v39, %v788_v40  ;;  %v7528_v54 = vcombine.low %v785_v41, %v789_v42  ;;  %v7568_v34 = vcombine.low %v825_v23, %v829_v24  ;;  %v844_v39 = vld [vmem:[#allocation6 + $0xbe0] sm:$0xff]  ;;  %v841_v41 = vld [vmem:[#allocation6 + $0xbc8] sm:$0xff] }
 0x18a   : > { %3680 = vmatprep.subr.bf16.mxu0 %v7479_v55  ;;  %4259 = vmatprep.subr.bf16.mxu1 %v7481_v57  ;;  %v7535_v55 = vcombine.high %v792_v48, %v796_v49  ;;  %v800_v57 = vld [vmem:[#allocation6 + $0xa80] sm:$0xff]  ;;  %v845_v42 = vld [vmem:[#allocation6 + $0xbe8] sm:$0xff] }
 0x18b   : > { %3526 = vmatmul.mubr.bf16.gmra.mrb[4].mxu0 %v9054_v56  ;;  %4105 = vmatmul.mubr.bf16.gmra.mrb[4].mxu1 %v9054_v56  ;;  %v7537_v56 = vcombine.high %v793_v51, %v797_v52  ;;  %v9073_v40 = vld [vmem:[%s9843_s11 + $0x18c] ss:$24 sps:$4 sm:$0xff]   ;;  %v7584_v48 = vcombine.low %v841_v41, %v845_v42  ;;  %v9075_v49 = vld [vmem:[%s9843_s11 + $0x188] ss:$24 sps:$4 sm:$0xff]   ;;  %v9934_v51 = vld [vmem:[#allocation6 + $0x10] sm:$0xff] }
 0x18c   : > { %3535 = vmatprep.mubr.bf16.mxu0 %v9055_v60  ;;  %4114 = vmatprep.mubr.bf16.mxu1 %v9055_v60  ;;  %v805_v60 = vld [vmem:[#allocation6 + $0xaa8] sm:$0xff]  ;;  %v9936_v52 = vld [vmem:[#allocation6 + $0x30] sm:$0xff] }
 0x18d   : > { %3681 = vmatpush1.bf16.msra.mxu0 %v7478_v63  ;;  %4260 = vmatpush1.bf16.msra.mxu1 %v7480_v0  ;;  %v7543_v63 = vcombine.high %v800_v57, %v804_v58  ;;  %v9066_v0 = vld [vmem:[%s9843_s11 + $0xf8] ss:$24 sps:$4 sm:$0xff]  }
 0x18e   : > { %3682 = vmatprep.subr.bf16.mxu0 %v7487_v1  ;;  %4261 = vmatprep.subr.bf16.mxu1 %v7489_v2  ;;  %v7545_v1 = vcombine.high %v801_v59, %v805_v60  ;;  %v808_v2 = vld [vmem:[#allocation6 + $0xac0] sm:$0xff] }
 0x18f   : > { %v7550_v15 = vcombine.low %v808_v2, %v812_v3 }
 0x191   : > { %3683 = vmatpush1.bf16.msra.mxu0 %v7486_v7  ;;  %4262 = vmatpush1.bf16.msra.mxu1 %v7488_v8  ;;  %v7542_v7 = vcombine.low %v800_v57, %v804_v58  ;;  %v7544_v8 = vcombine.low %v801_v59, %v805_v60  ;;  %v9078_v59 = vld [vmem:[%s9843_s11 + $0x1b8] ss:$24 sps:$4 sm:$0xff]   ;;  %v9079_v60 = vld [vmem:[%s9843_s11 + $0x1ec] ss:$24 sps:$4 sm:$0xff]  }
 0x192   : > { %3684 = vmatprep.subr.bf16.mxu0 %v7495_v9  ;;  %4263 = vmatprep.subr.bf16.mxu1 %v7497_v11  ;;  %v7551_v9 = vcombine.high %v808_v2, %v812_v3  ;;  %v816_v11 = vld [vmem:[#allocation6 + $0xb00] sm:$0xff]  ;;  %v9088_v2 = vld [vmem:[%s9843_s11 + $0x27c] ss:$24 sps:$4 sm:$0xff]   ;;  %v9090_v3 = vld [vmem:[%s9843_s11 + $0x278] ss:$24 sps:$4 sm:$0xff]  }
 0x193   : > { %3536 = vmatmul.mubr.bf16.gmra.mrb[8].mxu0 %v9057_v10  ;;  %4115 = vmatmul.mubr.bf16.gmra.mrb[8].mxu1 %v9057_v10  ;;  %v7553_v10 = vcombine.high %v809_v5, %v813_v6  ;;  %v9093_v5 = vld [vmem:[%s9843_s11 + $0x2a8] ss:$24 sps:$4 sm:$0xff]   ;;  %v9094_v6 = vld [vmem:[%s9843_s11 + $0x2dc] ss:$24 sps:$4 sm:$0xff]  }
 0x194   : > { %3545 = vmatprep.mubr.bf16.mxu0 %v9058_v14  ;;  %4124 = vmatprep.mubr.bf16.mxu1 %v9058_v14  ;;  %v821_v14 = vld [vmem:[#allocation6 + $0xb28] sm:$0xff] }
 0x195   : > { %3685 = vmatpush1.bf16.msra.mxu0 %v7494_v17  ;;  %4264 = vmatpush1.bf16.msra.mxu1 %v7496_v18  ;;  %v7559_v17 = vcombine.high %v816_v11, %v820_v12  ;;  %v9069_v18 = vld [vmem:[%s9843_s11 + $0x128] ss:$24 sps:$4 sm:$0xff]  }
 0x196   : > { %3686 = vmatprep.subr.bf16.mxu0 %v7503_v19  ;;  %4265 = vmatprep.subr.bf16.mxu1 %v7505_v20  ;;  %v7561_v19 = vcombine.high %v817_v13, %v821_v14  ;;  %v824_v20 = vld [vmem:[#allocation6 + $0xb40] sm:$0xff] }
 0x197   : > { %v7566_v33 = vcombine.low %v824_v20, %v828_v21 }
 0x199   : > { %3687 = vmatpush1.bf16.msra.mxu0 %v7502_v25  ;;  %4266 = vmatpush1.bf16.msra.mxu1 %v7504_v26  ;;  %v7558_v25 = vcombine.low %v816_v11, %v820_v12  ;;  %v7560_v26 = vcombine.low %v817_v13, %v821_v14  ;;  %v478_v11 = vld [vmem:[#allocation6 + $0x70] sm:$0xff]  ;;  %v9100_v12 = vld [vmem:[%s9843_s11 + $0x44] ss:$24 sps:$4 sm:$0xff]  }
 0x19a   : > { %3688 = vmatprep.subr.bf16.mxu0 %v7511_v27  ;;  %4267 = vmatprep.subr.bf16.mxu1 %v7513_v29  ;;  %v7567_v27 = vcombine.high %v824_v20, %v828_v21  ;;  %v832_v29 = vld [vmem:[#allocation6 + $0xb80] sm:$0xff]  ;;  %v475_v13 = vld [vmem:[#allocation6 + $0x58] sm:$0xff] }
 0x19b   : > { %3546 = vmatmul.mubr.bf16.gmra.mrb[12].mxu0 %v9060_v28  ;;  %4125 = vmatmul.mubr.bf16.gmra.mrb[12].mxu1 %v9060_v28  ;;  %v7569_v28 = vcombine.high %v825_v23, %v829_v24  ;;  %v479_v14 = vld [vmem:[#allocation6 + $0x78] sm:$0xff] }
 0x19c   : > { %3555 = vmatprep.mubr.bf16.mxu0 %v9061_v32  ;;  %4134 = vmatprep.mubr.bf16.mxu1 %v9061_v32  ;;  %v837_v32 = vld [vmem:[#allocation6 + $0xba8] sm:$0xff]  ;;  %v487_v20 = vld [vmem:[#allocation6 + $0xb8] sm:$0xff] }
 0x19d   : > { %3689 = vmatpush1.bf16.msra.mxu0 %v7510_v35  ;;  %4268 = vmatpush1.bf16.msra.mxu1 %v7512_v36  ;;  %v7575_v35 = vcombine.high %v832_v29, %v836_v30  ;;  %v9072_v36 = vld [vmem:[%s9843_s11 + $0x158] ss:$24 sps:$4 sm:$0xff]  }
 0x19e   : > { %3690 = vmatprep.subr.bf16.mxu0 %v7519_v37  ;;  %4269 = vmatprep.subr.bf16.mxu1 %v7521_v38  ;;  %v7577_v37 = vcombine.high %v833_v31, %v837_v32  ;;  %v840_v38 = vld [vmem:[#allocation6 + $0xbc0] sm:$0xff] }
 0x19f   : > { %v9102_v24 = vld [vmem:[%s9843_s11 + $0x40] ss:$24 sps:$4 sm:$0xff]  }
 0x1a1   : > { %3691 = vmatpush1.bf16.msra.mxu0 %v7518_v43  ;;  %4270 = vmatpush1.bf16.msra.mxu1 %v7520_v44  ;;  %v7574_v43 = vcombine.low %v832_v29, %v836_v30  ;;  %v7576_v44 = vcombine.low %v833_v31, %v837_v32  ;;  %v491_v29 = vld [vmem:[#allocation6 + $0xd8] sm:$0xff] }
 0x1a2   : > { %3692 = vmatprep.subr.bf16.mxu0 %v7527_v45  ;;  %4271 = vmatprep.subr.bf16.mxu1 %v7529_v47  ;;  %v7583_v45 = vcombine.high %v840_v38, %v844_v39  ;;  %v7582_v47 = vcombine.low %v840_v38, %v844_v39  ;;  %v495_v30 = vld [vmem:[#allocation6 + $0xf8] sm:$0xff] }
 0x1a3   : > { %3556 = vmatmul.mubr.bf16.gmra.mrb[16].mxu0 %v9063_v46  ;;  %4135 = vmatmul.mubr.bf16.gmra.mrb[16].mxu1 %v9063_v46  ;;  %v7585_v46 = vcombine.high %v841_v41, %v845_v42  ;;  %v503_v38 = vld [vmem:[#allocation6 + $0x138] sm:$0xff]  ;;  %v9105_v42 = vld [vmem:[%s9843_s11 + $0x70] ss:$24 sps:$4 sm:$0xff]  }
 0x1a4   : > { %3565 = vmatprep.mubr.bf16.mxu0 %v9064_v50  ;;  %4144 = vmatprep.mubr.bf16.mxu1 %v9064_v50  ;;  %v9076_v50 = vld [vmem:[%s9843_s11 + $0x1bc] ss:$24 sps:$4 sm:$0xff]  }
 0x1a5   : > { %3693 = vmatpush1.bf16.msra.mxu0 %v7526_v53  ;;  %4272 = vmatpush1.bf16.msra.mxu1 %v7528_v54  ;;  %v9938_v53 = vld [vmem:[#allocation6 + $0x18] sm:$0xff]  ;;  %v7211_v54 = vcombine.high %v9934_v51, %v9936_v52 }
 0x1a6   : > { %3694 = vmatprep.subr.bf16.mxu0 %v7535_v55  ;;  %4273 = vmatprep.subr.bf16.mxu1 %v7537_v56  ;;  %v9942_v55 = vld [vmem:[#allocation6 + $0x38] sm:$0xff]  ;;  %v7210_v56 = vcombine.low %v9934_v51, %v9936_v52 }
 0x1a7   : > { %v7212_v57 = vcombine.low %v9938_v53, %v9942_v55  ;;  %v7213_v58 = vcombine.high %v9938_v53, %v9942_v55  ;;  %v514_v53 = vld [vmem:[#allocation6 + $0x190] sm:$0xff]  ;;  %v515_v55 = vld [vmem:[#allocation6 + $0x198] sm:$0xff] }
 0x1a9   : > { %3695 = vmatpush1.bf16.msra.mxu0 %v7534_v61  ;;  %4274 = vmatpush1.bf16.msra.mxu1 %v7536_v62  ;;  %v9081_v61 = vld [vmem:[%s9843_s11 + $0x1e8] ss:$24 sps:$4 sm:$0xff]   ;;  %v9082_v62 = vld [vmem:[%s9843_s11 + $0x21c] ss:$24 sps:$4 sm:$0xff]  }
 0x1aa   : > { %3696 = vmatprep.subr.bf16.mxu0 %v7543_v63  ;;  %4275 = vmatprep.subr.bf16.mxu1 %v7545_v1  ;;  %v9084_v63 = vld [vmem:[%s9843_s11 + $0x218] ss:$24 sps:$4 sm:$0xff]   ;;  %v9087_v1 = vld [vmem:[%s9843_s11 + $0x248] ss:$24 sps:$4 sm:$0xff]  }
 0x1ab   : > { %3566 = vmatmul.mubr.bf16.gmra.mrb[20].mxu0 %v9066_v0  ;;  %4145 = vmatmul.mubr.bf16.gmra.mrb[20].mxu1 %v9066_v0  ;;  %v9085_v0 = vld [vmem:[%s9843_s11 + $0x24c] ss:$24 sps:$4 sm:$0xff]  }
 0x1ac   : > { %3575 = vmatprep.mubr.bf16.mxu0 %v9067_v4  ;;  %4154 = vmatprep.mubr.bf16.mxu1 %v9067_v4  ;;  %v9091_v4 = vld [vmem:[%s9843_s11 + $0x2ac] ss:$24 sps:$4 sm:$0xff]  }
 0x1ad   : > { %3697 = vmatpush1.bf16.msra.mxu0 %v7542_v7  ;;  %4276 = vmatpush1.bf16.msra.mxu1 %v7544_v8  ;;  %v9096_v7 = vld [vmem:[%s9843_s11 + $0x2d8] ss:$24 sps:$4 sm:$0xff]   ;;  %v9099_v8 = vld [vmem:[%s9843_s11 + $0x14] ss:$24 sps:$4 sm:$0xff]  }
 0x1ae   : > { %3698 = vmatprep.subr.bf16.mxu0 %v7551_v9  ;;  %4277 = vmatprep.subr.bf16.mxu1 %v7553_v10  ;;  %v9097_v9 = vld [vmem:[%s9843_s11 + $0x10] ss:$24 sps:$4 sm:$0xff]  }
 0x1af   : > { %v474_v10 = vld [vmem:[#allocation6 + $0x50] sm:$0xff] }
 0x1b0   : > { %v7218_v21 = vcombine.low %v474_v10, %v478_v11 }
 0x1b1   : > { %3699 = vmatpush1.bf16.msra.mxu0 %v7550_v15  ;;  %4278 = vmatpush1.bf16.msra.mxu1 %v7552_v16  ;;  %v7219_v15 = vcombine.high %v474_v10, %v478_v11  ;;  %v7221_v16 = vcombine.high %v475_v13, %v479_v14  ;;  %v535_v10 = vld [vmem:[#allocation6 + $0x238] sm:$0xff] }
 0x1b2   : > { %3700 = vmatprep.subr.bf16.mxu0 %v7559_v17  ;;  %4279 = vmatprep.subr.bf16.mxu1 %v7561_v19  ;;  %v482_v17 = vld [vmem:[#allocation6 + $0x90] sm:$0xff]  ;;  %v483_v19 = vld [vmem:[#allocation6 + $0x98] sm:$0xff] }
 0x1b3   : > { %3576 = vmatmul.mubr.bf16.gmra.mrb[24].mxu0 %v9069_v18  ;;  %4155 = vmatmul.mubr.bf16.gmra.mrb[24].mxu1 %v9069_v18  ;;  %v486_v18 = vld [vmem:[#allocation6 + $0xb0] sm:$0xff]  ;;  %v7228_v32 = vcombine.low %v483_v19, %v487_v20 }
 0x1b4   : > { %3585 = vmatprep.mubr.bf16.mxu0 %v9070_v22  ;;  %4164 = vmatprep.mubr.bf16.mxu1 %v9070_v22  ;;  %v7220_v22 = vcombine.low %v475_v13, %v479_v14  ;;  %v7227_v23 = vcombine.high %v482_v17, %v486_v18  ;;  %v7226_v31 = vcombine.low %v482_v17, %v486_v18  ;;  %v9111_v14 = vld [vmem:[%s9843_s11 + $0xd0] ss:$24 sps:$4 sm:$0xff]   ;;  %v9112_v18 = vld [vmem:[%s9843_s11 + $0x104] ss:$24 sps:$4 sm:$0xff]  }
 0x1b5   : > { %3701 = vmatpush1.bf16.msra.mxu0 %v7558_v25  ;;  %4280 = vmatpush1.bf16.msra.mxu1 %v7560_v26  ;;  %v7229_v25 = vcombine.high %v483_v19, %v487_v20  ;;  %v490_v26 = vld [vmem:[#allocation6 + $0xd0] sm:$0xff]  ;;  %v539_v19 = vld [vmem:[#allocation6 + $0x258] sm:$0xff] }
 0x1b6   : > { %3702 = vmatprep.subr.bf16.mxu0 %v7567_v27  ;;  %4281 = vmatprep.subr.bf16.mxu1 %v7569_v28  ;;  %v494_v27 = vld [vmem:[#allocation6 + $0xf0] sm:$0xff]  ;;  %v543_v20 = vld [vmem:[#allocation6 + $0x278] sm:$0xff] }
 0x1b7   : > { %v9103_v28 = vld [vmem:[%s9843_s11 + $0x74] ss:$24 sps:$4 sm:$0xff]   ;;  %v7234_v39 = vcombine.low %v490_v26, %v494_v27 }
 0x1b8   : > { %v542_v17 = vld [vmem:[#allocation6 + $0x270] sm:$0xff] }
 0x1b9   : > { %3703 = vmatpush1.bf16.msra.mxu0 %v7566_v33  ;;  %4282 = vmatpush1.bf16.msra.mxu1 %v7568_v34  ;;  %v7235_v33 = vcombine.high %v490_v26, %v494_v27  ;;  %v7237_v34 = vcombine.high %v491_v29, %v495_v30  ;;  %v550_v26 = vld [vmem:[#allocation6 + $0x2b0] sm:$0xff]  ;;  %v547_v27 = vld [vmem:[#allocation6 + $0x298] sm:$0xff] }
 0x1ba   : > { %3704 = vmatprep.subr.bf16.mxu0 %v7575_v35  ;;  %4283 = vmatprep.subr.bf16.mxu1 %v7577_v37  ;;  %v498_v35 = vld [vmem:[#allocation6 + $0x110] sm:$0xff]  ;;  %v499_v37 = vld [vmem:[#allocation6 + $0x118] sm:$0xff] }
 0x1bb   : > { %3586 = vmatmul.mubr.bf16.gmra.mrb[28].mxu0 %v9072_v36  ;;  %4165 = vmatmul.mubr.bf16.gmra.mrb[28].mxu1 %v9072_v36  ;;  %v502_v36 = vld [vmem:[#allocation6 + $0x130] sm:$0xff] }
 0x1bc   : > { %3595 = vmatprep.mubr.bf16.mxu0 %v9073_v40  ;;  %4174 = vmatprep.mubr.bf16.mxu1 %v9073_v40  ;;  %v7236_v40 = vcombine.low %v491_v29, %v495_v30  ;;  %v7243_v41 = vcombine.high %v498_v35, %v502_v36  ;;  %v7284_v30 = vcombine.low %v539_v19, %v543_v20 }
 0x1bd   : > { %3705 = vmatpush1.bf16.msra.mxu0 %v7574_v43  ;;  %4284 = vmatpush1.bf16.msra.mxu1 %v7576_v44  ;;  %v7245_v43 = vcombine.high %v499_v37, %v503_v38  ;;  %v506_v44 = vld [vmem:[#allocation6 + $0x150] sm:$0xff] }
 0x1be   : > { %3706 = vmatprep.subr.bf16.mxu0 %v7583_v45  ;;  %4285 = vmatprep.subr.bf16.mxu1 %v7585_v46  ;;  %v510_v45 = vld [vmem:[#allocation6 + $0x170] sm:$0xff]  ;;  %v9106_v46 = vld [vmem:[%s9843_s11 + $0xa4] ss:$24 sps:$4 sm:$0xff]  }
 0x1bf   : > { %v7251_v51 = vcombine.high %v506_v44, %v510_v45 }
 0x1c1   : > { %3707 = vmatpush1.bf16.msra.mxu0 %v7582_v47  ;;  %4286 = vmatpush1.bf16.msra.mxu1 %v7584_v48  ;;  %v507_v47 = vld [vmem:[#allocation6 + $0x158] sm:$0xff] }
 0x1c2   : > { %4448 = vmatprep.subr.bf16.mxu0 %v7211_v54  ;;  %5027 = vmatprep.subr.bf16.mxu1 %v7213_v58  ;;  %v511_v48 = vld [vmem:[#allocation6 + $0x178] sm:$0xff]  ;;  %v518_v54 = vld [vmem:[#allocation6 + $0x1b0] sm:$0xff] }
 0x1c3   : > { %3596 = vmatmul.mubr.bf16.gmra.mrb[32].mxu0 %v9075_v49  ;;  %4175 = vmatmul.mubr.bf16.gmra.mrb[32].mxu1 %v9075_v49  ;;  %v7242_v49 = vcombine.low %v498_v35, %v502_v36  ;;  %v7253_v52 = vcombine.high %v507_v47, %v511_v48  ;;  %v7252_v58 = vcombine.low %v507_v47, %v511_v48  ;;  %v558_v35 = vld [vmem:[#allocation6 + $0x2f0] sm:$0xff] }
 0x1c4   : > { %3605 = vmatprep.mubr.bf16.mxu0 %v9076_v50  ;;  %4184 = vmatprep.mubr.bf16.mxu1 %v9076_v50  ;;  %v7244_v50 = vcombine.low %v499_v37, %v503_v38  ;;  %v9115_v36 = vld [vmem:[%s9843_s11 + $0x134] ss:$24 sps:$4 sm:$0xff]   ;;  %v555_v37 = vld [vmem:[#allocation6 + $0x2d8] sm:$0xff] }
 0x1c5   : > { %v559_v38 = vld [vmem:[#allocation6 + $0x2f8] sm:$0xff] }
 0x1c6   : > { %v7300_v48 = vcombine.low %v555_v37, %v559_v38 }
 0x1cb   : > { %3606 = vmatmul.mubr.bf16.gmra.mrb[36].mxu0 %v9078_v59  ;;  %4185 = vmatmul.mubr.bf16.gmra.mrb[36].mxu1 %v9078_v59  ;;  %v7259_v59 = vcombine.high %v514_v53, %v518_v54 }
 0x1cc   : > { %3615 = vmatprep.mubr.bf16.mxu0 %v9079_v60  ;;  %4194 = vmatprep.mubr.bf16.mxu1 %v9079_v60  ;;  %v9108_v60 = vld [vmem:[%s9843_s11 + $0xa0] ss:$24 sps:$4 sm:$0xff]  }
 0x1d3   : > { %3616 = vmatmul.mubr.bf16.gmra.mrb[40].mxu0 %v9081_v61  ;;  %4195 = vmatmul.mubr.bf16.gmra.mrb[40].mxu1 %v9081_v61 }
 0x1d4   : > { %3625 = vmatprep.mubr.bf16.mxu0 %v9082_v62  ;;  %4204 = vmatprep.mubr.bf16.mxu1 %v9082_v62  ;;  %v522_v62 = vld [vmem:[#allocation6 + $0x1d0] sm:$0xff] }
 0x1db   : > { %3626 = vmatmul.mubr.bf16.gmra.mrb[44].mxu0 %v9084_v63  ;;  %4205 = vmatmul.mubr.bf16.gmra.mrb[44].mxu1 %v9084_v63  ;;  %v526_v63 = vld [vmem:[#allocation6 + $0x1f0] sm:$0xff] }
 0x1dc   : > { %3635 = vmatprep.mubr.bf16.mxu0 %v9085_v0  ;;  %4214 = vmatprep.mubr.bf16.mxu1 %v9085_v0  ;;  %v9109_v0 = vld [vmem:[%s9843_s11 + $0xd4] ss:$24 sps:$4 sm:$0xff]   ;;  %v7266_v11 = vcombine.low %v522_v62, %v526_v63 }
 0x1e3   : > { %3636 = vmatmul.mubr.bf16.gmra.mrb[48].mxu0 %v9087_v1  ;;  %4215 = vmatmul.mubr.bf16.gmra.mrb[48].mxu1 %v9087_v1  ;;  %v523_v1 = vld [vmem:[#allocation6 + $0x1d8] sm:$0xff] }
 0x1e4   : > { %3645 = vmatprep.mubr.bf16.mxu0 %v9088_v2  ;;  %4224 = vmatprep.mubr.bf16.mxu1 %v9088_v2  ;;  %v527_v2 = vld [vmem:[#allocation6 + $0x1f8] sm:$0xff] }
 0x1eb   : > { %3646 = vmatmul.mubr.bf16.gmra.mrb[52].mxu0 %v9090_v3  ;;  %4225 = vmatmul.mubr.bf16.gmra.mrb[52].mxu1 %v9090_v3  ;;  %v7258_v3 = vcombine.low %v514_v53, %v518_v54  ;;  %v574_v53 = vld [vmem:[#allocation6 + $0x370] sm:$0xff]  ;;  %v9118_v54 = vld [vmem:[%s9843_s11 + $0x164] ss:$24 sps:$4 sm:$0xff]  }
 0x1ec   : > { %3655 = vmatprep.mubr.bf16.mxu0 %v9091_v4  ;;  %4234 = vmatprep.mubr.bf16.mxu1 %v9091_v4 }
 0x1f3   : > { %3656 = vmatmul.mubr.bf16.gmra.mrb[56].mxu0 %v9093_v5  ;;  %4235 = vmatmul.mubr.bf16.gmra.mrb[56].mxu1 %v9093_v5  ;;  %v7267_v5 = vcombine.high %v522_v62, %v526_v63  ;;  %v582_v62 = vld [vmem:[#allocation6 + $0x3b0] sm:$0xff]  ;;  %v579_v63 = vld [vmem:[#allocation6 + $0x398] sm:$0xff] }
 0x1f4   : > { %3665 = vmatprep.mubr.bf16.mxu0 %v9094_v6  ;;  %4244 = vmatprep.mubr.bf16.mxu1 %v9094_v6  ;;  %v7269_v6 = vcombine.high %v523_v1, %v527_v2 }
 0x1fb   : > { %3666 = vmatmul.mubr.bf16.gmra.mrb[60].mxu0 %v9096_v7  ;;  %4245 = vmatmul.mubr.bf16.gmra.mrb[60].mxu1 %v9096_v7  ;;  %v530_v7 = vld [vmem:[#allocation6 + $0x210] sm:$0xff] }
 0x1fc   : > { %3708 = vmatprep.mubr.bf16.mxu0 %v9099_v8  ;;  %4287 = vmatprep.mubr.bf16.mxu1 %v9099_v8  ;;  %v534_v8 = vld [vmem:[#allocation6 + $0x230] sm:$0xff] }
 0x1fd   : > { %v7275_v13 = vcombine.high %v530_v7, %v534_v8 }
 0x203   : > { %3709 = vmatmul.mubr.bf16.vlgmr.msra.gmra.mrb[0].mxu0 %v9097_v9  ;;  %4288 = vmatmul.mubr.bf16.vlgmr.msra.gmra.mrb[0].mxu1 %v9097_v9  ;;  %v531_v9 = vld [vmem:[#allocation6 + $0x218] sm:$0xff] }
 0x204   : > { %3718 = vmatprep.mubr.bf16.mxu0 %v9100_v12  ;;  %4297 = vmatprep.mubr.bf16.mxu1 %v9100_v12  ;;  %v7268_v12 = vcombine.low %v523_v1, %v527_v2 }
 0x205   : > { %4449 = vmatpush1.bf16.msra.mxu0 %v7210_v56  ;;  %5028 = vmatpush1.bf16.msra.mxu1 %v7212_v57  ;;  %v519_v56 = vld [vmem:[#allocation6 + $0x1b8] sm:$0xff]  ;;  %v7250_v57 = vcombine.low %v506_v44, %v510_v45  ;;  %v566_v44 = vld [vmem:[#allocation6 + $0x330] sm:$0xff] }
 0x206   : > { %4450 = vmatprep.subr.bf16.mxu0 %v7219_v15  ;;  %5029 = vmatprep.subr.bf16.mxu1 %v7221_v16  ;;  %v7261_v61 = vcombine.high %v515_v55, %v519_v56  ;;  %v7260_v4 = vcombine.low %v515_v55, %v519_v56  ;;  %v7277_v15 = vcombine.high %v531_v9, %v535_v10  ;;  %v538_v16 = vld [vmem:[#allocation6 + $0x250] sm:$0xff]  ;;  %v563_v45 = vld [vmem:[#allocation6 + $0x318] sm:$0xff] }
 0x207   : > { %v7282_v29 = vcombine.low %v538_v16, %v542_v17  ;;  %v571_v55 = vld [vmem:[#allocation6 + $0x358] sm:$0xff] }
 0x208   : > { %v575_v56 = vld [vmem:[#allocation6 + $0x378] sm:$0xff] }
 0x209   : > { %4451 = vmatpush1.bf16.msra.mxu0 %v7218_v21  ;;  %5030 = vmatpush1.bf16.msra.mxu1 %v7220_v22  ;;  %v7274_v21 = vcombine.low %v530_v7, %v534_v8  ;;  %v7276_v22 = vcombine.low %v531_v9, %v535_v10  ;;  %v7316_v2 = vcombine.low %v571_v55, %v575_v56  ;;  %v590_v7 = vld [vmem:[#allocation6 + $0x3f0] sm:$0xff]  ;;  %v587_v9 = vld [vmem:[#allocation6 + $0x3d8] sm:$0xff] }
 0x20a   : > { %4452 = vmatprep.subr.bf16.mxu0 %v7227_v23  ;;  %5031 = vmatprep.subr.bf16.mxu1 %v7229_v25  ;;  %v7283_v23 = vcombine.high %v538_v16, %v542_v17  ;;  %v546_v25 = vld [vmem:[#allocation6 + $0x290] sm:$0xff]  ;;  %v591_v10 = vld [vmem:[#allocation6 + $0x3f8] sm:$0xff] }
 0x20b   : > { %3719 = vmatmul.mubr.bf16.gmra.mrb[4].mxu0 %v9102_v24  ;;  %4298 = vmatmul.mubr.bf16.gmra.mrb[4].mxu1 %v9102_v24  ;;  %v7285_v24 = vcombine.high %v539_v19, %v543_v20  ;;  %v9121_v8 = vld [vmem:[%s9843_s11 + $0x194] ss:$24 sps:$4 sm:$0xff]   ;;  %v7332_v16 = vcombine.low %v587_v9, %v591_v10  ;;  %v9123_v17 = vld [vmem:[%s9843_s11 + $0x190] ss:$24 sps:$4 sm:$0xff]  }
 0x20c   : > { %3728 = vmatprep.mubr.bf16.mxu0 %v9103_v28  ;;  %4307 = vmatprep.mubr.bf16.mxu1 %v9103_v28  ;;  %v551_v28 = vld [vmem:[#allocation6 + $0x2b8] sm:$0xff]  ;;  %v9988_v19 = vld [vmem:[#allocation6 + $0x410] sm:$0xff] }
 0x20d   : > { %4453 = vmatpush1.bf16.msra.mxu0 %v7226_v31  ;;  %5032 = vmatpush1.bf16.msra.mxu1 %v7228_v32  ;;  %v7291_v31 = vcombine.high %v546_v25, %v550_v26  ;;  %v9114_v32 = vld [vmem:[%s9843_s11 + $0x100] ss:$24 sps:$4 sm:$0xff]   ;;  %v9990_v20 = vld [vmem:[#allocation6 + $0x430] sm:$0xff] }
 0x20e   : > { %4454 = vmatprep.subr.bf16.mxu0 %v7235_v33  ;;  %5033 = vmatprep.subr.bf16.mxu1 %v7237_v34  ;;  %v7293_v33 = vcombine.high %v547_v27, %v551_v28  ;;  %v554_v34 = vld [vmem:[#allocation6 + $0x2d0] sm:$0xff] }
 0x20f   : > { %v7298_v47 = vcombine.low %v554_v34, %v558_v35 }
 0x211   : > { %4455 = vmatpush1.bf16.msra.mxu0 %v7234_v39  ;;  %5034 = vmatpush1.bf16.msra.mxu1 %v7236_v40  ;;  %v7290_v39 = vcombine.low %v546_v25, %v550_v26  ;;  %v7292_v40 = vcombine.low %v547_v27, %v551_v28  ;;  %v9126_v27 = vld [vmem:[%s9843_s11 + $0x1c0] ss:$24 sps:$4 sm:$0xff]   ;;  %v9127_v28 = vld [vmem:[%s9843_s11 + $0x1f4] ss:$24 sps:$4 sm:$0xff]  }
 0x212   : > { %4456 = vmatprep.subr.bf16.mxu0 %v7243_v41  ;;  %5035 = vmatprep.subr.bf16.mxu1 %v7245_v43  ;;  %v7299_v41 = vcombine.high %v554_v34, %v558_v35  ;;  %v562_v43 = vld [vmem:[#allocation6 + $0x310] sm:$0xff]  ;;  %v9136_v34 = vld [vmem:[%s9843_s11 + $0x284] ss:$24 sps:$4 sm:$0xff]   ;;  %v9138_v35 = vld [vmem:[%s9843_s11 + $0x280] ss:$24 sps:$4 sm:$0xff]  }
 0x213   : > { %3729 = vmatmul.mubr.bf16.gmra.mrb[8].mxu0 %v9105_v42  ;;  %4308 = vmatmul.mubr.bf16.gmra.mrb[8].mxu1 %v9105_v42  ;;  %v7301_v42 = vcombine.high %v555_v37, %v559_v38  ;;  %v9141_v37 = vld [vmem:[%s9843_s11 + $0x2b0] ss:$24 sps:$4 sm:$0xff]   ;;  %v9142_v38 = vld [vmem:[%s9843_s11 + $0x2e4] ss:$24 sps:$4 sm:$0xff]  }
 0x214   : > { %3738 = vmatprep.mubr.bf16.mxu0 %v9106_v46  ;;  %4317 = vmatprep.mubr.bf16.mxu1 %v9106_v46  ;;  %v567_v46 = vld [vmem:[#allocation6 + $0x338] sm:$0xff] }
 0x215   : > { %4457 = vmatpush1.bf16.msra.mxu0 %v7242_v49  ;;  %5036 = vmatpush1.bf16.msra.mxu1 %v7244_v50  ;;  %v7307_v49 = vcombine.high %v562_v43, %v566_v44  ;;  %v9117_v50 = vld [vmem:[%s9843_s11 + $0x130] ss:$24 sps:$4 sm:$0xff]  }
 0x216   : > { %4458 = vmatprep.subr.bf16.mxu0 %v7251_v51  ;;  %5037 = vmatprep.subr.bf16.mxu1 %v7253_v52  ;;  %v7309_v51 = vcombine.high %v563_v45, %v567_v46  ;;  %v570_v52 = vld [vmem:[#allocation6 + $0x350] sm:$0xff] }
 0x217   : > { %v7314_v1 = vcombine.low %v570_v52, %v574_v53 }
 0x219   : > { %4459 = vmatpush1.bf16.msra.mxu0 %v7250_v57  ;;  %5038 = vmatpush1.bf16.msra.mxu1 %v7252_v58  ;;  %v7306_v57 = vcombine.low %v562_v43, %v566_v44  ;;  %v7308_v58 = vcombine.low %v563_v45, %v567_v46  ;;  %v603_v43 = vld [vmem:[#allocation6 + $0x458] sm:$0xff] }
 0x21a   : > { %4460 = vmatprep.subr.bf16.mxu0 %v7259_v59  ;;  %5039 = vmatprep.subr.bf16.mxu1 %v7261_v61  ;;  %v7315_v59 = vcombine.high %v570_v52, %v574_v53  ;;  %v578_v61 = vld [vmem:[#allocation6 + $0x390] sm:$0xff]  ;;  %v607_v44 = vld [vmem:[#allocation6 + $0x478] sm:$0xff] }
 0x21b   : > { %3739 = vmatmul.mubr.bf16.gmra.mrb[12].mxu0 %v9108_v60  ;;  %4318 = vmatmul.mubr.bf16.gmra.mrb[12].mxu1 %v9108_v60  ;;  %v7317_v60 = vcombine.high %v571_v55, %v575_v56  ;;  %v9210_v46 = vld [vmem:[%s9843_s11] ss:$24 sps:$4 sm:$0xff]  }
 0x21c   : > { %3748 = vmatprep.mubr.bf16.mxu0 %v9109_v0  ;;  %4327 = vmatprep.mubr.bf16.mxu1 %v9109_v0  ;;  %v583_v0 = vld [vmem:[#allocation6 + $0x3b8] sm:$0xff] }
 0x21d   : > { %4461 = vmatpush1.bf16.msra.mxu0 %v7258_v3  ;;  %5040 = vmatpush1.bf16.msra.mxu1 %v7260_v4  ;;  %v7323_v3 = vcombine.high %v578_v61, %v582_v62  ;;  %v9120_v4 = vld [vmem:[%s9843_s11 + $0x160] ss:$24 sps:$4 sm:$0xff]  }
 0x21e   : > { %4462 = vmatprep.subr.bf16.mxu0 %v7267_v5  ;;  %5041 = vmatprep.subr.bf16.mxu1 %v7269_v6  ;;  %v7325_v5 = vcombine.high %v579_v63, %v583_v0  ;;  %v586_v6 = vld [vmem:[#allocation6 + $0x3d0] sm:$0xff]  ;;  %v615_v52 = vld [vmem:[#allocation6 + $0x4b8] sm:$0xff] }
 0x221   : > { %4463 = vmatpush1.bf16.msra.mxu0 %v7266_v11  ;;  %5042 = vmatpush1.bf16.msra.mxu1 %v7268_v12  ;;  %v7322_v11 = vcombine.low %v578_v61, %v582_v62  ;;  %v7324_v12 = vcombine.low %v579_v63, %v583_v0  ;;  %v9212_v0 = vld [vmem:[%s9843_s11 + $0x30] ss:$24 sps:$4 sm:$0xff]  }
 0x222   : > { %4464 = vmatprep.subr.bf16.mxu0 %v7275_v13  ;;  %5043 = vmatprep.subr.bf16.mxu1 %v7277_v15  ;;  %v7331_v13 = vcombine.high %v586_v6, %v590_v7  ;;  %v7330_v15 = vcombine.low %v586_v6, %v590_v7  ;;  %v631_v6 = vld [vmem:[#allocation6 + $0x538] sm:$0xff] }
 0x223   : > { %3749 = vmatmul.mubr.bf16.gmra.mrb[16].mxu0 %v9111_v14  ;;  %4328 = vmatmul.mubr.bf16.gmra.mrb[16].mxu1 %v9111_v14  ;;  %v7333_v14 = vcombine.high %v587_v9, %v591_v10 }
 0x224   : > { %3758 = vmatprep.mubr.bf16.mxu0 %v9112_v18  ;;  %4337 = vmatprep.mubr.bf16.mxu1 %v9112_v18  ;;  %v9124_v18 = vld [vmem:[%s9843_s11 + $0x1c4] ss:$24 sps:$4 sm:$0xff]  }
 0x225   : > { %4465 = vmatpush1.bf16.msra.mxu0 %v7274_v21  ;;  %5044 = vmatpush1.bf16.msra.mxu1 %v7276_v22  ;;  %v9992_v21 = vld [vmem:[#allocation6 + $0x418] sm:$0xff]  ;;  %v7339_v22 = vcombine.high %v9988_v19, %v9990_v20 }
 0x226   : > { %4466 = vmatprep.subr.bf16.mxu0 %v7283_v23  ;;  %5045 = vmatprep.subr.bf16.mxu1 %v7285_v24  ;;  %v9996_v23 = vld [vmem:[#allocation6 + $0x438] sm:$0xff]  ;;  %v7338_v24 = vcombine.low %v9988_v19, %v9990_v20  ;;  %v642_v20 = vld [vmem:[#allocation6 + $0x590] sm:$0xff] }
 0x227   : > { %v7340_v25 = vcombine.low %v9992_v21, %v9996_v23  ;;  %v7341_v26 = vcombine.high %v9992_v21, %v9996_v23  ;;  %v646_v21 = vld [vmem:[#allocation6 + $0x5b0] sm:$0xff]  ;;  %v643_v23 = vld [vmem:[#allocation6 + $0x598] sm:$0xff] }
 0x229   : > { %4467 = vmatpush1.bf16.msra.mxu0 %v7282_v29  ;;  %5046 = vmatpush1.bf16.msra.mxu1 %v7284_v30  ;;  %v9129_v29 = vld [vmem:[%s9843_s11 + $0x1f0] ss:$24 sps:$4 sm:$0xff]   ;;  %v9130_v30 = vld [vmem:[%s9843_s11 + $0x224] ss:$24 sps:$4 sm:$0xff]  }
 0x22a   : > { %4468 = vmatprep.subr.bf16.mxu0 %v7291_v31  ;;  %5047 = vmatprep.subr.bf16.mxu1 %v7293_v33  ;;  %v9132_v31 = vld [vmem:[%s9843_s11 + $0x220] ss:$24 sps:$4 sm:$0xff]   ;;  %v9135_v33 = vld [vmem:[%s9843_s11 + $0x250] ss:$24 sps:$4 sm:$0xff]  }
 0x22b   : > { %3759 = vmatmul.mubr.bf16.gmra.mrb[20].mxu0 %v9114_v32  ;;  %4338 = vmatmul.mubr.bf16.gmra.mrb[20].mxu1 %v9114_v32  ;;  %v9133_v32 = vld [vmem:[%s9843_s11 + $0x254] ss:$24 sps:$4 sm:$0xff]  }
 0x22c   : > { %3768 = vmatprep.mubr.bf16.mxu0 %v9115_v36  ;;  %4347 = vmatprep.mubr.bf16.mxu1 %v9115_v36  ;;  %v9139_v36 = vld [vmem:[%s9843_s11 + $0x2b4] ss:$24 sps:$4 sm:$0xff]  }
 0x22d   : > { %4469 = vmatpush1.bf16.msra.mxu0 %v7290_v39  ;;  %5048 = vmatpush1.bf16.msra.mxu1 %v7292_v40  ;;  %v9144_v39 = vld [vmem:[%s9843_s11 + $0x2e0] ss:$24 sps:$4 sm:$0xff]   ;;  %v9209_v40 = vld [vmem:[%s9843_s11 + $0x4] ss:$24 sps:$4 sm:$0xff]  }
 0x22e   : > { %4470 = vmatprep.subr.bf16.mxu0 %v7299_v41  ;;  %5049 = vmatprep.subr.bf16.mxu1 %v7301_v42  ;;  %v602_v41 = vld [vmem:[#allocation6 + $0x450] sm:$0xff] }
 0x22f   : > { %v606_v42 = vld [vmem:[#allocation6 + $0x470] sm:$0xff] }
 0x230   : > { %v7347_v45 = vcombine.high %v602_v41, %v606_v42  ;;  %v7346_v53 = vcombine.low %v602_v41, %v606_v42  ;;  %v659_v41 = vld [vmem:[#allocation6 + $0x618] sm:$0xff] }
 0x231   : > { %4471 = vmatpush1.bf16.msra.mxu0 %v7298_v47  ;;  %5050 = vmatpush1.bf16.msra.mxu1 %v7300_v48  ;;  %v7349_v47 = vcombine.high %v603_v43, %v607_v44  ;;  %v610_v48 = vld [vmem:[#allocation6 + $0x490] sm:$0xff]  ;;  %v663_v42 = vld [vmem:[#allocation6 + $0x638] sm:$0xff] }
 0x232   : > { %4472 = vmatprep.subr.bf16.mxu0 %v7307_v49  ;;  %5051 = vmatprep.subr.bf16.mxu1 %v7309_v51  ;;  %v614_v49 = vld [vmem:[#allocation6 + $0x4b0] sm:$0xff]  ;;  %v611_v51 = vld [vmem:[#allocation6 + $0x498] sm:$0xff] }
 0x233   : > { %3769 = vmatmul.mubr.bf16.gmra.mrb[24].mxu0 %v9117_v50  ;;  %4348 = vmatmul.mubr.bf16.gmra.mrb[24].mxu1 %v9117_v50  ;;  %v9211_v50 = vld [vmem:[%s9843_s11 + $0x34] ss:$24 sps:$4 sm:$0xff]   ;;  %v7355_v55 = vcombine.high %v610_v48, %v614_v49  ;;  %v7357_v56 = vcombine.high %v611_v51, %v615_v52  ;;  %v7354_v61 = vcombine.low %v610_v48, %v614_v49  ;;  %v667_v49 = vld [vmem:[#allocation6 + $0x658] sm:$0xff] }
 0x234   : > { %3778 = vmatprep.mubr.bf16.mxu0 %v9118_v54  ;;  %4357 = vmatprep.mubr.bf16.mxu1 %v9118_v54  ;;  %v7348_v54 = vcombine.low %v603_v43, %v607_v44  ;;  %v7356_v62 = vcombine.low %v611_v51, %v615_v52  ;;  %v670_v48 = vld [vmem:[#allocation6 + $0x670] sm:$0xff]  ;;  %v7404_v52 = vcombine.low %v659_v41, %v663_v42 }
 0x235   : > { %4473 = vmatpush1.bf16.msra.mxu0 %v7306_v57  ;;  %5052 = vmatpush1.bf16.msra.mxu1 %v7308_v58  ;;  %v618_v57 = vld [vmem:[#allocation6 + $0x4d0] sm:$0xff] }
 0x236   : > { %4474 = vmatprep.subr.bf16.mxu0 %v7315_v59  ;;  %5053 = vmatprep.subr.bf16.mxu1 %v7317_v60  ;;  %v622_v58 = vld [vmem:[#allocation6 + $0x4f0] sm:$0xff]  ;;  %v619_v59 = vld [vmem:[#allocation6 + $0x4d8] sm:$0xff] }
 0x237   : > { %v623_v60 = vld [vmem:[#allocation6 + $0x4f8] sm:$0xff]  ;;  %v7363_v63 = vcombine.high %v618_v57, %v622_v58  ;;  %v7362_v7 = vcombine.low %v618_v57, %v622_v58  ;;  %v678_v57 = vld [vmem:[#allocation6 + $0x6b0] sm:$0xff] }
 0x238   : > { %v9219_v58 = vld [vmem:[%s9843_s11 + $0xf4] ss:$24 sps:$4 sm:$0xff]  }
 0x239   : > { %4475 = vmatpush1.bf16.msra.mxu0 %v7314_v1  ;;  %5054 = vmatpush1.bf16.msra.mxu1 %v7316_v2  ;;  %v7365_v1 = vcombine.high %v619_v59, %v623_v60  ;;  %v626_v2 = vld [vmem:[#allocation6 + $0x510] sm:$0xff] }
 0x23a   : > { %4476 = vmatprep.subr.bf16.mxu0 %v7323_v3  ;;  %5055 = vmatprep.subr.bf16.mxu1 %v7325_v5  ;;  %v630_v3 = vld [vmem:[#allocation6 + $0x530] sm:$0xff]  ;;  %v627_v5 = vld [vmem:[#allocation6 + $0x518] sm:$0xff] }
 0x23b   : > { %3779 = vmatmul.mubr.bf16.gmra.mrb[28].mxu0 %v9120_v4  ;;  %4358 = vmatmul.mubr.bf16.gmra.mrb[28].mxu1 %v9120_v4  ;;  %v9213_v4 = vld [vmem:[%s9843_s11 + $0x64] ss:$24 sps:$4 sm:$0xff]   ;;  %v7371_v9 = vcombine.high %v626_v2, %v630_v3  ;;  %v7373_v10 = vcombine.high %v627_v5, %v631_v6 }
 0x23c   : > { %3788 = vmatprep.mubr.bf16.mxu0 %v9121_v8  ;;  %4367 = vmatprep.mubr.bf16.mxu1 %v9121_v8  ;;  %v7364_v8 = vcombine.low %v619_v59, %v623_v60  ;;  %v675_v59 = vld [vmem:[#allocation6 + $0x698] sm:$0xff] }
 0x23d   : > { %4477 = vmatpush1.bf16.msra.mxu0 %v7322_v11  ;;  %5056 = vmatpush1.bf16.msra.mxu1 %v7324_v12  ;;  %v634_v11 = vld [vmem:[#allocation6 + $0x550] sm:$0xff]  ;;  %v679_v60 = vld [vmem:[#allocation6 + $0x6b8] sm:$0xff] }
 0x23e   : > { %4478 = vmatprep.subr.bf16.mxu0 %v7331_v13  ;;  %5057 = vmatprep.subr.bf16.mxu1 %v7333_v14  ;;  %v638_v12 = vld [vmem:[#allocation6 + $0x570] sm:$0xff]  ;;  %v635_v13 = vld [vmem:[#allocation6 + $0x558] sm:$0xff] }
 0x23f   : > { %v639_v14 = vld [vmem:[#allocation6 + $0x578] sm:$0xff] }
 0x240   : > { %v7381_v19 = vcombine.high %v635_v13, %v639_v14 }
 0x241   : > { %4479 = vmatpush1.bf16.msra.mxu0 %v7330_v15  ;;  %5058 = vmatpush1.bf16.msra.mxu1 %v7332_v16  ;;  %v7370_v15 = vcombine.low %v626_v2, %v630_v3  ;;  %v7372_v16 = vcombine.low %v627_v5, %v631_v6  ;;  %v686_v2 = vld [vmem:[#allocation6 + $0x6f0] sm:$0xff]  ;;  %v683_v3 = vld [vmem:[#allocation6 + $0x6d8] sm:$0xff]  ;;  %v7420_v6 = vcombine.low %v675_v59, %v679_v60 }
 0x242   : > { %4641 = vmatprep.subr.bf16.mxu0 %v7339_v22  ;;  %5220 = vmatprep.subr.bf16.mxu1 %v7341_v26  ;;  %v9215_v22 = vld [vmem:[%s9843_s11 + $0x94] ss:$24 sps:$4 sm:$0xff]   ;;  %v7380_v26 = vcombine.low %v635_v13, %v639_v14  ;;  %v691_v13 = vld [vmem:[#allocation6 + $0x718] sm:$0xff] }
 0x243   : > { %3789 = vmatmul.mubr.bf16.gmra.mrb[32].mxu0 %v9123_v17  ;;  %4368 = vmatmul.mubr.bf16.gmra.mrb[32].mxu1 %v9123_v17  ;;  %v7379_v17 = vcombine.high %v634_v11, %v638_v12  ;;  %v695_v14 = vld [vmem:[#allocation6 + $0x738] sm:$0xff] }
 0x244   : > { %3798 = vmatprep.mubr.bf16.mxu0 %v9124_v18  ;;  %4377 = vmatprep.mubr.bf16.mxu1 %v9124_v18  ;;  %v9214_v18 = vld [vmem:[%s9843_s11 + $0x60] ss:$24 sps:$4 sm:$0xff]  }
 0x24b   : > { %3799 = vmatmul.mubr.bf16.gmra.mrb[36].mxu0 %v9126_v27  ;;  %4378 = vmatmul.mubr.bf16.gmra.mrb[36].mxu1 %v9126_v27  ;;  %v7387_v27 = vcombine.high %v642_v20, %v646_v21 }
 0x24c   : > { %3808 = vmatprep.mubr.bf16.mxu0 %v9127_v28  ;;  %4387 = vmatprep.mubr.bf16.mxu1 %v9127_v28 }
 0x253   : > { %3809 = vmatmul.mubr.bf16.gmra.mrb[40].mxu0 %v9129_v29  ;;  %4388 = vmatmul.mubr.bf16.gmra.mrb[40].mxu1 %v9129_v29  ;;  %v650_v29 = vld [vmem:[#allocation6 + $0x5d0] sm:$0xff] }
 0x254   : > { %3818 = vmatprep.mubr.bf16.mxu0 %v9130_v30  ;;  %4397 = vmatprep.mubr.bf16.mxu1 %v9130_v30  ;;  %v654_v30 = vld [vmem:[#allocation6 + $0x5f0] sm:$0xff] }
 0x255   : > { %v7394_v43 = vcombine.low %v650_v29, %v654_v30 }
 0x25b   : > { %3819 = vmatmul.mubr.bf16.gmra.mrb[44].mxu0 %v9132_v31  ;;  %4398 = vmatmul.mubr.bf16.gmra.mrb[44].mxu1 %v9132_v31  ;;  %v651_v31 = vld [vmem:[#allocation6 + $0x5d8] sm:$0xff] }
 0x25c   : > { %3828 = vmatprep.mubr.bf16.mxu0 %v9133_v32  ;;  %4407 = vmatprep.mubr.bf16.mxu1 %v9133_v32  ;;  %v655_v32 = vld [vmem:[#allocation6 + $0x5f8] sm:$0xff] }
 0x25d   : > { %v7396_v44 = vcombine.low %v651_v31, %v655_v32 }
 0x263   : > { %3829 = vmatmul.mubr.bf16.gmra.mrb[48].mxu0 %v9135_v33  ;;  %4408 = vmatmul.mubr.bf16.gmra.mrb[48].mxu1 %v9135_v33  ;;  %v7386_v33 = vcombine.low %v642_v20, %v646_v21  ;;  %v702_v20 = vld [vmem:[#allocation6 + $0x770] sm:$0xff]  ;;  %v699_v21 = vld [vmem:[#allocation6 + $0x758] sm:$0xff] }
 0x264   : > { %3838 = vmatprep.mubr.bf16.mxu0 %v9136_v34  ;;  %4417 = vmatprep.mubr.bf16.mxu1 %v9136_v34 }
 0x26b   : > { %3839 = vmatmul.mubr.bf16.gmra.mrb[52].mxu0 %v9138_v35  ;;  %4418 = vmatmul.mubr.bf16.gmra.mrb[52].mxu1 %v9138_v35  ;;  %v7395_v35 = vcombine.high %v650_v29, %v654_v30  ;;  %v710_v29 = vld [vmem:[#allocation6 + $0x7b0] sm:$0xff] }
 0x26c   : > { %3848 = vmatprep.mubr.bf16.mxu0 %v9139_v36  ;;  %4427 = vmatprep.mubr.bf16.mxu1 %v9139_v36  ;;  %v9216_v36 = vld [vmem:[%s9843_s11 + $0x90] ss:$24 sps:$4 sm:$0xff]   ;;  %v9223_v30 = vld [vmem:[%s9843_s11 + $0x154] ss:$24 sps:$4 sm:$0xff]  }
 0x273   : > { %3849 = vmatmul.mubr.bf16.gmra.mrb[56].mxu0 %v9141_v37  ;;  %4428 = vmatmul.mubr.bf16.gmra.mrb[56].mxu1 %v9141_v37  ;;  %v7397_v37 = vcombine.high %v651_v31, %v655_v32  ;;  %v707_v31 = vld [vmem:[#allocation6 + $0x798] sm:$0xff] }
 0x274   : > { %3858 = vmatprep.mubr.bf16.mxu0 %v9142_v38  ;;  %4437 = vmatprep.mubr.bf16.mxu1 %v9142_v38  ;;  %v658_v38 = vld [vmem:[#allocation6 + $0x610] sm:$0xff]  ;;  %v711_v32 = vld [vmem:[#allocation6 + $0x7b8] sm:$0xff] }
 0x27b   : > { %3859 = vmatmul.mubr.bf16.gmra.mrb[60].mxu0 %v9144_v39  ;;  %4438 = vmatmul.mubr.bf16.gmra.mrb[60].mxu1 %v9144_v39  ;;  %v662_v39 = vld [vmem:[#allocation6 + $0x630] sm:$0xff] }
 0x27c   : > { %4480 = vmatprep.mubr.bf16.mxu0 %v9209_v40  ;;  %5059 = vmatprep.mubr.bf16.mxu1 %v9209_v40  ;;  %v9217_v40 = vld [vmem:[%s9843_s11 + $0xc4] ss:$24 sps:$4 sm:$0xff]   ;;  %v7402_v51 = vcombine.low %v658_v38, %v662_v39 }
 0x283   : > { %4481 = vmatmul.mubr.bf16.vlgmr.msra.gmra.mrb[64].mxu0 %v9210_v46  ;;  %5060 = vmatmul.mubr.bf16.vlgmr.msra.gmra.mrb[64].mxu1 %v9210_v46  ;;  %v7405_v46 = vcombine.high %v659_v41, %v663_v42  ;;  %v7452_v42 = vcombine.low %v707_v31, %v711_v32 }
 0x284   : > { %4490 = vmatprep.mubr.bf16.mxu0 %v9211_v50  ;;  %5069 = vmatprep.mubr.bf16.mxu1 %v9211_v50  ;;  %v671_v50 = vld [vmem:[#allocation6 + $0x678] sm:$0xff] }
 0x285   : > { %4642 = vmatpush1.bf16.msra.mxu0 %v7338_v24  ;;  %5221 = vmatpush1.bf16.msra.mxu1 %v7340_v25  ;;  %v647_v24 = vld [vmem:[#allocation6 + $0x5b8] sm:$0xff]  ;;  %v7378_v25 = vcombine.low %v634_v11, %v638_v12  ;;  %v694_v11 = vld [vmem:[#allocation6 + $0x730] sm:$0xff] }
 0x286   : > { %4643 = vmatprep.subr.bf16.mxu0 %v7347_v45  ;;  %5222 = vmatprep.subr.bf16.mxu1 %v7349_v47  ;;  %v7389_v28 = vcombine.high %v643_v23, %v647_v24  ;;  %v7388_v34 = vcombine.low %v643_v23, %v647_v24  ;;  %v7403_v45 = vcombine.high %v658_v38, %v662_v39  ;;  %v666_v47 = vld [vmem:[#allocation6 + $0x650] sm:$0xff]  ;;  %v9221_v12 = vld [vmem:[%s9843_s11 + $0x124] ss:$24 sps:$4 sm:$0xff]  }
 0x287   : > { %v7436_v24 = vcombine.low %v691_v13, %v695_v14  ;;  %v718_v38 = vld [vmem:[#allocation6 + $0x7f0] sm:$0xff]  ;;  %v715_v39 = vld [vmem:[#allocation6 + $0x7d8] sm:$0xff] }
 0x289   : > { %4644 = vmatpush1.bf16.msra.mxu0 %v7346_v53  ;;  %5223 = vmatpush1.bf16.msra.mxu1 %v7348_v54  ;;  %v7411_v53 = vcombine.high %v666_v47, %v670_v48  ;;  %v9218_v54 = vld [vmem:[%s9843_s11 + $0xc0] ss:$24 sps:$4 sm:$0xff]  }
 0x28a   : > { %4645 = vmatprep.subr.bf16.mxu0 %v7355_v55  ;;  %5224 = vmatprep.subr.bf16.mxu1 %v7357_v56  ;;  %v7413_v55 = vcombine.high %v667_v49, %v671_v50  ;;  %v674_v56 = vld [vmem:[#allocation6 + $0x690] sm:$0xff] }
 0x28b   : > { %4491 = vmatmul.mubr.bf16.gmra.mrb[68].mxu0 %v9212_v0  ;;  %5070 = vmatmul.mubr.bf16.gmra.mrb[68].mxu1 %v9212_v0  ;;  %v7421_v0 = vcombine.high %v675_v59, %v679_v60  ;;  %v7418_v5 = vcombine.low %v674_v56, %v678_v57  ;;  %v850_v59 = vlaneseq  ;;  %v9228_v60 = vld [vmem:[%s9843_s11 + $0x1b0] ss:$24 sps:$4 sm:$0xff]  }
 0x28c   : > { %4500 = vmatprep.mubr.bf16.mxu0 %v9213_v4  ;;  %5079 = vmatprep.mubr.bf16.mxu1 %v9213_v4  ;;  %v687_v4 = vld [vmem:[#allocation6 + $0x6f8] sm:$0xff] }
 0x28d   : > { %4646 = vmatpush1.bf16.msra.mxu0 %v7354_v61  ;;  %5225 = vmatpush1.bf16.msra.mxu1 %v7356_v62  ;;  %v7410_v61 = vcombine.low %v666_v47, %v670_v48  ;;  %v7412_v62 = vcombine.low %v667_v49, %v671_v50  ;;  %v10040_v49 = vld [vmem:[#allocation6 + $0x810] sm:$0xff] }
 0x28e   : > { %4647 = vmatprep.subr.bf16.mxu0 %v7363_v63  ;;  %5226 = vmatprep.subr.bf16.mxu1 %v7365_v1  ;;  %v7419_v63 = vcombine.high %v674_v56, %v678_v57  ;;  %v682_v1 = vld [vmem:[#allocation6 + $0x6d0] sm:$0xff] }
 0x28f   : > { %v10042_v50 = vld [vmem:[#allocation6 + $0x830] sm:$0xff] }
 0x291   : > { %4648 = vmatpush1.bf16.msra.mxu0 %v7362_v7  ;;  %5227 = vmatpush1.bf16.msra.mxu1 %v7364_v8  ;;  %v7427_v7 = vcombine.high %v682_v1, %v686_v2  ;;  %v9220_v8 = vld [vmem:[%s9843_s11 + $0xf0] ss:$24 sps:$4 sm:$0xff]  }
 0x292   : > { %4649 = vmatprep.subr.bf16.mxu0 %v7371_v9  ;;  %5228 = vmatprep.subr.bf16.mxu1 %v7373_v10  ;;  %v7429_v9 = vcombine.high %v683_v3, %v687_v4  ;;  %v690_v10 = vld [vmem:[#allocation6 + $0x710] sm:$0xff] }
 0x293   : > { %4501 = vmatmul.mubr.bf16.gmra.mrb[72].mxu0 %v9214_v18  ;;  %5080 = vmatmul.mubr.bf16.gmra.mrb[72].mxu1 %v9214_v18  ;;  %v7437_v18 = vcombine.high %v691_v13, %v695_v14  ;;  %v7434_v23 = vcombine.low %v690_v10, %v694_v11 }
 0x294   : > { %4510 = vmatprep.mubr.bf16.mxu0 %v9215_v22  ;;  %5089 = vmatprep.mubr.bf16.mxu1 %v9215_v22  ;;  %v703_v22 = vld [vmem:[#allocation6 + $0x778] sm:$0xff] }
 0x295   : > { %4650 = vmatpush1.bf16.msra.mxu0 %v7370_v15  ;;  %5229 = vmatpush1.bf16.msra.mxu1 %v7372_v16  ;;  %v7426_v15 = vcombine.low %v682_v1, %v686_v2  ;;  %v7428_v16 = vcombine.low %v683_v3, %v687_v4  ;;  %v9230_v3 = vld [vmem:[%s9843_s11 + $0x1e0] ss:$24 sps:$4 sm:$0xff]  }
 0x296   : > { %4651 = vmatprep.subr.bf16.mxu0 %v7379_v17  ;;  %5230 = vmatprep.subr.bf16.mxu1 %v7381_v19  ;;  %v7435_v17 = vcombine.high %v690_v10, %v694_v11  ;;  %v698_v19 = vld [vmem:[#allocation6 + $0x750] sm:$0xff] }
 0x299   : > { %4652 = vmatpush1.bf16.msra.mxu0 %v7378_v25  ;;  %5231 = vmatpush1.bf16.msra.mxu1 %v7380_v26  ;;  %v7443_v25 = vcombine.high %v698_v19, %v702_v20  ;;  %v9222_v26 = vld [vmem:[%s9843_s11 + $0x120] ss:$24 sps:$4 sm:$0xff]  }
 0x29a   : > { %4653 = vmatprep.subr.bf16.mxu0 %v7387_v27  ;;  %5232 = vmatprep.subr.bf16.mxu1 %v7389_v28  ;;  %v7445_v27 = vcombine.high %v699_v21, %v703_v22  ;;  %v706_v28 = vld [vmem:[#allocation6 + $0x790] sm:$0xff] }
 0x29b   : > { %4511 = vmatmul.mubr.bf16.gmra.mrb[76].mxu0 %v9216_v36  ;;  %5090 = vmatmul.mubr.bf16.gmra.mrb[76].mxu1 %v9216_v36  ;;  %v7453_v36 = vcombine.high %v707_v31, %v711_v32  ;;  %v7450_v41 = vcombine.low %v706_v28, %v710_v29 }
 0x29c   : > { %4520 = vmatprep.mubr.bf16.mxu0 %v9217_v40  ;;  %5099 = vmatprep.mubr.bf16.mxu1 %v9217_v40  ;;  %v719_v40 = vld [vmem:[#allocation6 + $0x7f8] sm:$0xff] }
 0x29d   : > { %4654 = vmatpush1.bf16.msra.mxu0 %v7386_v33  ;;  %5233 = vmatpush1.bf16.msra.mxu1 %v7388_v34  ;;  %v7442_v33 = vcombine.low %v698_v19, %v702_v20  ;;  %v7444_v34 = vcombine.low %v699_v21, %v703_v22  ;;  %v7460_v48 = vcombine.low %v715_v39, %v719_v40 }
 0x29e   : > { %4655 = vmatprep.subr.bf16.mxu0 %v7395_v35  ;;  %5234 = vmatprep.subr.bf16.mxu1 %v7397_v37  ;;  %v7451_v35 = vcombine.high %v706_v28, %v710_v29  ;;  %v714_v37 = vld [vmem:[#allocation6 + $0x7d0] sm:$0xff]  ;;  %v9233_v29 = vld [vmem:[%s9843_s11 + $0x244] ss:$24 sps:$4 sm:$0xff]  }
 0x29f   : > { %v7458_v47 = vcombine.low %v714_v37, %v718_v38 }
 0x2a1   : > { %4656 = vmatpush1.bf16.msra.mxu0 %v7394_v43  ;;  %5235 = vmatpush1.bf16.msra.mxu1 %v7396_v44  ;;  %v7459_v43 = vcombine.high %v714_v37, %v718_v38  ;;  %v9224_v44 = vld [vmem:[%s9843_s11 + $0x150] ss:$24 sps:$4 sm:$0xff]  }
 0x2a2   : > { %4657 = vmatprep.subr.bf16.mxu0 %v7403_v45  ;;  %5236 = vmatprep.subr.bf16.mxu1 %v7405_v46  ;;  %v7461_v45 = vcombine.high %v715_v39, %v719_v40  ;;  %v9225_v46 = vld [vmem:[%s9843_s11 + $0x184] ss:$24 sps:$4 sm:$0xff]  }
 0x2a3   : > { %4521 = vmatmul.mubr.bf16.gmra.mrb[80].mxu0 %v9218_v54  ;;  %5100 = vmatmul.mubr.bf16.gmra.mrb[80].mxu1 %v9218_v54  ;;  %v9226_v54 = vld [vmem:[%s9843_s11 + $0x180] ss:$24 sps:$4 sm:$0xff]  }
 0x2a4   : > { %4530 = vmatprep.mubr.bf16.mxu0 %v9219_v58  ;;  %5109 = vmatprep.mubr.bf16.mxu1 %v9219_v58  ;;  %v9227_v58 = vld [vmem:[%s9843_s11 + $0x1b4] ss:$24 sps:$4 sm:$0xff]  }
 0x2a5   : > { %4658 = vmatpush1.bf16.msra.mxu0 %v7402_v51  ;;  %5237 = vmatpush1.bf16.msra.mxu1 %v7404_v52  ;;  %v10044_v51 = vld [vmem:[#allocation6 + $0x818] sm:$0xff]  ;;  %v7467_v52 = vcombine.high %v10040_v49, %v10042_v50 }
 0x2a6   : > { %4659 = vmatprep.subr.bf16.mxu0 %v7411_v53  ;;  %5238 = vmatprep.subr.bf16.mxu1 %v7413_v55  ;;  %v10048_v53 = vld [vmem:[#allocation6 + $0x838] sm:$0xff] }
 0x2a7   : > { %v7469_v57 = vcombine.high %v10044_v51, %v10048_v53 }
 0x2a9   : > { %4660 = vmatpush1.bf16.msra.mxu0 %v7410_v61  ;;  %5239 = vmatpush1.bf16.msra.mxu1 %v7412_v62  ;;  %v9229_v61 = vld [vmem:[%s9843_s11 + $0x1e4] ss:$24 sps:$4 sm:$0xff]   ;;  %v10060_v62 = vshrl.u32 %v850_v59, 7 }
 0x2aa   : > { %4661 = vmatprep.subr.bf16.mxu0 %v7419_v63  ;;  %5240 = vmatprep.subr.bf16.mxu1 %v7421_v0  ;;  %v848_v0 = vld [vmem:[#allocation8] sm:$0xff] }
 0x2ab   : > { %4531 = vmatmul.mubr.bf16.gmra.mrb[84].mxu0 %v9220_v8  ;;  %5110 = vmatmul.mubr.bf16.gmra.mrb[84].mxu1 %v9220_v8  ;;  %12032 = vst [vmem:[#allocation20_spill] sm:$0xff] %v10060_v62  ;;  %v852_v63 = vsub.s32 0, %v10060_v62  ;;  %v860_v1 = vsub.s32 2, %v10060_v62  ;;  %v856_v2 = vsub.s32 1, %v10060_v62  ;;  %v864_v4 = vsub.s32 3, %v10060_v62 }
 0x2ac   : > { %4540 = vmatprep.mubr.bf16.mxu0 %v9221_v12  ;;  %5119 = vmatprep.mubr.bf16.mxu1 %v9221_v12 }
 0x2ad   : > { %4662 = vmatpush1.bf16.msra.mxu0 %v7418_v5  ;;  %5241 = vmatpush1.bf16.msra.mxu1 %v7420_v6  ;;  %v9231_v5 = vld [vmem:[%s9843_s11 + $0x214] ss:$24 sps:$4 sm:$0xff]   ;;  %v10068_v6 = vrot.slane %v848_v0, %v852_v63  ;;  %v10070_v8 = vrot.slane %v848_v0, %v860_v1  ;;  %v10074_v12 = vrot.slane %v848_v0, %v864_v4 }
 0x2ae   : > { %4663 = vmatprep.subr.bf16.mxu0 %v7427_v7  ;;  %5242 = vmatprep.subr.bf16.mxu1 %v7429_v9  ;;  %v10072_v9 = vrot.slane %v848_v0, %v856_v2 }
 0x2b1   : > { %4664 = vmatpush1.bf16.msra.mxu0 %v7426_v15  ;;  %5243 = vmatpush1.bf16.msra.mxu1 %v7428_v16 }
 0x2b2   : > { %4665 = vmatprep.subr.bf16.mxu0 %v7435_v17  ;;  %5244 = vmatprep.subr.bf16.mxu1 %v7437_v18 }
 0x2b3   : > { %4541 = vmatmul.mubr.bf16.gmra.mrb[88].mxu0 %v9222_v26  ;;  %5120 = vmatmul.mubr.bf16.gmra.mrb[88].mxu1 %v9222_v26 }
 0x2b4   : > { %4550 = vmatprep.mubr.bf16.mxu0 %v9223_v30  ;;  %5129 = vmatprep.mubr.bf16.mxu1 %v9223_v30  ;;  %v731_v30 = vld [vmem:[#allocation6 + $0x858] sm:$0xff] }
 0x2b5   : > { %4666 = vmatpush1.bf16.msra.mxu0 %v7434_v23  ;;  %5245 = vmatpush1.bf16.msra.mxu1 %v7436_v24 }
 0x2b6   : > { %4667 = vmatprep.subr.bf16.mxu0 %v7443_v25  ;;  %5246 = vmatprep.subr.bf16.mxu1 %v7445_v27  ;;  %v9232_v27 = vld [vmem:[%s9843_s11 + $0x210] ss:$24 sps:$4 sm:$0xff]  }
 0x2b9   : > { %4668 = vmatpush1.bf16.msra.mxu0 %v7442_v33  ;;  %5247 = vmatpush1.bf16.msra.mxu1 %v7444_v34 }
 0x2ba   : > { %4669 = vmatprep.subr.bf16.mxu0 %v7451_v35  ;;  %5248 = vmatprep.subr.bf16.mxu1 %v7453_v36 }
 0x2bb   : > { %4551 = vmatmul.mubr.bf16.gmra.mrb[92].mxu0 %v9224_v44  ;;  %5130 = vmatmul.mubr.bf16.gmra.mrb[92].mxu1 %v9224_v44 }
 0x2bc   : > { %4560 = vmatprep.mubr.bf16.mxu0 %v9225_v46  ;;  %5139 = vmatprep.mubr.bf16.mxu1 %v9225_v46 }
 0x2bd   : > { %4670 = vmatpush1.bf16.msra.mxu0 %v7450_v41  ;;  %5249 = vmatpush1.bf16.msra.mxu1 %v7452_v42 }
 0x2be   : > { %4671 = vmatprep.subr.bf16.mxu0 %v7459_v43  ;;  %5250 = vmatprep.subr.bf16.mxu1 %v7461_v45 }
 0x2c1   : > { %4672 = vmatpush1.bf16.msra.mxu0 %v7458_v47  ;;  %5251 = vmatpush1.bf16.msra.mxu1 %v7460_v48 }
 0x2c2   : > { %4834 = vmatprep.subr.bf16.mxu0 %v7467_v52  ;;  %5413 = vmatprep.subr.bf16.mxu1 %v7469_v57  ;;  %v9234_v52 = vld [vmem:[%s9843_s11 + $0x240] ss:$24 sps:$4 sm:$0xff]   ;;  %v734_v57 = vld [vmem:[#allocation6 + $0x870] sm:$0xff] }
 0x2c3   : > { %4561 = vmatmul.mubr.bf16.gmra.mrb[96].mxu0 %v9226_v54  ;;  %5140 = vmatmul.mubr.bf16.gmra.mrb[96].mxu1 %v9226_v54 }
 0x2c4   : > { %4570 = vmatprep.mubr.bf16.mxu0 %v9227_v58  ;;  %5149 = vmatprep.mubr.bf16.mxu1 %v9227_v58  ;;  %v9235_v58 = vld [vmem:[%s9843_s11 + $0x274] ss:$24 sps:$4 sm:$0xff]  }
 0x2cb   : > { %4571 = vmatmul.mubr.bf16.gmra.mrb[100].mxu0 %v9228_v60  ;;  %5150 = vmatmul.mubr.bf16.gmra.mrb[100].mxu1 %v9228_v60 }
 0x2cc   : > { %4580 = vmatprep.mubr.bf16.mxu0 %v9229_v61  ;;  %5159 = vmatprep.mubr.bf16.mxu1 %v9229_v61 }
 0x2d3   : > { %4581 = vmatmul.mubr.bf16.gmra.mrb[104].mxu0 %v9230_v3  ;;  %5160 = vmatmul.mubr.bf16.gmra.mrb[104].mxu1 %v9230_v3 }
 0x2d4   : > { %4590 = vmatprep.mubr.bf16.mxu0 %v9231_v5  ;;  %5169 = vmatprep.mubr.bf16.mxu1 %v9231_v5 }
 0x2d6   : > { %v3710_v7 = vpop.f32.mrb[0].mxu0  ;;  %v4289_v10 = vpop.f32.mrb[0].mxu1 }
 0x2d7   : > { %v3712_v11 = vpop.f32.mrb[1].mxu0  ;;  %v4291_v13 = vpop.f32.mrb[1].mxu1  ;;  %v10077_v15 = vadd.f32 %v3710_v7, %v10068_v6  ;;  %v10083_v19 = vadd.f32 %v4289_v10, %v10070_v8 }
 0x2d8   : > { %v3714_v14 = vpop.f32.mrb[2].mxu0  ;;  %v4293_v17 = vpop.f32.mrb[2].mxu1  ;;  %v10086_v20 = vadd.f32 %v3712_v11, %v10072_v9  ;;  %v10095_v24 = vadd.f32 %v4291_v13, %v10074_v12 }
 0x2d9   : > { %v10080_v16 = vadd.f32 %v3714_v14, %v10068_v6  ;;  %v3716_v18 = vpop.f32.mrb[3].mxu0  ;;  %v10089_v21 = vadd.f32 %v4293_v17, %v10070_v8  ;;  %v4295_v23 = vpop.f32.mrb[3].mxu1 }
 0x2da   : > { %v10092_v22 = vadd.f32 %v3716_v18, %v10072_v9  ;;  %v10100_v26 = vadd.f32 %v4295_v23, %v10074_v12 }
 0x2db   : > { %4591 = vmatmul.mubr.bf16.gmra.mrb[108].mxu0 %v9232_v27  ;;  %5170 = vmatmul.mubr.bf16.gmra.mrb[108].mxu1 %v9232_v27  ;;  %v9236_v27 = vld [vmem:[%s9843_s11 + $0x270] ss:$24 sps:$4 sm:$0xff]  }
 0x2dc   : > { %4600 = vmatprep.mubr.bf16.mxu0 %v9233_v29  ;;  %5179 = vmatprep.mubr.bf16.mxu1 %v9233_v29 }
 0x2de   : > { %v3720_v32 = vpop.f32.mrb[4].mxu0  ;;  %v4299_v33 = vpop.f32.mrb[4].mxu1 }
 0x2df   : > { %v3722_v34 = vpop.f32.mrb[5].mxu0  ;;  %v4301_v35 = vpop.f32.mrb[5].mxu1  ;;  %v10111_v37 = vadd.f32 %v3720_v32, %v10068_v6  ;;  %v10117_v41 = vadd.f32 %v4299_v33, %v10070_v8  ;;  %v9237_v33 = vld [vmem:[%s9843_s11 + $0x2a4] ss:$24 sps:$4 sm:$0xff]  }
 0x2e0   : > { %v3724_v36 = vpop.f32.mrb[6].mxu0  ;;  %v4303_v39 = vpop.f32.mrb[6].mxu1  ;;  %v10120_v42 = vadd.f32 %v3722_v34, %v10072_v9  ;;  %v10129_v46 = vadd.f32 %v4301_v35, %v10074_v12 }
 0x2e1   : > { %v10114_v38 = vadd.f32 %v3724_v36, %v10068_v6  ;;  %v3726_v40 = vpop.f32.mrb[7].mxu0  ;;  %v10123_v43 = vadd.f32 %v4303_v39, %v10070_v8  ;;  %v4305_v45 = vpop.f32.mrb[7].mxu1 }
 0x2e2   : > { %v10126_v44 = vadd.f32 %v3726_v40, %v10072_v9  ;;  %v10134_v48 = vadd.f32 %v4305_v45, %v10074_v12 }
 0x2e3   : > { %4601 = vmatmul.mubr.bf16.gmra.mrb[112].mxu0 %v9234_v52  ;;  %5180 = vmatmul.mubr.bf16.gmra.mrb[112].mxu1 %v9234_v52 }
 0x2e4   : > { %4610 = vmatprep.mubr.bf16.mxu0 %v9235_v58  ;;  %5189 = vmatprep.mubr.bf16.mxu1 %v9235_v58 }
 0x2e6   : > { %v3730_v60 = vpop.f32.mrb[8].mxu0  ;;  %v4309_v61 = vpop.f32.mrb[8].mxu1 }
 0x2e7   : > { %v3732_v63 = vpop.f32.mrb[9].mxu0  ;;  %v4311_v0 = vpop.f32.mrb[9].mxu1  ;;  %v10145_v2 = vadd.f32 %v3730_v60, %v10068_v6  ;;  %v10151_v7 = vadd.f32 %v4309_v61, %v10070_v8 }
 0x2e8   : > { %v3734_v1 = vpop.f32.mrb[10].mxu0  ;;  %v4313_v4 = vpop.f32.mrb[10].mxu1  ;;  %v10154_v10 = vadd.f32 %v3732_v63, %v10072_v9  ;;  %v10163_v17 = vadd.f32 %v4311_v0, %v10074_v12 }
 0x2e9   : > { %v10148_v3 = vadd.f32 %v3734_v1, %v10068_v6  ;;  %v3736_v5 = vpop.f32.mrb[11].mxu0  ;;  %v10157_v11 = vadd.f32 %v4313_v4, %v10070_v8  ;;  %v4315_v14 = vpop.f32.mrb[11].mxu1 }
 0x2ea   : > { %v10160_v13 = vadd.f32 %v3736_v5, %v10072_v9  ;;  %v10168_v23 = vadd.f32 %v4315_v14, %v10074_v12 }
 0x2eb   : > { %4611 = vmatmul.mubr.bf16.gmra.mrb[116].mxu0 %v9236_v27  ;;  %5190 = vmatmul.mubr.bf16.gmra.mrb[116].mxu1 %v9236_v27 }
 0x2ec   : > { %4620 = vmatprep.mubr.bf16.mxu0 %v9237_v33  ;;  %5199 = vmatprep.mubr.bf16.mxu1 %v9237_v33 }
 0x2ee   : > { %v3740_v35 = vpop.f32.mrb[12].mxu0  ;;  %v4319_v36 = vpop.f32.mrb[12].mxu1 }
 0x2ef   : > { %v3742_v39 = vpop.f32.mrb[13].mxu0  ;;  %v4321_v40 = vpop.f32.mrb[13].mxu1  ;;  %v10179_v52 = vadd.f32 %v3740_v35, %v10068_v6  ;;  %v10185_v63 = vadd.f32 %v4319_v36, %v10070_v8  ;;  %v9238_v35 = vld [vmem:[%s9843_s11 + $0x2a0] ss:$24 sps:$4 sm:$0xff]  }
 0x2f0   : > { %v3744_v45 = vpop.f32.mrb[14].mxu0  ;;  %v4323_v60 = vpop.f32.mrb[14].mxu1  ;;  %v10188_v0 = vadd.f32 %v3742_v39, %v10072_v9  ;;  %v10197_v14 = vadd.f32 %v4321_v40, %v10074_v12 }
 0x2f1   : > { %v10182_v58 = vadd.f32 %v3744_v45, %v10068_v6  ;;  %v3746_v61 = vpop.f32.mrb[15].mxu0  ;;  %v10191_v1 = vadd.f32 %v4323_v60, %v10070_v8  ;;  %v4325_v5 = vpop.f32.mrb[15].mxu1  ;;  %v9239_v45 = vld [vmem:[%s9843_s11 + $0x2d4] ss:$24 sps:$4 sm:$0xff]  }
 0x2f2   : > { %v10194_v4 = vadd.f32 %v3746_v61, %v10072_v9  ;;  %v10202_v33 = vadd.f32 %v4325_v5, %v10074_v12 }
 0x2f3   : > { %4621 = vmatmul.mubr.bf16.gmra.mrb[120].mxu0 %v9238_v35  ;;  %5200 = vmatmul.mubr.bf16.gmra.mrb[120].mxu1 %v9238_v35 }
 0x2f4   : > { %4630 = vmatprep.mubr.bf16.mxu0 %v9239_v45  ;;  %5209 = vmatprep.mubr.bf16.mxu1 %v9239_v45 }
 0x2f6   : > { %v3750_v60 = vpop.f32.mrb[16].mxu0  ;;  %v4329_v61 = vpop.f32.mrb[16].mxu1 }
 0x2f7   : > { %v3752_v5 = vpop.f32.mrb[17].mxu0  ;;  %v4331_v27 = vpop.f32.mrb[17].mxu1  ;;  %v10213_v18 = vadd.f32 %v3750_v60, %v10068_v6  ;;  %v10219_v34 = vadd.f32 %v4329_v61, %v10070_v8  ;;  %v9240_v61 = vld [vmem:[%s9843_s11 + $0x2d0] ss:$24 sps:$4 sm:$0xff]  }
 0x2f8   : > { %v3754_v29 = vpop.f32.mrb[18].mxu0  ;;  %v4333_v35 = vpop.f32.mrb[18].mxu1  ;;  %v10222_v45 = vadd.f32 %v3752_v5, %v10072_v9  ;;  %v10231_v54 = vadd.f32 %v4331_v27, %v10074_v12  ;;  %v735_v5 = vld [vmem:[#allocation6 + $0x878] sm:$0xff] }
 0x2f9   : > { %12033 = vst [vmem:[#allocation21_spill] sm:$0xff] %v10213_v18  ;;  %v10216_v36 = vadd.f32 %v3754_v29, %v10068_v6  ;;  %v3756_v39 = vpop.f32.mrb[19].mxu0  ;;  %12035 = vst [vmem:[#allocation23_spill] sm:$0xff] %v10219_v34  ;;  %v10225_v40 = vadd.f32 %v4333_v35, %v10070_v8  ;;  %v4335_v60 = vpop.f32.mrb[19].mxu1  ;;  %v730_v29 = vld [vmem:[#allocation6 + $0x850] sm:$0xff]  ;;  %v12048_v18 = vcombine.low %v10040_v49, %v10042_v50 }
 0x2fa   : > { %12036 = vst [vmem:[#allocation24_spill] sm:$0xff] %v10222_v45  ;;  %v10228_v32 = vadd.f32 %v3756_v39, %v10072_v9  ;;  %12039 = vst [vmem:[#allocation27_spill] sm:$0xff] %v10231_v54  ;;  %v10236_v47 = vadd.f32 %v4335_v60, %v10074_v12  ;;  %v9241_v39 = vld [vmem:[%s9843_s11 + $0xc] ss:$24 sps:$4 sm:$0xff]   ;;  %v7475_v27 = vcombine.high %v730_v29, %v734_v57  ;;  %v738_v54 = vld [vmem:[#allocation6 + $0x890] sm:$0xff] }
 0x2fb   : > { %12034 = vst [vmem:[#allocation22_spill] sm:$0xff] %v10216_v36  ;;  %12037 = vst [vmem:[#allocation25_spill] sm:$0xff] %v10225_v40  ;;  %4631 = vmatmul.mubr.bf16.gmra.mrb[124].mxu0 %v9240_v61  ;;  %5210 = vmatmul.mubr.bf16.gmra.mrb[124].mxu1 %v9240_v61  ;;  %v9242_v36 = vld [vmem:[%s9843_s11 + $0x8] ss:$24 sps:$4 sm:$0xff]   ;;  %v739_v45 = vld [vmem:[#allocation6 + $0x898] sm:$0xff] }
 0x2fc   : > { %12038 = vst [vmem:[#allocation26_spill] sm:$0xff] %v10228_v32  ;;  %12040 = vst [vmem:[#allocation28_spill] sm:$0xff] %v10236_v47  ;;  %4673 = vmatprep.mubr.bf16.mxu0 %v9241_v39  ;;  %5252 = vmatprep.mubr.bf16.mxu1 %v9241_v39  ;;  %v742_v47 = vld [vmem:[#allocation6 + $0x8b0] sm:$0xff]  ;;  %v743_v32 = vld [vmem:[#allocation6 + $0x8b8] sm:$0xff] }
 0x2fd   : > { %v7485_v50 = vcombine.high %v739_v45, %v743_v32 }
 0x2fe   : > { %v3760_v59 = vpop.f32.mrb[20].mxu0  ;;  %v4339_v60 = vpop.f32.mrb[20].mxu1 }
 0x2ff   : > { %v3762_v28 = vpop.f32.mrb[21].mxu0  ;;  %v4341_v25 = vpop.f32.mrb[21].mxu1  ;;  %v10247_v56 = vadd.f32 %v3760_v59, %v10068_v6  ;;  %v10253_v39 = vadd.f32 %v4339_v60, %v10070_v8 }
 0x300   : > { %v3764_v31 = vpop.f32.mrb[22].mxu0  ;;  %v4343_v35 = vpop.f32.mrb[22].mxu1  ;;  %v10256_v62 = vadd.f32 %v3762_v28, %v10072_v9  ;;  %v7477_v28 = vcombine.high %v731_v30, %v735_v5 }
 0x301   : > { %12041 = vst [vmem:[#allocation29_spill] sm:$0xff] %v10247_v56  ;;  %v10250_v61 = vadd.f32 %v3764_v31, %v10068_v6  ;;  %v3766_v55 = vpop.f32.mrb[23].mxu0  ;;  %12043 = vst [vmem:[#allocation31_spill] sm:$0xff] %v10253_v39  ;;  %v10259_v34 = vadd.f32 %v4343_v35, %v10070_v8  ;;  %v4345_v59 = vpop.f32.mrb[23].mxu1  ;;  %v10265_v31 = vadd.f32 %v4341_v25, %v10074_v12  ;;  %v9243_v25 = vld [vmem:[%s9843_s11 + $0x3c] ss:$24 sps:$4 sm:$0xff]  }
 0x302   : > { %12044 = vst [vmem:[#allocation32_spill] sm:$0xff] %v10256_v62  ;;  %v10262_v40 = vadd.f32 %v3766_v55, %v10072_v9  ;;  %v10270_v60 = vadd.f32 %v4345_v59, %v10074_v12  ;;  %v7474_v56 = vcombine.low %v730_v29, %v734_v57  ;;  %v10285_v35 = vld [vmem:[#allocation6 + $0x8f0] sm:$0xff]  ;;  %v7476_v55 = vcombine.low %v731_v30, %v735_v5  ;;  %v10290_v62 = vld [vmem:[#allocation6 + $0x8d8] sm:$0xff] }
 0x303   : > { %12042 = vst [vmem:[#allocation30_spill] sm:$0xff] %v10250_v61  ;;  %12045 = vst [vmem:[#allocation33_spill] sm:$0xff] %v10259_v34  ;;  %4674 = vmatmul.mubr.bf16.vlgmr.msra.gmra.mrb[64].mxu0 %v9242_v36  ;;  %5253 = vmatmul.mubr.bf16.vlgmr.msra.gmra.mrb[64].mxu1 %v9242_v36  ;;  %v10283_v61 = vld [vmem:[#allocation6 + $0x8d0] sm:$0xff]  ;;  %v12049_v36 = vcombine.low %v10044_v51, %v10048_v53  ;;  %v7483_v34 = vcombine.high %v738_v54, %v742_v47 }
 0x304   : > { %12046 = vst [vmem:[#allocation34_spill] sm:$0xff] %v10265_v31  ;;  %12047 = vst [vmem:[#allocation35_spill] sm:$0xff] %v10270_v60  ;;  %4683 = vmatprep.mubr.bf16.mxu0 %v9243_v25  ;;  %5262 = vmatprep.mubr.bf16.mxu1 %v9243_v25  ;;  %v10292_v25 = vld [vmem:[#allocation6 + $0x8f8] sm:$0xff]  ;;  %v7482_v29 = vcombine.low %v738_v54, %v742_v47  ;;  %v7484_v31 = vcombine.low %v739_v45, %v743_v32 }
 0x305   : > { %4835 = vmatpush1.bf16.msra.mxu0 %v12048_v18  ;;  %5414 = vmatpush1.bf16.msra.mxu1 %v12049_v36  ;;  %v7491_v60 = vcombine.high %v10283_v61, %v10285_v35  ;;  %v7493_v47 = vcombine.high %v10290_v62, %v10292_v25  ;;  %v9244_v36 = vld [vmem:[%s9843_s11 + $0x38] ss:$24 sps:$4 sm:$0xff]  }
 0x306   : > { %v3770_v39 = vpop.f32.mrb[24].mxu0  ;;  %4836 = vmatprep.subr.bf16.mxu0 %v7475_v27  ;;  %v4349_v59 = vpop.f32.mrb[24].mxu1  ;;  %5415 = vmatprep.subr.bf16.mxu1 %v7477_v28 }
 0x307   : > { %v3772_v49 = vpop.f32.mrb[25].mxu0  ;;  %v4351_v57 = vpop.f32.mrb[25].mxu1  ;;  %v10297_v51 = vadd.f32 %v3770_v39, %v10068_v6  ;;  %v10300_v53 = vadd.f32 %v4349_v59, %v10070_v8 }
 0x308   : > { %v3774_v18 = vpop.f32.mrb[26].mxu0  ;;  %v4353_v5 = vpop.f32.mrb[26].mxu1  ;;  %v10308_v54 = vadd.f32 %v3772_v49, %v10072_v9  ;;  %v10317_v28 = vadd.f32 %v4351_v57, %v10074_v12  ;;  %v754_v49 = vld [vmem:[#allocation6 + $0x910] sm:$0xff]  ;;  %v755_v57 = vld [vmem:[#allocation6 + $0x918] sm:$0xff] }
 0x309   : > { %12050 = vst [vmem:[#allocation36_spill] sm:$0xff] %v10297_v51  ;;  %12051 = vst [vmem:[#allocation37_spill] sm:$0xff] %v10300_v53  ;;  %v10303_v30 = vadd.f32 %v3774_v18, %v10068_v6  ;;  %v3776_v27 = vpop.f32.mrb[27].mxu0  ;;  %4837 = vmatpush1.bf16.msra.mxu0 %v7474_v56  ;;  %v10311_v32 = vadd.f32 %v4353_v5, %v10070_v8  ;;  %v4355_v39 = vpop.f32.mrb[27].mxu1  ;;  %5416 = vmatpush1.bf16.msra.mxu1 %v7476_v55  ;;  %v758_v18 = vld [vmem:[#allocation6 + $0x930] sm:$0xff]  ;;  %v10340_v53 = vld [vmem:[#allocation6 + $0x958] sm:$0xff] }
 0x30a   : > { %12053 = vst [vmem:[#allocation39_spill] sm:$0xff] %v10308_v54  ;;  %v10314_v45 = vadd.f32 %v3776_v27, %v10072_v9  ;;  %4838 = vmatprep.subr.bf16.mxu0 %v7483_v34  ;;  %12056 = vst [vmem:[#allocation42_spill] sm:$0xff] %v10317_v28  ;;  %v10322_v59 = vadd.f32 %v4355_v39, %v10074_v12  ;;  %5417 = vmatprep.subr.bf16.mxu1 %v7485_v50  ;;  %v9245_v55 = vld [vmem:[%s9843_s11 + $0x6c] ss:$24 sps:$4 sm:$0xff]   ;;  %v759_v27 = vld [vmem:[#allocation6 + $0x938] sm:$0xff] }
 0x30b   : > { %12052 = vst [vmem:[#allocation38_spill] sm:$0xff] %v10303_v30  ;;  %12054 = vst [vmem:[#allocation40_spill] sm:$0xff] %v10311_v32  ;;  %4684 = vmatmul.mubr.bf16.gmra.mrb[68].mxu0 %v9244_v36  ;;  %5263 = vmatmul.mubr.bf16.gmra.mrb[68].mxu1 %v9244_v36  ;;  %v7490_v50 = vcombine.low %v10283_v61, %v10285_v35  ;;  %v10334_v56 = vld [vmem:[#allocation6 + $0x950] sm:$0xff]  ;;  %v7492_v36 = vcombine.low %v10290_v62, %v10292_v25  ;;  %v10342_v32 = vld [vmem:[#allocation6 + $0x978] sm:$0xff] }
 0x30c   : > { %12055 = vst [vmem:[#allocation41_spill] sm:$0xff] %v10314_v45  ;;  %12057 = vst [vmem:[#allocation43_spill] sm:$0xff] %v10322_v59  ;;  %4693 = vmatprep.mubr.bf16.mxu0 %v9245_v55  ;;  %5272 = vmatprep.mubr.bf16.mxu1 %v9245_v55  ;;  %v10336_v51 = vld [vmem:[#allocation6 + $0x970] sm:$0xff]  ;;  %v7499_v34 = vcombine.high %v754_v49, %v758_v18  ;;  %v7501_v39 = vcombine.high %v755_v57, %v759_v27  ;;  %v775_v45 = vld [vmem:[#allocation6 + $0x9b8] sm:$0xff] }
 0x30d   : > { %4839 = vmatpush1.bf16.msra.mxu0 %v7482_v29  ;;  %5418 = vmatpush1.bf16.msra.mxu1 %v7484_v31  ;;  %v7498_v30 = vcombine.low %v754_v49, %v758_v18  ;;  %v7500_v28 = vcombine.low %v755_v57, %v759_v27  ;;  %v7507_v31 = vcombine.high %v10334_v56, %v10336_v51  ;;  %v774_v54 = vld [vmem:[#allocation6 + $0x9b0] sm:$0xff] }
 0x30e   : > { %v3780_v5 = vpop.f32.mrb[28].mxu0  ;;  %4840 = vmatprep.subr.bf16.mxu0 %v7491_v60  ;;  %v4359_v55 = vpop.f32.mrb[28].mxu1  ;;  %5419 = vmatprep.subr.bf16.mxu1 %v7493_v47  ;;  %v7509_v49 = vcombine.high %v10340_v53, %v10342_v32 }
 0x30f   : > { %v3782_v29 = vpop.f32.mrb[29].mxu0  ;;  %v4361_v61 = vpop.f32.mrb[29].mxu1  ;;  %v10347_v60 = vadd.f32 %v3780_v5, %v10068_v6  ;;  %v10350_v62 = vadd.f32 %v4359_v55, %v10070_v8 }
 0x310   : > { %v3784_v35 = vpop.f32.mrb[30].mxu0  ;;  %v4363_v59 = vpop.f32.mrb[30].mxu1  ;;  %v10358_v18 = vadd.f32 %v3782_v29, %v10072_v9  ;;  %v10367_v55 = vadd.f32 %v4361_v61, %v10074_v12  ;;  %v9246_v29 = vld [vmem:[%s9843_s11 + $0x68] ss:$24 sps:$4 sm:$0xff]   ;;  %v771_v61 = vld [vmem:[#allocation6 + $0x998] sm:$0xff] }
 0x311   : > { %12058 = vst [vmem:[#allocation44_spill] sm:$0xff] %v10347_v60  ;;  %12059 = vst [vmem:[#allocation45_spill] sm:$0xff] %v10350_v62  ;;  %v10353_v25 = vadd.f32 %v3784_v35, %v10068_v6  ;;  %v3786_v47 = vpop.f32.mrb[31].mxu0  ;;  %4841 = vmatpush1.bf16.msra.mxu0 %v7490_v50  ;;  %v10361_v57 = vadd.f32 %v4363_v59, %v10070_v8  ;;  %v4365_v27 = vpop.f32.mrb[31].mxu1  ;;  %5420 = vmatpush1.bf16.msra.mxu1 %v7492_v36  ;;  %v770_v59 = vld [vmem:[#allocation6 + $0x990] sm:$0xff]  ;;  %v10390_v62 = vld [vmem:[#allocation6 + $0x9d8] sm:$0xff] }
 0x312   : > { %12061 = vst [vmem:[#allocation47_spill] sm:$0xff] %v10358_v18  ;;  %v10364_v5 = vadd.f32 %v3786_v47, %v10072_v9  ;;  %4842 = vmatprep.subr.bf16.mxu0 %v7499_v34  ;;  %12064 = vst [vmem:[#allocation50_spill] sm:$0xff] %v10367_v55  ;;  %v10372_v35 = vadd.f32 %v4365_v27, %v10074_v12  ;;  %5421 = vmatprep.subr.bf16.mxu1 %v7501_v39  ;;  %v9247_v36 = vld [vmem:[%s9843_s11 + $0x9c] ss:$24 sps:$4 sm:$0xff]  }
 0x313   : > { %12060 = vst [vmem:[#allocation46_spill] sm:$0xff] %v10353_v25  ;;  %12062 = vst [vmem:[#allocation48_spill] sm:$0xff] %v10361_v57  ;;  %4694 = vmatmul.mubr.bf16.gmra.mrb[72].mxu0 %v9246_v29  ;;  %5273 = vmatmul.mubr.bf16.gmra.mrb[72].mxu1 %v9246_v29  ;;  %v7506_v39 = vcombine.low %v10334_v56, %v10336_v51  ;;  %v10384_v50 = vld [vmem:[#allocation6 + $0x9d0] sm:$0xff]  ;;  %v7508_v29 = vcombine.low %v10340_v53, %v10342_v32  ;;  %v10392_v57 = vld [vmem:[#allocation6 + $0x9f8] sm:$0xff] }
 0x314   : > { %12063 = vst [vmem:[#allocation49_spill] sm:$0xff] %v10364_v5  ;;  %12065 = vst [vmem:[#allocation51_spill] sm:$0xff] %v10372_v35  ;;  %4703 = vmatprep.mubr.bf16.mxu0 %v9247_v36  ;;  %5282 = vmatprep.mubr.bf16.mxu1 %v9247_v36  ;;  %v10386_v60 = vld [vmem:[#allocation6 + $0x9f0] sm:$0xff]  ;;  %v7515_v34 = vcombine.high %v770_v59, %v774_v54  ;;  %v7517_v27 = vcombine.high %v771_v61, %v775_v45  ;;  %v791_v5 = vld [vmem:[#allocation6 + $0xa38] sm:$0xff] }
 0x315   : > { %4843 = vmatpush1.bf16.msra.mxu0 %v7498_v30  ;;  %5422 = vmatpush1.bf16.msra.mxu1 %v7500_v28  ;;  %v7514_v25 = vcombine.low %v770_v59, %v774_v54  ;;  %v7516_v55 = vcombine.low %v771_v61, %v775_v45  ;;  %v7523_v28 = vcombine.high %v10384_v50, %v10386_v60  ;;  %v790_v18 = vld [vmem:[#allocation6 + $0xa30] sm:$0xff] }
 0x316   : > { %v3790_v47 = vpop.f32.mrb[32].mxu0  ;;  %4844 = vmatprep.subr.bf16.mxu0 %v7507_v31  ;;  %v4369_v36 = vpop.f32.mrb[32].mxu1  ;;  %5423 = vmatprep.subr.bf16.mxu1 %v7509_v49  ;;  %v7525_v54 = vcombine.high %v10390_v62, %v10392_v57 }
 0x317   : > { %v3792_v30 = vpop.f32.mrb[33].mxu0  ;;  %v4371_v51 = vpop.f32.mrb[33].mxu1  ;;  %v10397_v31 = vadd.f32 %v3790_v47, %v10068_v6  ;;  %v10400_v53 = vadd.f32 %v4369_v36, %v10070_v8 }
 0x318   : > { %v3794_v56 = vpop.f32.mrb[34].mxu0  ;;  %v4373_v35 = vpop.f32.mrb[34].mxu1  ;;  %v10408_v45 = vadd.f32 %v3792_v30, %v10072_v9  ;;  %v10417_v36 = vadd.f32 %v4371_v51, %v10074_v12  ;;  %v9248_v30 = vld [vmem:[%s9843_s11 + $0x98] ss:$24 sps:$4 sm:$0xff]  }
 0x319   : > { %12066 = vst [vmem:[#allocation52_spill] sm:$0xff] %v10397_v31  ;;  %12067 = vst [vmem:[#allocation53_spill] sm:$0xff] %v10400_v53  ;;  %v10403_v32 = vadd.f32 %v3794_v56, %v10068_v6  ;;  %v3796_v49 = vpop.f32.mrb[35].mxu0  ;;  %4845 = vmatpush1.bf16.msra.mxu0 %v7506_v39  ;;  %v10411_v59 = vadd.f32 %v4373_v35, %v10070_v8  ;;  %v4375_v61 = vpop.f32.mrb[35].mxu1  ;;  %5424 = vmatpush1.bf16.msra.mxu1 %v7508_v29  ;;  %v786_v35 = vld [vmem:[#allocation6 + $0xa10] sm:$0xff]  ;;  %v787_v51 = vld [vmem:[#allocation6 + $0xa18] sm:$0xff] }
 0x31a   : > { %12069 = vst [vmem:[#allocation55_spill] sm:$0xff] %v10408_v45  ;;  %v10414_v47 = vadd.f32 %v3796_v49, %v10072_v9  ;;  %4846 = vmatprep.subr.bf16.mxu0 %v7515_v34  ;;  %12072 = vst [vmem:[#allocation58_spill] sm:$0xff] %v10417_v36  ;;  %v10422_v56 = vadd.f32 %v4375_v61, %v10074_v12  ;;  %5425 = vmatprep.subr.bf16.mxu1 %v7517_v27  ;;  %v9249_v29 = vld [vmem:[%s9843_s11 + $0xcc] ss:$24 sps:$4 sm:$0xff]   ;;  %v10434_v39 = vld [vmem:[#allocation6 + $0xa50] sm:$0xff] }
 0x31b   : > { %12068 = vst [vmem:[#allocation54_spill] sm:$0xff] %v10403_v32  ;;  %12070 = vst [vmem:[#allocation56_spill] sm:$0xff] %v10411_v59  ;;  %4704 = vmatmul.mubr.bf16.gmra.mrb[76].mxu0 %v9248_v30  ;;  %5283 = vmatmul.mubr.bf16.gmra.mrb[76].mxu1 %v9248_v30  ;;  %v7522_v27 = vcombine.low %v10384_v50, %v10386_v60  ;;  %v10436_v31 = vld [vmem:[#allocation6 + $0xa70] sm:$0xff]  ;;  %v7524_v30 = vcombine.low %v10390_v62, %v10392_v57  ;;  %v10440_v53 = vld [vmem:[#allocation6 + $0xa58] sm:$0xff] }
 0x31c   : > { %12071 = vst [vmem:[#allocation57_spill] sm:$0xff] %v10414_v47  ;;  %12073 = vst [vmem:[#allocation59_spill] sm:$0xff] %v10422_v56  ;;  %4713 = vmatprep.mubr.bf16.mxu0 %v9249_v29  ;;  %5292 = vmatprep.mubr.bf16.mxu1 %v9249_v29  ;;  %v7531_v34 = vcombine.high %v786_v35, %v790_v18  ;;  %v10442_v59 = vld [vmem:[#allocation6 + $0xa78] sm:$0xff]  ;;  %v7533_v61 = vcombine.high %v787_v51, %v791_v5  ;;  %v806_v45 = vld [vmem:[#allocation6 + $0xab0] sm:$0xff] }
 0x31d   : > { %4847 = vmatpush1.bf16.msra.mxu0 %v7514_v25  ;;  %5426 = vmatpush1.bf16.msra.mxu1 %v7516_v55  ;;  %v7530_v32 = vcombine.low %v786_v35, %v790_v18  ;;  %v7532_v36 = vcombine.low %v787_v51, %v791_v5  ;;  %v7539_v55 = vcombine.high %v10434_v39, %v10436_v31  ;;  %v807_v47 = vld [vmem:[#allocation6 + $0xab8] sm:$0xff] }
 0x31e   : > { %v3800_v49 = vpop.f32.mrb[36].mxu0  ;;  %4848 = vmatprep.subr.bf16.mxu0 %v7523_v28  ;;  %v4379_v29 = vpop.f32.mrb[36].mxu1  ;;  %5427 = vmatprep.subr.bf16.mxu1 %v7525_v54  ;;  %v7541_v18 = vcombine.high %v10440_v53, %v10442_v59 }
 0x31f   : > { %v3802_v25 = vpop.f32.mrb[37].mxu0  ;;  %v4381_v60 = vpop.f32.mrb[37].mxu1  ;;  %v10447_v28 = vadd.f32 %v3800_v49, %v10068_v6  ;;  %v10450_v62 = vadd.f32 %v4379_v29, %v10070_v8 }
 0x320   : > { %v3804_v50 = vpop.f32.mrb[38].mxu0  ;;  %v4383_v56 = vpop.f32.mrb[38].mxu1  ;;  %v10458_v5 = vadd.f32 %v3802_v25, %v10072_v9  ;;  %v10467_v29 = vadd.f32 %v4381_v60, %v10074_v12  ;;  %v9250_v25 = vld [vmem:[%s9843_s11 + $0xc8] ss:$24 sps:$4 sm:$0xff]   ;;  %v803_v60 = vld [vmem:[#allocation6 + $0xa98] sm:$0xff] }
 0x321   : > { %12074 = vst [vmem:[#allocation60_spill] sm:$0xff] %v10447_v28  ;;  %12075 = vst [vmem:[#allocation61_spill] sm:$0xff] %v10450_v62  ;;  %v10453_v57 = vadd.f32 %v3804_v50, %v10068_v6  ;;  %v3806_v54 = vpop.f32.mrb[39].mxu0  ;;  %4849 = vmatpush1.bf16.msra.mxu0 %v7522_v27  ;;  %v10461_v35 = vadd.f32 %v4383_v56, %v10070_v8  ;;  %v4385_v51 = vpop.f32.mrb[39].mxu1  ;;  %5428 = vmatpush1.bf16.msra.mxu1 %v7524_v30  ;;  %v802_v56 = vld [vmem:[#allocation6 + $0xa90] sm:$0xff]  ;;  %v10490_v62 = vld [vmem:[#allocation6 + $0xad8] sm:$0xff] }
 0x322   : > { %12077 = vst [vmem:[#allocation63_spill] sm:$0xff] %v10458_v5  ;;  %v10464_v49 = vadd.f32 %v3806_v54, %v10072_v9  ;;  %4850 = vmatprep.subr.bf16.mxu0 %v7531_v34  ;;  %12080 = vst [vmem:[#allocation66_spill] sm:$0xff] %v10467_v29  ;;  %v10472_v50 = vadd.f32 %v4385_v51, %v10074_v12  ;;  %5429 = vmatprep.subr.bf16.mxu1 %v7533_v61  ;;  %v9251_v30 = vld [vmem:[%s9843_s11 + $0xfc] ss:$24 sps:$4 sm:$0xff]  }
 0x323   : > { %12076 = vst [vmem:[#allocation62_spill] sm:$0xff] %v10453_v57  ;;  %12078 = vst [vmem:[#allocation64_spill] sm:$0xff] %v10461_v35  ;;  %4714 = vmatmul.mubr.bf16.gmra.mrb[80].mxu0 %v9250_v25  ;;  %5293 = vmatmul.mubr.bf16.gmra.mrb[80].mxu1 %v9250_v25  ;;  %v7538_v61 = vcombine.low %v10434_v39, %v10436_v31  ;;  %v10484_v27 = vld [vmem:[#allocation6 + $0xad0] sm:$0xff]  ;;  %v7540_v25 = vcombine.low %v10440_v53, %v10442_v59  ;;  %v10492_v35 = vld [vmem:[#allocation6 + $0xaf8] sm:$0xff] }
 0x324   : > { %12079 = vst [vmem:[#allocation65_spill] sm:$0xff] %v10464_v49  ;;  %12081 = vst [vmem:[#allocation67_spill] sm:$0xff] %v10472_v50  ;;  %4723 = vmatprep.mubr.bf16.mxu0 %v9251_v30  ;;  %5302 = vmatprep.mubr.bf16.mxu1 %v9251_v30  ;;  %v10486_v28 = vld [vmem:[#allocation6 + $0xaf0] sm:$0xff]  ;;  %v7547_v34 = vcombine.high %v802_v56, %v806_v45  ;;  %v7549_v51 = vcombine.high %v803_v60, %v807_v47  ;;  %v823_v49 = vld [vmem:[#allocation6 + $0xb38] sm:$0xff] }
 0x325   : > { %4851 = vmatpush1.bf16.msra.mxu0 %v7530_v32  ;;  %5430 = vmatpush1.bf16.msra.mxu1 %v7532_v36  ;;  %v7546_v57 = vcombine.low %v802_v56, %v806_v45  ;;  %v7548_v29 = vcombine.low %v803_v60, %v807_v47  ;;  %v7555_v36 = vcombine.high %v10484_v27, %v10486_v28  ;;  %v822_v5 = vld [vmem:[#allocation6 + $0xb30] sm:$0xff] }
 0x326   : > { %v3810_v54 = vpop.f32.mrb[40].mxu0  ;;  %4852 = vmatprep.subr.bf16.mxu0 %v7539_v55  ;;  %v4389_v30 = vpop.f32.mrb[40].mxu1  ;;  %5431 = vmatprep.subr.bf16.mxu1 %v7541_v18  ;;  %v7557_v45 = vcombine.high %v10490_v62, %v10492_v35 }
 0x327   : > { %v3812_v32 = vpop.f32.mrb[41].mxu0  ;;  %v4391_v31 = vpop.f32.mrb[41].mxu1  ;;  %v10497_v55 = vadd.f32 %v3810_v54, %v10068_v6  ;;  %v10500_v53 = vadd.f32 %v4389_v30, %v10070_v8 }
 0x328   : > { %v3814_v39 = vpop.f32.mrb[42].mxu0  ;;  %v4393_v50 = vpop.f32.mrb[42].mxu1  ;;  %v10508_v47 = vadd.f32 %v3812_v32, %v10072_v9  ;;  %v10517_v30 = vadd.f32 %v4391_v31, %v10074_v12  ;;  %v9252_v32 = vld [vmem:[%s9843_s11 + $0xf8] ss:$24 sps:$4 sm:$0xff]  }
 0x329   : > { %12082 = vst [vmem:[#allocation68_spill] sm:$0xff] %v10497_v55  ;;  %12083 = vst [vmem:[#allocation69_spill] sm:$0xff] %v10500_v53  ;;  %v10503_v59 = vadd.f32 %v3814_v39, %v10068_v6  ;;  %v3816_v18 = vpop.f32.mrb[43].mxu0  ;;  %4853 = vmatpush1.bf16.msra.mxu0 %v7538_v61  ;;  %v10511_v56 = vadd.f32 %v4393_v50, %v10070_v8  ;;  %v4395_v60 = vpop.f32.mrb[43].mxu1  ;;  %5432 = vmatpush1.bf16.msra.mxu1 %v7540_v25  ;;  %v818_v50 = vld [vmem:[#allocation6 + $0xb10] sm:$0xff]  ;;  %v819_v31 = vld [vmem:[#allocation6 + $0xb18] sm:$0xff] }
 0x32a   : > { %12085 = vst [vmem:[#allocation71_spill] sm:$0xff] %v10508_v47  ;;  %v10514_v54 = vadd.f32 %v3816_v18, %v10072_v9  ;;  %4854 = vmatprep.subr.bf16.mxu0 %v7547_v34  ;;  %12088 = vst [vmem:[#allocation74_spill] sm:$0xff] %v10517_v30  ;;  %v10522_v39 = vadd.f32 %v4395_v60, %v10074_v12  ;;  %5433 = vmatprep.subr.bf16.mxu1 %v7549_v51  ;;  %v9253_v25 = vld [vmem:[%s9843_s11 + $0x12c] ss:$24 sps:$4 sm:$0xff]   ;;  %v10534_v61 = vld [vmem:[#allocation6 + $0xb50] sm:$0xff] }
 0x32b   : > { %12084 = vst [vmem:[#allocation70_spill] sm:$0xff] %v10503_v59  ;;  %12086 = vst [vmem:[#allocation72_spill] sm:$0xff] %v10511_v56  ;;  %4724 = vmatmul.mubr.bf16.gmra.mrb[84].mxu0 %v9252_v32  ;;  %5303 = vmatmul.mubr.bf16.gmra.mrb[84].mxu1 %v9252_v32  ;;  %v7554_v51 = vcombine.low %v10484_v27, %v10486_v28  ;;  %v10536_v55 = vld [vmem:[#allocation6 + $0xb70] sm:$0xff]  ;;  %v7556_v32 = vcombine.low %v10490_v62, %v10492_v35  ;;  %v10540_v53 = vld [vmem:[#allocation6 + $0xb58] sm:$0xff] }
 0x32c   : > { %12087 = vst [vmem:[#allocation73_spill] sm:$0xff] %v10514_v54  ;;  %12089 = vst [vmem:[#allocation75_spill] sm:$0xff] %v10522_v39  ;;  %4733 = vmatprep.mubr.bf16.mxu0 %v9253_v25  ;;  %5312 = vmatprep.mubr.bf16.mxu1 %v9253_v25  ;;  %v7563_v34 = vcombine.high %v818_v50, %v822_v5  ;;  %v10542_v56 = vld [vmem:[#allocation6 + $0xb78] sm:$0xff]  ;;  %v7565_v60 = vcombine.high %v819_v31, %v823_v49  ;;  %v838_v47 = vld [vmem:[#allocation6 + $0xbb0] sm:$0xff] }
 0x32d   : > { %4855 = vmatpush1.bf16.msra.mxu0 %v7546_v57  ;;  %5434 = vmatpush1.bf16.msra.mxu1 %v7548_v29  ;;  %v7562_v59 = vcombine.low %v818_v50, %v822_v5  ;;  %v7564_v30 = vcombine.low %v819_v31, %v823_v49  ;;  %v7571_v29 = vcombine.high %v10534_v61, %v10536_v55  ;;  %v839_v54 = vld [vmem:[#allocation6 + $0xbb8] sm:$0xff] }
 0x32e   : > { %v3820_v18 = vpop.f32.mrb[44].mxu0  ;;  %4856 = vmatprep.subr.bf16.mxu0 %v7555_v36  ;;  %v4399_v25 = vpop.f32.mrb[44].mxu1  ;;  %5435 = vmatprep.subr.bf16.mxu1 %v7557_v45  ;;  %v7573_v5 = vcombine.high %v10540_v53, %v10542_v56 }
 0x32f   : > { %v3822_v57 = vpop.f32.mrb[45].mxu0  ;;  %v4401_v28 = vpop.f32.mrb[45].mxu1  ;;  %v10547_v36 = vadd.f32 %v3820_v18, %v10068_v6  ;;  %v10550_v62 = vadd.f32 %v4399_v25, %v10070_v8 }
 0x330   : > { %v3824_v27 = vpop.f32.mrb[46].mxu0  ;;  %v4403_v39 = vpop.f32.mrb[46].mxu1  ;;  %v10558_v49 = vadd.f32 %v3822_v57, %v10072_v9  ;;  %v10567_v25 = vadd.f32 %v4401_v28, %v10074_v12  ;;  %v9254_v57 = vld [vmem:[%s9843_s11 + $0x128] ss:$24 sps:$4 sm:$0xff]   ;;  %v835_v28 = vld [vmem:[#allocation6 + $0xb98] sm:$0xff] }
 0x331   : > { %12090 = vst [vmem:[#allocation76_spill] sm:$0xff] %v10547_v36  ;;  %12091 = vst [vmem:[#allocation77_spill] sm:$0xff] %v10550_v62  ;;  %v10553_v35 = vadd.f32 %v3824_v27, %v10068_v6  ;;  %v3826_v45 = vpop.f32.mrb[47].mxu0  ;;  %4857 = vmatpush1.bf16.msra.mxu0 %v7554_v51  ;;  %v10561_v50 = vadd.f32 %v4403_v39, %v10070_v8  ;;  %v4405_v31 = vpop.f32.mrb[47].mxu1  ;;  %5436 = vmatpush1.bf16.msra.mxu1 %v7556_v32  ;;  %v834_v39 = vld [vmem:[#allocation6 + $0xb90] sm:$0xff]  ;;  %v847_v62 = vld [vmem:[#allocation6 + $0xbf8] sm:$0xff] }
 0x332   : > { %12093 = vst [vmem:[#allocation79_spill] sm:$0xff] %v10558_v49  ;;  %v10564_v18 = vadd.f32 %v3826_v45, %v10072_v9  ;;  %4858 = vmatprep.subr.bf16.mxu0 %v7563_v34  ;;  %12096 = vst [vmem:[#allocation82_spill] sm:$0xff] %v10567_v25  ;;  %v10572_v27 = vadd.f32 %v4405_v31, %v10074_v12  ;;  %5437 = vmatprep.subr.bf16.mxu1 %v7565_v60  ;;  %v9255_v32 = vld [vmem:[%s9843_s11 + $0x15c] ss:$24 sps:$4 sm:$0xff]  }
 0x333   : > { %12092 = vst [vmem:[#allocation78_spill] sm:$0xff] %v10553_v35  ;;  %12094 = vst [vmem:[#allocation80_spill] sm:$0xff] %v10561_v50  ;;  %4734 = vmatmul.mubr.bf16.gmra.mrb[88].mxu0 %v9254_v57  ;;  %5313 = vmatmul.mubr.bf16.gmra.mrb[88].mxu1 %v9254_v57  ;;  %v7570_v60 = vcombine.low %v10534_v61, %v10536_v55  ;;  %v842_v51 = vld [vmem:[#allocation6 + $0xbd0] sm:$0xff]  ;;  %v7572_v57 = vcombine.low %v10540_v53, %v10542_v56  ;;  %v843_v34 = vld [vmem:[#allocation6 + $0xbd8] sm:$0xff] }
 0x334   : > { %12095 = vst [vmem:[#allocation81_spill] sm:$0xff] %v10564_v18  ;;  %12097 = vst [vmem:[#allocation83_spill] sm:$0xff] %v10572_v27  ;;  %4743 = vmatprep.mubr.bf16.mxu0 %v9255_v32  ;;  %5322 = vmatprep.mubr.bf16.mxu1 %v9255_v32  ;;  %v846_v36 = vld [vmem:[#allocation6 + $0xbf0] sm:$0xff]  ;;  %v7579_v45 = vcombine.high %v834_v39, %v838_v47  ;;  %v7581_v31 = vcombine.high %v835_v28, %v839_v54 }
 0x335   : > { %4859 = vmatpush1.bf16.msra.mxu0 %v7562_v59  ;;  %5438 = vmatpush1.bf16.msra.mxu1 %v7564_v30  ;;  %v7578_v25 = vcombine.low %v834_v39, %v838_v47  ;;  %v7580_v27 = vcombine.low %v835_v28, %v839_v54  ;;  %v7587_v55 = vcombine.high %v842_v51, %v846_v36 }
 0x336   : > { %v3830_v35 = vpop.f32.mrb[48].mxu0  ;;  %4860 = vmatprep.subr.bf16.mxu0 %v7571_v29  ;;  %v4409_v50 = vpop.f32.mrb[48].mxu1  ;;  %5439 = vmatprep.subr.bf16.mxu1 %v7573_v5  ;;  %v7589_v5 = vcombine.high %v843_v34, %v847_v62 }
 0x337   : > { %v3832_v49 = vpop.f32.mrb[49].mxu0  ;;  %v4411_v32 = vpop.f32.mrb[49].mxu1  ;;  %v10587_v61 = vadd.f32 %v3830_v35, %v10068_v6  ;;  %v10590_v30 = vadd.f32 %v4409_v50, %v10070_v8 }
 0x338   : > { %v3834_v59 = vpop.f32.mrb[50].mxu0  ;;  %v4413_v56 = vpop.f32.mrb[50].mxu1  ;;  %v10596_v18 = vadd.f32 %v3832_v49, %v10072_v9  ;;  %v10605_v50 = vadd.f32 %v4411_v32, %v10074_v12  ;;  %v9256_v49 = vld [vmem:[%s9843_s11 + $0x158] ss:$24 sps:$4 sm:$0xff]   ;;  %v7586_v32 = vcombine.low %v842_v51, %v846_v36 }
 0x339   : > { %v10593_v53 = vadd.f32 %v3834_v59, %v10068_v6  ;;  %v3836_v29 = vpop.f32.mrb[51].mxu0  ;;  %4861 = vmatpush1.bf16.msra.mxu0 %v7570_v60  ;;  %v10599_v47 = vadd.f32 %v4413_v56, %v10070_v8  ;;  %v4415_v35 = vpop.f32.mrb[51].mxu1  ;;  %5440 = vmatpush1.bf16.msra.mxu1 %v7572_v57 }
 0x33a   : > { %v10602_v54 = vadd.f32 %v3836_v29, %v10072_v9  ;;  %4862 = vmatprep.subr.bf16.mxu0 %v7579_v45  ;;  %v10610_v28 = vadd.f32 %v4415_v35, %v10074_v12  ;;  %5441 = vmatprep.subr.bf16.mxu1 %v7581_v31  ;;  %v9257_v45 = vld [vmem:[%s9843_s11 + $0x18c] ss:$24 sps:$4 sm:$0xff]   ;;  %v7588_v29 = vcombine.low %v843_v34, %v847_v62 }
 0x33b   : > { %4744 = vmatmul.mubr.bf16.gmra.mrb[92].mxu0 %v9256_v49  ;;  %5323 = vmatmul.mubr.bf16.gmra.mrb[92].mxu1 %v9256_v49 }
 0x33c   : > { %4753 = vmatprep.mubr.bf16.mxu0 %v9257_v45  ;;  %5332 = vmatprep.mubr.bf16.mxu1 %v9257_v45 }
 0x33d   : > { %4863 = vmatpush1.bf16.msra.mxu0 %v7578_v25  ;;  %5442 = vmatpush1.bf16.msra.mxu1 %v7580_v27 }
 0x33e   : > { %v3840_v56 = vpop.f32.mrb[52].mxu0  ;;  %4864 = vmatprep.subr.bf16.mxu0 %v7587_v55  ;;  %v4419_v31 = vpop.f32.mrb[52].mxu1  ;;  %5443 = vmatprep.subr.bf16.mxu1 %v7589_v5 }
 0x33f   : > { %v3842_v35 = vpop.f32.mrb[53].mxu0  ;;  %v4421_v60 = vpop.f32.mrb[53].mxu1  ;;  %v10621_v49 = vadd.f32 %v3840_v56, %v10068_v6  ;;  %v10627_v36 = vadd.f32 %v4419_v31, %v10070_v8  ;;  %v9259_v56 = vld [vmem:[%s9843_s11 + $0x1bc] ss:$24 sps:$4 sm:$0xff]  }
 0x340   : > { %v3844_v39 = vpop.f32.mrb[54].mxu0  ;;  %v4423_v57 = vpop.f32.mrb[54].mxu1  ;;  %v10630_v62 = vadd.f32 %v3842_v35, %v10072_v9  ;;  %v10639_v34 = vadd.f32 %v4421_v60, %v10074_v12  ;;  %v9147_v60 = vld [vmem:[#allocation9 + $0xc0] sm:$0xff]  }
 0x341   : > { %12098 = vst [vmem:[#allocation84_spill] sm:$0xff] %v10621_v49  ;;  %v10624_v59 = vadd.f32 %v3844_v39, %v10068_v6  ;;  %v3846_v45 = vpop.f32.mrb[55].mxu0  ;;  %4865 = vmatpush1.bf16.msra.mxu0 %v7586_v32  ;;  %12100 = vst [vmem:[#allocation86_spill] sm:$0xff] %v10627_v36  ;;  %v10633_v25 = vadd.f32 %v4423_v57, %v10070_v8  ;;  %v4425_v27 = vpop.f32.mrb[55].mxu1  ;;  %5444 = vmatpush1.bf16.msra.mxu1 %v7588_v29  ;;  %v9258_v39 = vld [vmem:[%s9843_s11 + $0x188] ss:$24 sps:$4 sm:$0xff]  }
 0x342   : > { %v10636_v51 = vadd.f32 %v3846_v45, %v10072_v9  ;;  %12102 = vst [vmem:[#allocation88_spill] sm:$0xff] %v10639_v34  ;;  %v10644_v5 = vadd.f32 %v4425_v27, %v10074_v12  ;;  %v9145_v29 = vld [vmem:[#allocation9 + $0x40] sm:$0xff]   ;;  %7773 = vmatprep.subr.bf16.mxu1 %v9147_v60 }
 0x343   : > { %12099 = vst [vmem:[#allocation85_spill] sm:$0xff] %v10624_v59  ;;  %12101 = vst [vmem:[#allocation87_spill] sm:$0xff] %v10633_v25  ;;  %4754 = vmatmul.mubr.bf16.gmra.mrb[96].mxu0 %v9258_v39  ;;  %5333 = vmatmul.mubr.bf16.gmra.mrb[96].mxu1 %v9258_v39 }
 0x344   : > { %12103 = vst [vmem:[#allocation89_spill] sm:$0xff] %v10644_v5  ;;  %4763 = vmatprep.mubr.bf16.mxu0 %v9259_v56  ;;  %5342 = vmatprep.mubr.bf16.mxu1 %v9259_v56 }
 0x345   : > { %7661 = vmatprep.subr.bf16.mxu0 %v9145_v29 }
 0x346   : > { %v3850_v35 = vpop.f32.mrb[56].mxu0  ;;  %v4429_v45 = vpop.f32.mrb[56].mxu1 }
 0x347   : > { %v3852_v27 = vpop.f32.mrb[57].mxu0  ;;  %v4431_v55 = vpop.f32.mrb[57].mxu1  ;;  %v10655_v36 = vadd.f32 %v3850_v35, %v10068_v6  ;;  %v10661_v31 = vadd.f32 %v4429_v45, %v10070_v8  ;;  %v9260_v45 = vld [vmem:[%s9843_s11 + $0x1b8] ss:$24 sps:$4 sm:$0xff]  }
 0x348   : > { %v3854_v57 = vpop.f32.mrb[58].mxu0  ;;  %v4433_v32 = vpop.f32.mrb[58].mxu1  ;;  %v10664_v56 = vadd.f32 %v3852_v27, %v10072_v9  ;;  %v10673_v49 = vadd.f32 %v4431_v55, %v10074_v12 }
 0x349   : > { %12104 = vst [vmem:[#allocation90_spill] sm:$0xff] %v10655_v36  ;;  %v10658_v39 = vadd.f32 %v3854_v57, %v10068_v6  ;;  %v3856_v25 = vpop.f32.mrb[59].mxu0  ;;  %12106 = vst [vmem:[#allocation92_spill] sm:$0xff] %v10661_v31  ;;  %v10667_v29 = vadd.f32 %v4433_v32, %v10070_v8  ;;  %v4435_v35 = vpop.f32.mrb[59].mxu1 }
 0x34a   : > { %v10670_v60 = vadd.f32 %v3856_v25, %v10072_v9  ;;  %v10678_v59 = vadd.f32 %v4435_v35, %v10074_v12  ;;  %v9261_v25 = vld [vmem:[%s9843_s11 + $0x1ec] ss:$24 sps:$4 sm:$0xff]  }
 0x34b   : > { %12105 = vst [vmem:[#allocation91_spill] sm:$0xff] %v10658_v39  ;;  %12107 = vst [vmem:[#allocation93_spill] sm:$0xff] %v10667_v29  ;;  %4764 = vmatmul.mubr.bf16.gmra.mrb[100].mxu0 %v9260_v45  ;;  %5343 = vmatmul.mubr.bf16.gmra.mrb[100].mxu1 %v9260_v45 }
 0x34c   : > { %4773 = vmatprep.mubr.bf16.mxu0 %v9261_v25  ;;  %5352 = vmatprep.mubr.bf16.mxu1 %v9261_v25 }
 0x34e   : > { %v3860_v34 = vpop.f32.mrb[60].mxu0  ;;  %v4439_v57 = vpop.f32.mrb[60].mxu1 }
 0x34f   : > { %v3862_v35 = vpop.f32.mrb[61].mxu0  ;;  %v4441_v36 = vpop.f32.mrb[61].mxu1  ;;  %v10689_v5 = vadd.f32 %v3860_v34, %v10068_v6  ;;  %v10695_v31 = vadd.f32 %v4439_v57, %v10070_v8 }
 0x350   : > { %v3864_v39 = vpop.f32.mrb[62].mxu0  ;;  %v4443_v45 = vpop.f32.mrb[62].mxu1  ;;  %v10698_v25 = vadd.f32 %v3862_v35, %v10072_v9  ;;  %v9262_v35 = vld [vmem:[%s9843_s11 + $0x1e8] ss:$24 sps:$4 sm:$0xff]  }
 0x351   : > { %12108 = vst [vmem:[#allocation94_spill] sm:$0xff] %v10689_v5  ;;  %v10692_v27 = vadd.f32 %v3864_v39, %v10068_v6  ;;  %v3866_v32 = vpop.f32.mrb[63].mxu0  ;;  %12110 = vst [vmem:[#allocation96_spill] sm:$0xff] %v10695_v31  ;;  %v10701_v55 = vadd.f32 %v4443_v45, %v10070_v8  ;;  %v4445_v34 = vpop.f32.mrb[63].mxu1  ;;  %v10707_v6 = vadd.f32 %v4441_v36, %v10074_v12  ;;  %v9265_v45 = vld [vmem:[%s9843_s11 + $0x24c] ss:$24 sps:$4 sm:$0xff]  }
 0x352   : > { %v10704_v29 = vadd.f32 %v3866_v32, %v10072_v9  ;;  %v10712_v57 = vadd.f32 %v4445_v34, %v10074_v12  ;;  %v9263_v32 = vld [vmem:[%s9843_s11 + $0x21c] ss:$24 sps:$4 sm:$0xff]   ;;  %v9264_v12 = vld [vmem:[%s9843_s11 + $0x218] ss:$24 sps:$4 sm:$0xff]   ;;  %v9266_v34 = vld [vmem:[%s9843_s11 + $0x248] ss:$24 sps:$4 sm:$0xff]  }
 0x353   : > { %12109 = vst [vmem:[#allocation95_spill] sm:$0xff] %v10692_v27  ;;  %12111 = vst [vmem:[#allocation97_spill] sm:$0xff] %v10701_v55  ;;  %4774 = vmatmul.mubr.bf16.gmra.mrb[104].mxu0 %v9262_v35  ;;  %5353 = vmatmul.mubr.bf16.gmra.mrb[104].mxu1 %v9262_v35  ;;  %v9267_v35 = vld [vmem:[%s9843_s11 + $0x27c] ss:$24 sps:$4 sm:$0xff]   ;;  %v9268_v8 = vld [vmem:[%s9843_s11 + $0x278] ss:$24 sps:$4 sm:$0xff]  }
 0x354   : > { %12112 = vst [vmem:[#allocation98_spill] sm:$0xff] %v10707_v6  ;;  %4783 = vmatprep.mubr.bf16.mxu0 %v9263_v32  ;;  %5362 = vmatprep.mubr.bf16.mxu1 %v9263_v32  ;;  %v9269_v32 = vld [vmem:[%s9843_s11 + $0x2ac] ss:$24 sps:$4 sm:$0xff]   ;;  %v9274_v9 = vld [vmem:[%s9843_s11 + $0x10] ss:$24 sps:$4 sm:$0xff]   ;;  %v9154_v55 = vld [vmem:[#allocation9 + $0x10] sm:$0xff]  }
 0x355   : > { %v9273_v39 = vld [vmem:[%s9843_s11 + $0x14] ss:$24 sps:$4 sm:$0xff]   ;;  %v9275_v31 = vld [vmem:[%s9843_s11 + $0x44] ss:$24 sps:$4 sm:$0xff]  }
 0x356   : > { %v9148_v36 = vld [vmem:[#allocation9 + $0x80] sm:$0xff]   ;;  %v9156_v5 = vld [vmem:[#allocation9 + $0x90] sm:$0xff]   ;;  %v9157_v27 = vld [vmem:[#allocation9 + $0x58] sm:$0xff]  }
 0x357   : > { %v9158_v6 = vld [vmem:[#allocation9 + $0xd8] sm:$0xff]  }
 0x35b   : > { %4784 = vmatmul.mubr.bf16.gmra.mrb[108].mxu0 %v9264_v12  ;;  %5363 = vmatmul.mubr.bf16.gmra.mrb[108].mxu1 %v9264_v12  ;;  %v9270_v12 = vld [vmem:[%s9843_s11 + $0x2a8] ss:$24 sps:$4 sm:$0xff]  }
 0x35c   : > { %4793 = vmatprep.mubr.bf16.mxu0 %v9265_v45  ;;  %5372 = vmatprep.mubr.bf16.mxu1 %v9265_v45  ;;  %v9271_v45 = vld [vmem:[%s9843_s11 + $0x2dc] ss:$24 sps:$4 sm:$0xff]  }
 0x363   : > { %4794 = vmatmul.mubr.bf16.gmra.mrb[112].mxu0 %v9266_v34  ;;  %5373 = vmatmul.mubr.bf16.gmra.mrb[112].mxu1 %v9266_v34  ;;  %v9272_v34 = vld [vmem:[%s9843_s11 + $0x2d8] ss:$24 sps:$4 sm:$0xff]  }
 0x364   : > { %4803 = vmatprep.mubr.bf16.mxu0 %v9267_v35  ;;  %5382 = vmatprep.mubr.bf16.mxu1 %v9267_v35  ;;  %v9146_v35 = vld [vmem:[#allocation9] sm:$0xff]  }
 0x36b   : > { %4804 = vmatmul.mubr.bf16.gmra.mrb[116].mxu0 %v9268_v8  ;;  %5383 = vmatmul.mubr.bf16.gmra.mrb[116].mxu1 %v9268_v8  ;;  %v9149_v8 = vld [vmem:[#allocation9 + $0x48] sm:$0xff]  }
 0x36c   : > { %4813 = vmatprep.mubr.bf16.mxu0 %v9269_v32  ;;  %5392 = vmatprep.mubr.bf16.mxu1 %v9269_v32  ;;  %v9151_v32 = vld [vmem:[#allocation9 + $0xc8] sm:$0xff]  }
 0x373   : > { %4814 = vmatmul.mubr.bf16.gmra.mrb[120].mxu0 %v9270_v12  ;;  %5393 = vmatmul.mubr.bf16.gmra.mrb[120].mxu1 %v9270_v12  ;;  %v9150_v12 = vld [vmem:[#allocation9 + $0x8] sm:$0xff]  }
 0x374   : > { %4823 = vmatprep.mubr.bf16.mxu0 %v9271_v45  ;;  %5402 = vmatprep.mubr.bf16.mxu1 %v9271_v45  ;;  %v9152_v45 = vld [vmem:[#allocation9 + $0x88] sm:$0xff]  }
 0x37b   : > { %4824 = vmatmul.mubr.bf16.gmra.mrb[124].mxu0 %v9272_v34  ;;  %5403 = vmatmul.mubr.bf16.gmra.mrb[124].mxu1 %v9272_v34  ;;  %v9153_v34 = vld [vmem:[#allocation9 + $0x50] sm:$0xff]  }
 0x37c   : > { %4866 = vmatprep.mubr.bf16.mxu0 %v9273_v39  ;;  %5445 = vmatprep.mubr.bf16.mxu1 %v9273_v39  ;;  %v9155_v39 = vld [vmem:[#allocation9 + $0xd0] sm:$0xff]  }
 0x383   : > { %4867 = vmatmul.mubr.bf16.vlgmr.msra.gmra.mrb[64].mxu0 %v9274_v9  ;;  %5446 = vmatmul.mubr.bf16.vlgmr.msra.gmra.mrb[64].mxu1 %v9274_v9  ;;  %v9276_v9 = vld [vmem:[%s9843_s11 + $0x40] ss:$24 sps:$4 sm:$0xff]  }
 0x384   : > { %4876 = vmatprep.mubr.bf16.mxu0 %v9275_v31  ;;  %5455 = vmatprep.mubr.bf16.mxu1 %v9275_v31  ;;  %v9277_v31 = vld [vmem:[%s9843_s11 + $0x74] ss:$24 sps:$4 sm:$0xff]  }
 0x385   : > { %7662 = vmatpush3.bf16.msra.mxu0 %v9146_v35  ;;  %7774 = vmatpush3.bf16.msra.mxu1 %v9148_v36  ;;  %v9159_v36 = vld [vmem:[#allocation9 + $0x18] sm:$0xff]  }
 0x386   : > { %7663 = vmatprep.subr.bf16.mxu0 %v9149_v8  ;;  %7775 = vmatprep.subr.bf16.mxu1 %v9151_v32  ;;  %v9160_v35 = vld [vmem:[#allocation9 + $0x98] sm:$0xff]   ;;  %v9161_v8 = vld [vmem:[#allocation9 + $0x60] sm:$0xff]  }
 0x387   : > { %v9162_v32 = vld [vmem:[#allocation9 + $0xe0] sm:$0xff]  }
 0x389   : > { %7664 = vmatpush3.bf16.msra.mxu0 %v9150_v12  ;;  %7776 = vmatpush3.bf16.msra.mxu1 %v9152_v45  ;;  %v9163_v12 = vld [vmem:[#allocation9 + $0x20] sm:$0xff]  }
 0x38a   : > { %7665 = vmatprep.subr.bf16.mxu0 %v9153_v34  ;;  %7777 = vmatprep.subr.bf16.mxu1 %v9155_v39  ;;  %v9164_v45 = vld [vmem:[#allocation9 + $0xa0] sm:$0xff]   ;;  %v9165_v34 = vld [vmem:[#allocation9 + $0x68] sm:$0xff]  }
 0x38b   : > { %4877 = vmatmul.mubr.bf16.gmra.mrb[68].mxu0 %v9276_v9  ;;  %5456 = vmatmul.mubr.bf16.gmra.mrb[68].mxu1 %v9276_v9  ;;  %v9278_v39 = vld [vmem:[%s9843_s11 + $0x70] ss:$24 sps:$4 sm:$0xff]  }
 0x38c   : > { %4886 = vmatprep.mubr.bf16.mxu0 %v9277_v31  ;;  %5465 = vmatprep.mubr.bf16.mxu1 %v9277_v31  ;;  %v9166_v9 = vld [vmem:[#allocation9 + $0xe8] sm:$0xff]   ;;  %v9170_v31 = vld [vmem:[#allocation9 + $0xf0] sm:$0xff]  }
 0x38d   : > { %7666 = vmatpush3.bf16.msra.mxu0 %v9154_v55  ;;  %7778 = vmatpush3.bf16.msra.mxu1 %v9156_v5  ;;  %v9279_v55 = vld [vmem:[%s9843_s11 + $0xa4] ss:$24 sps:$4 sm:$0xff]   ;;  %v9167_v5 = vld [vmem:[#allocation9 + $0x28] sm:$0xff]  }
 0x38e   : > { %7667 = vmatprep.subr.bf16.mxu0 %v9157_v27  ;;  %7779 = vmatprep.subr.bf16.mxu1 %v9158_v6  ;;  %v9168_v27 = vld [vmem:[#allocation9 + $0xa8] sm:$0xff]   ;;  %v9169_v6 = vld [vmem:[#allocation9 + $0x70] sm:$0xff]  }
 0x391   : > { %7668 = vmatpush3.bf16.msra.mxu0 %v9159_v36  ;;  %7780 = vmatpush3.bf16.msra.mxu1 %v9160_v35  ;;  %v9171_v36 = vld [vmem:[#allocation9 + $0x30] sm:$0xff]  }
 0x392   : > { %7669 = vmatprep.subr.bf16.mxu0 %v9161_v8  ;;  %7781 = vmatprep.subr.bf16.mxu1 %v9162_v32  ;;  %v9172_v35 = vld [vmem:[#allocation9 + $0xb0] sm:$0xff]   ;;  %v9173_v8 = vld [vmem:[#allocation9 + $0x78] sm:$0xff]  }
 0x393   : > { %4887 = vmatmul.mubr.bf16.gmra.mrb[72].mxu0 %v9278_v39  ;;  %5466 = vmatmul.mubr.bf16.gmra.mrb[72].mxu1 %v9278_v39  ;;  %v9280_v32 = vld [vmem:[%s9843_s11 + $0xa0] ss:$24 sps:$4 sm:$0xff]  }
 0x394   : > { %4896 = vmatprep.mubr.bf16.mxu0 %v9279_v55  ;;  %5475 = vmatprep.mubr.bf16.mxu1 %v9279_v55  ;;  %v9174_v39 = vld [vmem:[#allocation9 + $0xf8] sm:$0xff]  }
 0x395   : > { %7670 = vmatpush3.bf16.msra.mxu0 %v9163_v12  ;;  %7782 = vmatpush3.bf16.msra.mxu1 %v9164_v45  ;;  %v9281_v12 = vld [vmem:[%s9843_s11 + $0xd4] ss:$24 sps:$4 sm:$0xff]   ;;  %v9175_v45 = vld [vmem:[#allocation9 + $0x38] sm:$0xff]  }
 0x396   : > { %7671 = vmatprep.subr.bf16.mxu0 %v9165_v34  ;;  %7783 = vmatprep.subr.bf16.mxu1 %v9166_v9  ;;  %v9176_v34 = vld [vmem:[#allocation9 + $0xb8] sm:$0xff]   ;;  %v9282_v9 = vld [vmem:[%s9843_s11 + $0xd0] ss:$24 sps:$4 sm:$0xff]  }
 0x397   : > { %v9283_v55 = vld [vmem:[%s9843_s11 + $0x104] ss:$24 sps:$4 sm:$0xff]  }
 0x399   : > { %7672 = vmatpush3.bf16.msra.mxu0 %v9167_v5  ;;  %7784 = vmatpush3.bf16.msra.mxu1 %v9168_v27  ;;  %v9284_v5 = vld [vmem:[%s9843_s11 + $0x100] ss:$24 sps:$4 sm:$0xff]   ;;  %v9285_v27 = vld [vmem:[%s9843_s11 + $0x134] ss:$24 sps:$4 sm:$0xff]  }
 0x39a   : > { %7673 = vmatprep.subr.bf16.mxu0 %v9169_v6  ;;  %7785 = vmatprep.subr.bf16.mxu1 %v9170_v31  ;;  %v9286_v6 = vld [vmem:[%s9843_s11 + $0x130] ss:$24 sps:$4 sm:$0xff]   ;;  %v9287_v31 = vld [vmem:[%s9843_s11 + $0x164] ss:$24 sps:$4 sm:$0xff]  }
 0x39b   : > { %4897 = vmatmul.mubr.bf16.gmra.mrb[76].mxu0 %v9280_v32  ;;  %5476 = vmatmul.mubr.bf16.gmra.mrb[76].mxu1 %v9280_v32  ;;  %v9291_v32 = vld [vmem:[%s9843_s11 + $0x1c4] ss:$24 sps:$4 sm:$0xff]  }
 0x39c   : > { %4906 = vmatprep.mubr.bf16.mxu0 %v9281_v12  ;;  %5485 = vmatprep.mubr.bf16.mxu1 %v9281_v12  ;;  %v9179_v12 = vld [vmem:[#allocation9 + $0x1c0] sm:$0xff]  }
 0x39d   : > { %7674 = vmatpush3.bf16.msra.mxu0 %v9171_v36  ;;  %7786 = vmatpush3.bf16.msra.mxu1 %v9172_v35  ;;  %v9288_v36 = vld [vmem:[%s9843_s11 + $0x160] ss:$24 sps:$4 sm:$0xff]   ;;  %v9289_v35 = vld [vmem:[%s9843_s11 + $0x194] ss:$24 sps:$4 sm:$0xff]  }
 0x39e   : > { %7675 = vmatprep.subr.bf16.mxu0 %v9173_v8  ;;  %7787 = vmatprep.subr.bf16.mxu1 %v9174_v39  ;;  %v9290_v8 = vld [vmem:[%s9843_s11 + $0x190] ss:$24 sps:$4 sm:$0xff]  }
 0x39f   : > { %v9177_v39 = vld [vmem:[#allocation9 + $0x140] sm:$0xff]  }
 0x3a1   : > { %7676 = vmatpush3.bf16.msra.mxu0 %v9175_v45  ;;  %7788 = vmatpush3.bf16.msra.mxu1 %v9176_v34  ;;  %v9292_v45 = vld [vmem:[%s9843_s11 + $0x1c0] ss:$24 sps:$4 sm:$0xff]   ;;  %v9293_v34 = vld [vmem:[%s9843_s11 + $0x1f4] ss:$24 sps:$4 sm:$0xff]  }
 0x3a2   : > { %7885 = vmatprep.subr.bf16.mxu0 %v9177_v39  ;;  %7997 = vmatprep.subr.bf16.mxu1 %v9179_v12  ;;  %v9304_v39 = vld [vmem:[%s9843_s11 + $0x2e0] ss:$24 sps:$4 sm:$0xff]   ;;  %v12113_v12 = vpack.c.bf16 %v10092_v22, %v10086_v20  ;;  %v12117_v20 = vpack.c.bf16 %v10126_v44, %v10120_v42  ;;  %v12118_v22 = vpack.c.bf16 %v10134_v48, %v10129_v46 }
 0x3a3   : > { %4907 = vmatmul.mubr.bf16.gmra.mrb[80].mxu0 %v9282_v9  ;;  %5486 = vmatmul.mubr.bf16.gmra.mrb[80].mxu1 %v9282_v9  ;;  %v9294_v9 = vld [vmem:[%s9843_s11 + $0x1f0] ss:$24 sps:$4 sm:$0xff]   ;;  %v12119_v42 = vpack.c.bf16 %v10114_v38, %v10111_v37  ;;  %v9190_v44 = vld [vmem:[#allocation9 + $0x1d8] sm:$0xff]   ;;  %v12120_v46 = vpack.c.bf16 %v10123_v43, %v10117_v41  ;;  %v12121_v48 = vpack.c.bf16 %v10160_v13, %v10154_v10 }
 0x3a4   : > { %4916 = vmatprep.mubr.bf16.mxu0 %v9283_v55  ;;  %5495 = vmatprep.mubr.bf16.mxu1 %v9283_v55  ;;  %v9295_v55 = vld [vmem:[%s9843_s11 + $0x224] ss:$24 sps:$4 sm:$0xff]   ;;  %v9193_v38 = vld [vmem:[#allocation9 + $0x160] sm:$0xff]   ;;  %v9197_v43 = vld [vmem:[#allocation9 + $0x168] sm:$0xff]   ;;  %v12123_v10 = vpack.c.bf16 %v10148_v3, %v10145_v2 }
 0x3a5   : > { %v9192_v37 = vld [vmem:[#allocation9 + $0x198] sm:$0xff]   ;;  %v9196_v41 = vld [vmem:[#allocation9 + $0x1a0] sm:$0xff]   ;;  %v9198_v13 = vld [vmem:[#allocation9 + $0x1e8] sm:$0xff]  }
 0x3a6   : > { %v9200_v2 = vld [vmem:[#allocation9 + $0x1a8] sm:$0xff]   ;;  %v9201_v3 = vld [vmem:[#allocation9 + $0x170] sm:$0xff]  }
 0x3ab   : > { %4917 = vmatmul.mubr.bf16.gmra.mrb[84].mxu0 %v9284_v5  ;;  %5496 = vmatmul.mubr.bf16.gmra.mrb[84].mxu1 %v9284_v5  ;;  %v9296_v5 = vld [vmem:[%s9843_s11 + $0x220] ss:$24 sps:$4 sm:$0xff]  }
 0x3ac   : > { %4926 = vmatprep.mubr.bf16.mxu0 %v9285_v27  ;;  %5505 = vmatprep.mubr.bf16.mxu1 %v9285_v27  ;;  %v9297_v27 = vld [vmem:[%s9843_s11 + $0x254] ss:$24 sps:$4 sm:$0xff]  }
 0x3b3   : > { %4927 = vmatmul.mubr.bf16.gmra.mrb[88].mxu0 %v9286_v6  ;;  %5506 = vmatmul.mubr.bf16.gmra.mrb[88].mxu1 %v9286_v6  ;;  %v9298_v6 = vld [vmem:[%s9843_s11 + $0x250] ss:$24 sps:$4 sm:$0xff]  }
 0x3b4   : > { %4936 = vmatprep.mubr.bf16.mxu0 %v9287_v31  ;;  %5515 = vmatprep.mubr.bf16.mxu1 %v9287_v31  ;;  %v9299_v31 = vld [vmem:[%s9843_s11 + $0x284] ss:$24 sps:$4 sm:$0xff]  }
 0x3bb   : > { %4937 = vmatmul.mubr.bf16.gmra.mrb[92].mxu0 %v9288_v36  ;;  %5516 = vmatmul.mubr.bf16.gmra.mrb[92].mxu1 %v9288_v36  ;;  %v9300_v36 = vld [vmem:[%s9843_s11 + $0x280] ss:$24 sps:$4 sm:$0xff]  }
 0x3bc   : > { %4946 = vmatprep.mubr.bf16.mxu0 %v9289_v35  ;;  %5525 = vmatprep.mubr.bf16.mxu1 %v9289_v35  ;;  %v9301_v35 = vld [vmem:[%s9843_s11 + $0x2b4] ss:$24 sps:$4 sm:$0xff]  }
 0x3c3   : > { %4947 = vmatmul.mubr.bf16.gmra.mrb[96].mxu0 %v9290_v8  ;;  %5526 = vmatmul.mubr.bf16.gmra.mrb[96].mxu1 %v9290_v8  ;;  %v9302_v8 = vld [vmem:[%s9843_s11 + $0x2b0] ss:$24 sps:$4 sm:$0xff]  }
 0x3c4   : > { %4956 = vmatprep.mubr.bf16.mxu0 %v9291_v32  ;;  %5535 = vmatprep.mubr.bf16.mxu1 %v9291_v32  ;;  %v9303_v32 = vld [vmem:[%s9843_s11 + $0x2e4] ss:$24 sps:$4 sm:$0xff]  }
 0x3cb   : > { %4957 = vmatmul.mubr.bf16.gmra.mrb[100].mxu0 %v9292_v45  ;;  %5536 = vmatmul.mubr.bf16.gmra.mrb[100].mxu1 %v9292_v45  ;;  %v12114_v45 = vpack.c.bf16 %v10100_v26, %v10095_v24  ;;  %v9182_v24 = vld [vmem:[#allocation9 + $0x108] sm:$0xff]  }
 0x3cc   : > { %4966 = vmatprep.mubr.bf16.mxu0 %v9293_v34  ;;  %5545 = vmatprep.mubr.bf16.mxu1 %v9293_v34  ;;  %v9178_v34 = vld [vmem:[#allocation9 + $0x100] sm:$0xff]   ;;  %v9184_v26 = vld [vmem:[#allocation9 + $0x188] sm:$0xff]  }
 0x3d3   : > { %4967 = vmatmul.mubr.bf16.gmra.mrb[104].mxu0 %v9294_v9  ;;  %5546 = vmatmul.mubr.bf16.gmra.mrb[104].mxu1 %v9294_v9  ;;  %v9180_v9 = vld [vmem:[#allocation9 + $0x180] sm:$0xff]  }
 0x3d4   : > { %4976 = vmatprep.mubr.bf16.mxu0 %v9295_v55  ;;  %5555 = vmatprep.mubr.bf16.mxu1 %v9295_v55  ;;  %v9181_v55 = vld [vmem:[#allocation9 + $0x148] sm:$0xff]  }
 0x3db   : > { %4977 = vmatmul.mubr.bf16.gmra.mrb[108].mxu0 %v9296_v5  ;;  %5556 = vmatmul.mubr.bf16.gmra.mrb[108].mxu1 %v9296_v5  ;;  %v12115_v5 = vpack.c.bf16 %v10080_v16, %v10077_v15  ;;  %v9185_v15 = vld [vmem:[#allocation9 + $0x150] sm:$0xff]  }
 0x3dc   : > { %4986 = vmatprep.mubr.bf16.mxu0 %v9297_v27  ;;  %5565 = vmatprep.mubr.bf16.mxu1 %v9297_v27  ;;  %v9183_v27 = vld [vmem:[#allocation9 + $0x1c8] sm:$0xff]   ;;  %v9187_v16 = vld [vmem:[#allocation9 + $0x1d0] sm:$0xff]  }
 0x3e3   : > { %4987 = vmatmul.mubr.bf16.gmra.mrb[112].mxu0 %v9298_v6  ;;  %5566 = vmatmul.mubr.bf16.gmra.mrb[112].mxu1 %v9298_v6  ;;  %v12116_v6 = vpack.c.bf16 %v10089_v21, %v10083_v19  ;;  %v9188_v19 = vld [vmem:[#allocation9 + $0x190] sm:$0xff]   ;;  %v9189_v21 = vld [vmem:[#allocation9 + $0x158] sm:$0xff]  }
 0x3e4   : > { %4996 = vmatprep.mubr.bf16.mxu0 %v9299_v31  ;;  %5575 = vmatprep.mubr.bf16.mxu1 %v9299_v31  ;;  %v9186_v31 = vld [vmem:[#allocation9 + $0x110] sm:$0xff]  }
 0x3eb   : > { %4997 = vmatmul.mubr.bf16.gmra.mrb[116].mxu0 %v9300_v36  ;;  %5576 = vmatmul.mubr.bf16.gmra.mrb[116].mxu1 %v9300_v36  ;;  %v12122_v36 = vpack.c.bf16 %v10168_v23, %v10163_v17  ;;  %v12124_v17 = vpack.c.bf16 %v10157_v11, %v10151_v7  ;;  %v12125_v23 = vpack.c.bf16 %v10194_v4, %v10188_v0  ;;  %v9204_v7 = vld [vmem:[#allocation9 + $0x1b0] sm:$0xff]   ;;  %v9205_v11 = vld [vmem:[#allocation9 + $0x178] sm:$0xff]  }
 0x3ec   : > { %5006 = vmatprep.mubr.bf16.mxu0 %v9301_v35  ;;  %5585 = vmatprep.mubr.bf16.mxu1 %v9301_v35  ;;  %v9191_v35 = vld [vmem:[#allocation9 + $0x118] sm:$0xff]   ;;  %v12127_v0 = vpack.c.bf16 %v10182_v58, %v10179_v52 }
 0x3ed   : > { %v9206_v4 = vld [vmem:[#allocation9 + $0x1f8] sm:$0xff]  }
 0x3ee   : > { %v9208_v52 = vld [vmem:[#allocation9 + $0x1b8] sm:$0xff]  }
 0x3ef   : > { %v12135_v58 = vld [vmem:[#allocation22_spill] sm:$0xff] }
 0x3f3   : > { %5007 = vmatmul.mubr.bf16.gmra.mrb[120].mxu0 %v9302_v8  ;;  %5586 = vmatmul.mubr.bf16.gmra.mrb[120].mxu1 %v9302_v8  ;;  %v9194_v8 = vld [vmem:[#allocation9 + $0x1e0] sm:$0xff]  }
 0x3f4   : > { %5016 = vmatprep.mubr.bf16.mxu0 %v9303_v32  ;;  %5595 = vmatprep.mubr.bf16.mxu1 %v9303_v32  ;;  %v9195_v32 = vld [vmem:[#allocation9 + $0x120] sm:$0xff]  }
 0x3fb   : > { %5017 = vmatmul.mubr.bf16.gmra.mrb[124].mxu0 %v9304_v39  ;;  %5596 = vmatmul.mubr.bf16.gmra.mrb[124].mxu1 %v9304_v39  ;;  %v12126_v39 = vpack.c.bf16 %v10202_v33, %v10197_v14  ;;  %v12128_v14 = vpack.c.bf16 %v10191_v1, %v10185_v63  ;;  %v12129_v33 = vld [vmem:[#allocation26_spill] sm:$0xff]  ;;  %v12138_v1 = vld [vmem:[#allocation25_spill] sm:$0xff] }
 0x3fc   : > { %6285 = vmatprep.mubr.bf16.mxu0 %v12113_v12  ;;  %6446 = vmatprep.mubr.bf16.mxu1 %v12114_v45  ;;  %v9199_v12 = vld [vmem:[#allocation9 + $0x128] sm:$0xff]   ;;  %v9202_v45 = vld [vmem:[#allocation9 + $0x1f0] sm:$0xff]  }
 0x403   : > { %6286 = vmatmul.mubr.bf16.vlgmr.msra.gmra.mrb[128].mxu0 %v12115_v5  ;;  %6447 = vmatmul.mubr.bf16.vlgmr.msra.gmra.mrb[128].mxu1 %v12116_v6  ;;  %v12132_v5 = vld [vmem:[#allocation28_spill] sm:$0xff] }
 0x404   : > { %6293 = vmatprep.mubr.bf16.mxu0 %v12117_v20  ;;  %6454 = vmatprep.mubr.bf16.mxu1 %v12118_v22  ;;  %v9207_v20 = vld [vmem:[#allocation9 + $0x138] sm:$0xff]   ;;  %v12136_v22 = vld [vmem:[#allocation21_spill] sm:$0xff] }
 0x405   : > { %7886 = vmatpush3.bf16.msra.mxu0 %v9178_v34  ;;  %7998 = vmatpush3.bf16.msra.mxu1 %v9180_v9  ;;  %v9203_v34 = vld [vmem:[#allocation9 + $0x130] sm:$0xff]   ;;  %v12130_v9 = vld [vmem:[#allocation24_spill] sm:$0xff]  ;;  %v12137_v63 = vpack.c.bf16 %v12135_v58, %v12136_v22 }
 0x406   : > { %7887 = vmatprep.subr.bf16.mxu0 %v9181_v55  ;;  %7999 = vmatprep.subr.bf16.mxu1 %v9183_v27  ;;  %v12131_v55 = vpack.c.bf16 %v12129_v33, %v12130_v9  ;;  %v12133_v27 = vld [vmem:[#allocation27_spill] sm:$0xff]  ;;  %v12174_v33 = vld [vmem:[#allocation45_spill] sm:$0xff]  ;;  %v12182_v58 = vld [vmem:[#allocation54_spill] sm:$0xff] }
 0x407   : > { %v12134_v6 = vpack.c.bf16 %v12132_v5, %v12133_v27  ;;  %v12177_v5 = vld [vmem:[#allocation55_spill] sm:$0xff]  ;;  %v12183_v22 = vld [vmem:[#allocation52_spill] sm:$0xff] }
 0x409   : > { %7888 = vmatpush3.bf16.msra.mxu0 %v9182_v24  ;;  %8000 = vmatpush3.bf16.msra.mxu1 %v9184_v26  ;;  %v12139_v24 = vld [vmem:[#allocation23_spill] sm:$0xff] }
 0x40a   : > { %7889 = vmatprep.subr.bf16.mxu0 %v9185_v15  ;;  %8001 = vmatprep.subr.bf16.mxu1 %v9187_v16  ;;  %v12140_v26 = vpack.c.bf16 %v12138_v1, %v12139_v24  ;;  %v12141_v15 = vld [vmem:[#allocation32_spill] sm:$0xff]  ;;  %v12186_v24 = vld [vmem:[#allocation53_spill] sm:$0xff] }
 0x40b   : > { %6294 = vmatmul.mubr.bf16.gmra.mrb[132].mxu0 %v12119_v42  ;;  %6455 = vmatmul.mubr.bf16.gmra.mrb[132].mxu1 %v12120_v46  ;;  %v12142_v16 = vpack.c.bf16 %v10262_v40, %v12141_v15  ;;  %v12146_v42 = vld [vmem:[#allocation30_spill] sm:$0xff]  ;;  %v12185_v1 = vld [vmem:[#allocation56_spill] sm:$0xff]  ;;  %v12188_v15 = vld [vmem:[#allocation65_spill] sm:$0xff] }
 0x40c   : > { %6301 = vmatprep.mubr.bf16.mxu0 %v12121_v48  ;;  %6462 = vmatprep.mubr.bf16.mxu1 %v12122_v36  ;;  %v12149_v48 = vld [vmem:[#allocation33_spill] sm:$0xff]  ;;  %v12150_v36 = vld [vmem:[#allocation31_spill] sm:$0xff] }
 0x40d   : > { %7890 = vmatpush3.bf16.msra.mxu0 %v9186_v31  ;;  %8002 = vmatpush3.bf16.msra.mxu1 %v9188_v19  ;;  %v12143_v31 = vld [vmem:[#allocation35_spill] sm:$0xff]  ;;  %v12144_v19 = vld [vmem:[#allocation34_spill] sm:$0xff] }
 0x40e   : > { %7891 = vmatprep.subr.bf16.mxu0 %v9189_v21  ;;  %8003 = vmatprep.subr.bf16.mxu1 %v9190_v44  ;;  %v12145_v21 = vpack.c.bf16 %v12143_v31, %v12144_v19  ;;  %v12147_v44 = vld [vmem:[#allocation29_spill] sm:$0xff]  ;;  %v12191_v19 = vld [vmem:[#allocation67_spill] sm:$0xff] }
 0x40f   : > { %v12148_v46 = vpack.c.bf16 %v12146_v42, %v12147_v44  ;;  %v12194_v44 = vld [vmem:[#allocation62_spill] sm:$0xff] }
 0x411   : > { %7892 = vmatpush3.bf16.msra.mxu0 %v9191_v35  ;;  %8004 = vmatpush3.bf16.msra.mxu1 %v9192_v37  ;;  %v12151_v35 = vpack.c.bf16 %v12149_v48, %v12150_v36  ;;  %v12152_v37 = vld [vmem:[#allocation41_spill] sm:$0xff]  ;;  %v12197_v36 = vld [vmem:[#allocation64_spill] sm:$0xff] }
 0x412   : > { %7893 = vmatprep.subr.bf16.mxu0 %v9193_v38  ;;  %8005 = vmatprep.subr.bf16.mxu1 %v9194_v8  ;;  %v12153_v38 = vld [vmem:[#allocation39_spill] sm:$0xff] }
 0x413   : > { %6302 = vmatmul.mubr.bf16.gmra.mrb[136].mxu0 %v12123_v10  ;;  %6463 = vmatmul.mubr.bf16.gmra.mrb[136].mxu1 %v12124_v17  ;;  %v12154_v8 = vpack.c.bf16 %v12152_v37, %v12153_v38  ;;  %v12159_v10 = vld [vmem:[#allocation36_spill] sm:$0xff]  ;;  %v12200_v38 = vld [vmem:[#allocation73_spill] sm:$0xff] }
 0x414   : > { %6309 = vmatprep.mubr.bf16.mxu0 %v12125_v23  ;;  %6470 = vmatprep.mubr.bf16.mxu1 %v12126_v39  ;;  %v12161_v17 = vld [vmem:[#allocation40_spill] sm:$0xff]  ;;  %v12162_v23 = vld [vmem:[#allocation37_spill] sm:$0xff] }
 0x415   : > { %7894 = vmatpush3.bf16.msra.mxu0 %v9195_v32  ;;  %8006 = vmatpush3.bf16.msra.mxu1 %v9196_v41  ;;  %v12155_v32 = vld [vmem:[#allocation43_spill] sm:$0xff]  ;;  %v12156_v41 = vld [vmem:[#allocation42_spill] sm:$0xff]  ;;  %v12163_v39 = vpack.c.bf16 %v12161_v17, %v12162_v23 }
 0x416   : > { %7895 = vmatprep.subr.bf16.mxu0 %v9197_v43  ;;  %8007 = vmatprep.subr.bf16.mxu1 %v9198_v13  ;;  %v12157_v40 = vpack.c.bf16 %v12155_v32, %v12156_v41  ;;  %v12158_v43 = vld [vmem:[#allocation38_spill] sm:$0xff]  ;;  %v12203_v41 = vld [vmem:[#allocation75_spill] sm:$0xff] }
 0x417   : > { %v12160_v13 = vpack.c.bf16 %v12158_v43, %v12159_v10  ;;  %v12206_v10 = vld [vmem:[#allocation20_spill] sm:$0xff] }
 0x418   : > { %v876_v17 = vsub.s32 6, %v12206_v10  ;;  %v872_v23 = vsub.s32 5, %v12206_v10 }
 0x419   : > { %7896 = vmatpush3.bf16.msra.mxu0 %v9199_v12  ;;  %8008 = vmatpush3.bf16.msra.mxu1 %v9200_v2  ;;  %v12164_v12 = vld [vmem:[#allocation49_spill] sm:$0xff]  ;;  %v12165_v2 = vld [vmem:[#allocation47_spill] sm:$0xff] }
 0x41a   : > { %7897 = vmatprep.subr.bf16.mxu0 %v9201_v3  ;;  %8009 = vmatprep.subr.bf16.mxu1 %v9202_v45  ;;  %v12166_v3 = vpack.c.bf16 %v12164_v12, %v12165_v2  ;;  %v12167_v45 = vld [vmem:[#allocation51_spill] sm:$0xff]  ;;  %v12208_v12 = vld [vmem:[#allocation68_spill] sm:$0xff] }
 0x41b   : > { %6310 = vmatmul.mubr.bf16.gmra.mrb[140].mxu0 %v12127_v0  ;;  %6471 = vmatmul.mubr.bf16.gmra.mrb[140].mxu1 %v12128_v14  ;;  %v12171_v0 = vld [vmem:[#allocation44_spill] sm:$0xff] }
 0x41c   : > { %6317 = vmatprep.mubr.bf16.mxu0 %v12131_v55  ;;  %6478 = vmatprep.mubr.bf16.mxu1 %v12134_v6  ;;  %v12173_v14 = vld [vmem:[#allocation48_spill] sm:$0xff]  ;;  %v12176_v55 = vld [vmem:[#allocation57_spill] sm:$0xff]  ;;  %v12179_v6 = vld [vmem:[#allocation59_spill] sm:$0xff] }
 0x41d   : > { %7898 = vmatpush3.bf16.msra.mxu0 %v9203_v34  ;;  %8010 = vmatpush3.bf16.msra.mxu1 %v9204_v7  ;;  %v12168_v34 = vld [vmem:[#allocation50_spill] sm:$0xff]  ;;  %v12175_v9 = vpack.c.bf16 %v12173_v14, %v12174_v33  ;;  %v12178_v27 = vpack.c.bf16 %v12176_v55, %v12177_v5  ;;  %v12216_v14 = vld [vmem:[#allocation83_spill] sm:$0xff] }
 0x41e   : > { %7899 = vmatprep.subr.bf16.mxu0 %v9205_v11  ;;  %8011 = vmatprep.subr.bf16.mxu1 %v9206_v4  ;;  %v12169_v7 = vpack.c.bf16 %v12167_v45, %v12168_v34  ;;  %v12170_v11 = vld [vmem:[#allocation46_spill] sm:$0xff]  ;;  %v12210_v45 = vld [vmem:[#allocation72_spill] sm:$0xff]  ;;  %v12211_v34 = vld [vmem:[#allocation69_spill] sm:$0xff] }
 0x41f   : > { %v12172_v4 = vpack.c.bf16 %v12170_v11, %v12171_v0  ;;  %v12213_v11 = vld [vmem:[#allocation81_spill] sm:$0xff]  ;;  %v12214_v0 = vld [vmem:[#allocation79_spill] sm:$0xff]  ;;  %v12217_v33 = vld [vmem:[#allocation82_spill] sm:$0xff] }
 0x420   : > { %v9305_v55 = vld [vmem:[#allocation8] sm:$0xff] }
 0x421   : > { %7900 = vmatpush3.bf16.msra.mxu0 %v9207_v20  ;;  %8012 = vmatpush3.bf16.msra.mxu1 %v9208_v52  ;;  %v12180_v20 = vld [vmem:[#allocation58_spill] sm:$0xff] }
 0x422   : > { %v12181_v52 = vpack.c.bf16 %v12179_v6, %v12180_v20  ;;  %v10907_v6 = vrot.slane %v9305_v55, %v876_v17  ;;  %v10909_v20 = vrot.slane %v9305_v55, %v872_v23  ;;  %v12226_v17 = vpack.c.bf16 %v10610_v28, %v10605_v50 }
 0x423   : > { %6318 = vmatmul.mubr.bf16.gmra.mrb[144].mxu0 %v12137_v63  ;;  %6479 = vmatmul.mubr.bf16.gmra.mrb[144].mxu1 %v12140_v26  ;;  %v12184_v63 = vpack.c.bf16 %v12182_v58, %v12183_v22  ;;  %v12187_v26 = vpack.c.bf16 %v12185_v1, %v12186_v24 }
 0x424   : > { %6325 = vmatprep.mubr.bf16.mxu0 %v12142_v16  ;;  %6486 = vmatprep.mubr.bf16.mxu1 %v12145_v21  ;;  %v12189_v16 = vld [vmem:[#allocation63_spill] sm:$0xff]  ;;  %v12192_v21 = vld [vmem:[#allocation66_spill] sm:$0xff] }
 0x425   : > { %v12190_v31 = vpack.c.bf16 %v12188_v15, %v12189_v16  ;;  %v12193_v42 = vpack.c.bf16 %v12191_v19, %v12192_v21 }
 0x42b   : > { %6326 = vmatmul.mubr.bf16.gmra.mrb[148].mxu0 %v12148_v46  ;;  %6487 = vmatmul.mubr.bf16.gmra.mrb[148].mxu1 %v12151_v35  ;;  %v12195_v46 = vld [vmem:[#allocation60_spill] sm:$0xff]  ;;  %v12198_v35 = vld [vmem:[#allocation61_spill] sm:$0xff] }
 0x42c   : > { %6333 = vmatprep.mubr.bf16.mxu0 %v12154_v8  ;;  %6494 = vmatprep.mubr.bf16.mxu1 %v12157_v40  ;;  %v12196_v48 = vpack.c.bf16 %v12194_v44, %v12195_v46  ;;  %v12199_v37 = vpack.c.bf16 %v12197_v36, %v12198_v35  ;;  %v12201_v8 = vld [vmem:[#allocation71_spill] sm:$0xff]  ;;  %v12204_v40 = vld [vmem:[#allocation74_spill] sm:$0xff] }
 0x42d   : > { %v12202_v32 = vpack.c.bf16 %v12200_v38, %v12201_v8  ;;  %v12205_v43 = vpack.c.bf16 %v12203_v41, %v12204_v40  ;;  %v12219_v35 = vld [vmem:[#allocation78_spill] sm:$0xff]  ;;  %v12222_v41 = vld [vmem:[#allocation80_spill] sm:$0xff]  ;;  %v12223_v40 = vld [vmem:[#allocation77_spill] sm:$0xff] }
 0x433   : > { %6334 = vmatmul.mubr.bf16.gmra.mrb[152].mxu0 %v12160_v13  ;;  %6495 = vmatmul.mubr.bf16.gmra.mrb[152].mxu1 %v12163_v39  ;;  %v868_v13 = vsub.s32 4, %v12206_v10  ;;  %v12207_v39 = vld [vmem:[#allocation70_spill] sm:$0xff] }
 0x434   : > { %6341 = vmatprep.mubr.bf16.mxu0 %v12166_v3  ;;  %6502 = vmatprep.mubr.bf16.mxu1 %v12169_v7  ;;  %v12209_v2 = vpack.c.bf16 %v12207_v39, %v12208_v12  ;;  %v880_v3 = vsub.s32 7, %v12206_v10  ;;  %v12212_v7 = vpack.c.bf16 %v12210_v45, %v12211_v34  ;;  %v12225_v10 = vpack.c.bf16 %v10602_v54, %v10596_v18 }
 0x435   : > { %v10905_v5 = vrot.slane %v9305_v55, %v868_v13 }
 0x436   : > { %v10911_v22 = vrot.slane %v9305_v55, %v880_v3 }
 0x43b   : > { %6342 = vmatmul.mubr.bf16.gmra.mrb[156].mxu0 %v12172_v4  ;;  %6503 = vmatmul.mubr.bf16.gmra.mrb[156].mxu1 %v12175_v9  ;;  %v12215_v4 = vpack.c.bf16 %v12213_v11, %v12214_v0  ;;  %v12218_v9 = vpack.c.bf16 %v12216_v14, %v12217_v33 }
 0x43c   : > { %6349 = vmatprep.mubr.bf16.mxu0 %v12178_v27  ;;  %6510 = vmatprep.mubr.bf16.mxu1 %v12181_v52 }
 0x443   : > { %6350 = vmatmul.mubr.bf16.gmra.mrb[160].mxu0 %v12184_v63  ;;  %6511 = vmatmul.mubr.bf16.gmra.mrb[160].mxu1 %v12187_v26 }
 0x444   : > { %6357 = vmatprep.mubr.bf16.mxu0 %v12190_v31  ;;  %6518 = vmatprep.mubr.bf16.mxu1 %v12193_v42 }
 0x44b   : > { %6358 = vmatmul.mubr.bf16.gmra.mrb[164].mxu0 %v12196_v48  ;;  %6519 = vmatmul.mubr.bf16.gmra.mrb[164].mxu1 %v12199_v37  ;;  %v12220_v37 = vld [vmem:[#allocation76_spill] sm:$0xff] }
 0x44c   : > { %6365 = vmatprep.mubr.bf16.mxu0 %v12202_v32  ;;  %6526 = vmatprep.mubr.bf16.mxu1 %v12205_v43  ;;  %v12221_v38 = vpack.c.bf16 %v12219_v35, %v12220_v37  ;;  %v12224_v43 = vpack.c.bf16 %v12222_v41, %v12223_v40 }
 0x453   : > { %6366 = vmatmul.mubr.bf16.gmra.mrb[168].mxu0 %v12209_v2  ;;  %6527 = vmatmul.mubr.bf16.gmra.mrb[168].mxu1 %v12212_v7 }
 0x454   : > { %6373 = vmatprep.mubr.bf16.mxu0 %v12215_v4  ;;  %6534 = vmatprep.mubr.bf16.mxu1 %v12218_v9  ;;  %v12227_v9 = vpack.c.bf16 %v10593_v53, %v10587_v61  ;;  %v12231_v61 = vld [vmem:[#allocation88_spill] sm:$0xff] }
 0x456   : > { %v4868_v27 = vpop.f32.mrb[64].mxu0  ;;  %v5447_v52 = vpop.f32.mrb[64].mxu1 }
 0x457   : > { %v4870_v58 = vpop.f32.mrb[65].mxu0  ;;  %v5449_v63 = vpop.f32.mrb[65].mxu1  ;;  %v10914_v24 = vadd.f32 %v4868_v27, %v10905_v5  ;;  %v10920_v31 = vadd.f32 %v5447_v52, %v10907_v6  ;;  %v12228_v52 = vpack.c.bf16 %v10599_v47, %v10590_v30 }
 0x458   : > { %v4872_v1 = vpop.f32.mrb[66].mxu0  ;;  %v5451_v15 = vpop.f32.mrb[66].mxu1  ;;  %v10923_v19 = vadd.f32 %v4870_v58, %v10909_v20  ;;  %v10932_v46 = vadd.f32 %v5449_v63, %v10911_v22  ;;  %v12229_v58 = vpack.c.bf16 %v10636_v51, %v10630_v62 }
 0x459   : > { %v10917_v26 = vadd.f32 %v4872_v1, %v10905_v5  ;;  %v4874_v16 = vpop.f32.mrb[67].mxu0  ;;  %v10926_v21 = vadd.f32 %v5451_v15, %v10907_v6  ;;  %v5453_v44 = vpop.f32.mrb[67].mxu1  ;;  %v12230_v1 = vld [vmem:[#allocation89_spill] sm:$0xff] }
 0x45a   : > { %v10929_v42 = vadd.f32 %v4874_v16, %v10909_v20  ;;  %v10937_v36 = vadd.f32 %v5453_v44, %v10911_v22  ;;  %v12232_v53 = vpack.c.bf16 %v12230_v1, %v12231_v61  ;;  %v12240_v61 = vpack.c.bf16 %v10678_v59, %v10673_v49 }
 0x45b   : > { %v5610_v48 = vpack.c.bf16 %v10917_v26, %v10914_v24  ;;  %6374 = vmatmul.mubr.bf16.gmra.mrb[172].mxu0 %v12221_v38  ;;  %v5612_v8 = vpack.c.bf16 %v10926_v21, %v10920_v31  ;;  %6535 = vmatmul.mubr.bf16.gmra.mrb[172].mxu1 %v12224_v43 }
 0x45c   : > { %v5611_v32 = vpack.c.bf16 %v10929_v42, %v10923_v19  ;;  %6381 = vmatprep.mubr.bf16.mxu0 %v12225_v10  ;;  %v5613_v13 = vpack.c.bf16 %v10937_v36, %v10932_v46  ;;  %6542 = vmatprep.mubr.bf16.mxu1 %v12226_v17 }
 0x45e   : > { %v4878_v23 = vpop.f32.mrb[68].mxu0  ;;  %v5457_v39 = vpop.f32.mrb[68].mxu1 }
 0x45f   : > { %v4880_v12 = vpop.f32.mrb[69].mxu0  ;;  %v5459_v2 = vpop.f32.mrb[69].mxu1  ;;  %v10958_v45 = vadd.f32 %v4878_v23, %v10905_v5  ;;  %v10964_v7 = vadd.f32 %v5457_v39, %v10907_v6  ;;  %v12254_v23 = vld [vmem:[#allocation96_spill] sm:$0xff] }
 0x460   : > { %v4882_v3 = vpop.f32.mrb[70].mxu0  ;;  %v5461_v18 = vpop.f32.mrb[70].mxu1  ;;  %v10967_v11 = vadd.f32 %v4880_v12, %v10909_v20  ;;  %v10976_v4 = vadd.f32 %v5459_v2, %v10911_v22  ;;  %v12233_v12 = vld [vmem:[#allocation85_spill] sm:$0xff]  ;;  %v12234_v2 = vld [vmem:[#allocation84_spill] sm:$0xff] }
 0x461   : > { %v10961_v34 = vadd.f32 %v4882_v3, %v10905_v5  ;;  %v4884_v54 = vpop.f32.mrb[71].mxu0  ;;  %v10970_v50 = vadd.f32 %v5461_v18, %v10907_v6  ;;  %v5463_v0 = vpop.f32.mrb[71].mxu1  ;;  %v12235_v3 = vpack.c.bf16 %v12233_v12, %v12234_v2  ;;  %v12253_v18 = vld [vmem:[#allocation97_spill] sm:$0xff] }
 0x462   : > { %v10973_v28 = vadd.f32 %v4884_v54, %v10909_v20  ;;  %v10981_v33 = vadd.f32 %v5463_v0, %v10911_v22  ;;  %v12236_v0 = vld [vmem:[#allocation87_spill] sm:$0xff] }
 0x463   : > { %v5618_v14 = vpack.c.bf16 %v10961_v34, %v10958_v45  ;;  %6382 = vmatmul.mubr.bf16.gmra.mrb[176].mxu0 %v12227_v9  ;;  %v5620_v55 = vpack.c.bf16 %v10970_v50, %v10964_v7  ;;  %6543 = vmatmul.mubr.bf16.gmra.mrb[176].mxu1 %v12228_v52  ;;  %v12237_v9 = vld [vmem:[#allocation86_spill] sm:$0xff] }
 0x464   : > { %v5619_v27 = vpack.c.bf16 %v10973_v28, %v10967_v11  ;;  %6389 = vmatprep.mubr.bf16.mxu0 %v12229_v58  ;;  %v5621_v63 = vpack.c.bf16 %v10981_v33, %v10976_v4  ;;  %6550 = vmatprep.mubr.bf16.mxu1 %v12232_v53  ;;  %v12238_v52 = vpack.c.bf16 %v12236_v0, %v12237_v9  ;;  %v12241_v9 = vld [vmem:[#allocation91_spill] sm:$0xff] }
 0x465   : > { %v12239_v58 = vpack.c.bf16 %v10670_v60, %v10664_v56 }
 0x466   : > { %v4888_v15 = vpop.f32.mrb[72].mxu0  ;;  %v5467_v16 = vpop.f32.mrb[72].mxu1 }
 0x467   : > { %v4890_v44 = vpop.f32.mrb[73].mxu0  ;;  %v5469_v35 = vpop.f32.mrb[73].mxu1  ;;  %v11002_v38 = vadd.f32 %v4888_v15, %v10905_v5  ;;  %v11008_v51 = vadd.f32 %v5467_v16, %v10907_v6 }
 0x468   : > { %v4892_v37 = vpop.f32.mrb[74].mxu0  ;;  %v5471_v47 = vpop.f32.mrb[74].mxu1  ;;  %v11011_v41 = vadd.f32 %v4890_v44, %v10909_v20  ;;  %v11020_v17 = vadd.f32 %v5469_v35, %v10911_v22 }
 0x469   : > { %v11005_v30 = vadd.f32 %v4892_v37, %v10905_v5  ;;  %v4894_v62 = vpop.f32.mrb[75].mxu0  ;;  %v11014_v40 = vadd.f32 %v5471_v47, %v10907_v6  ;;  %v5473_v10 = vpop.f32.mrb[75].mxu1 }
 0x46a   : > { %v11017_v43 = vadd.f32 %v4894_v62, %v10909_v20  ;;  %v11025_v39 = vadd.f32 %v5473_v10, %v10911_v22 }
 0x46b   : > { %6390 = vmatmul.mubr.bf16.gmra.mrb[180].mxu0 %v12235_v3  ;;  %6551 = vmatmul.mubr.bf16.gmra.mrb[180].mxu1 %v12238_v52  ;;  %v12242_v52 = vld [vmem:[#allocation90_spill] sm:$0xff] }
 0x46c   : > { %v5627_v54 = vpack.c.bf16 %v11017_v43, %v11011_v41  ;;  %6397 = vmatprep.mubr.bf16.mxu0 %v12239_v58  ;;  %v5629_v1 = vpack.c.bf16 %v11025_v39, %v11020_v17  ;;  %6558 = vmatprep.mubr.bf16.mxu1 %v12240_v61  ;;  %v12243_v58 = vpack.c.bf16 %v12241_v9, %v12242_v52 }
 0x46e   : > { %v4898_v53 = vpop.f32.mrb[76].mxu0  ;;  %v5477_v15 = vpop.f32.mrb[76].mxu1 }
 0x46f   : > { %v4900_v16 = vpop.f32.mrb[77].mxu0  ;;  %v5479_v44 = vpop.f32.mrb[77].mxu1  ;;  %v11046_v37 = vadd.f32 %v4898_v53, %v10905_v5  ;;  %v11052_v62 = vadd.f32 %v5477_v15, %v10907_v6  ;;  %v12244_v15 = vld [vmem:[#allocation93_spill] sm:$0xff] }
 0x470   : > { %v4902_v35 = vpop.f32.mrb[78].mxu0  ;;  %v5481_v56 = vpop.f32.mrb[78].mxu1  ;;  %v11055_v10 = vadd.f32 %v4900_v16, %v10909_v20  ;;  %v11064_v2 = vadd.f32 %v5479_v44, %v10911_v22  ;;  %v12245_v16 = vld [vmem:[#allocation92_spill] sm:$0xff] }
 0x471   : > { %v11049_v47 = vadd.f32 %v4902_v35, %v10905_v5  ;;  %v4904_v60 = vpop.f32.mrb[79].mxu0  ;;  %v11058_v59 = vadd.f32 %v5481_v56, %v10907_v6  ;;  %v5483_v12 = vpop.f32.mrb[79].mxu1  ;;  %v12246_v44 = vpack.c.bf16 %v12244_v15, %v12245_v16  ;;  %v12247_v35 = vpack.c.bf16 %v10704_v29, %v10698_v25  ;;  %v12251_v56 = vld [vmem:[#allocation94_spill] sm:$0xff] }
 0x472   : > { %v11061_v49 = vadd.f32 %v4904_v60, %v10909_v20  ;;  %v11069_v0 = vadd.f32 %v5483_v12, %v10911_v22  ;;  %v12248_v60 = vld [vmem:[#allocation98_spill] sm:$0xff] }
 0x473   : > { %6398 = vmatmul.mubr.bf16.gmra.mrb[184].mxu0 %v12243_v58  ;;  %6559 = vmatmul.mubr.bf16.gmra.mrb[184].mxu1 %v12246_v44  ;;  %v12249_v12 = vpack.c.bf16 %v10712_v57, %v12248_v60 }
 0x474   : > { %6405 = vmatprep.mubr.bf16.mxu0 %v12247_v35 }
 0x475   : > { %6566 = vmatprep.mubr.bf16.mxu1 %v12249_v12 }
 0x476   : > { %v4908_v9 = vpop.f32.mrb[80].mxu0  ;;  %v5487_v52 = vpop.f32.mrb[80].mxu1 }
 0x477   : > { %v4910_v58 = vpop.f32.mrb[81].mxu0  ;;  %v5489_v61 = vpop.f32.mrb[81].mxu1  ;;  %v11090_v53 = vadd.f32 %v4908_v9, %v10905_v5  ;;  %v11096_v16 = vadd.f32 %v5487_v52, %v10907_v6  ;;  %v12250_v52 = vld [vmem:[#allocation95_spill] sm:$0xff] }
 0x478   : > { %v4912_v3 = vpop.f32.mrb[82].mxu0  ;;  %v5491_v29 = vpop.f32.mrb[82].mxu1  ;;  %v11099_v44 = vadd.f32 %v4910_v58, %v10909_v20  ;;  %v11108_v12 = vadd.f32 %v5489_v61, %v10911_v22  ;;  %v12252_v58 = vpack.c.bf16 %v12250_v52, %v12251_v56  ;;  %v12255_v61 = vpack.c.bf16 %v12253_v18, %v12254_v23 }
 0x479   : > { %v11093_v15 = vadd.f32 %v4912_v3, %v10905_v5  ;;  %v4914_v25 = vpop.f32.mrb[83].mxu0  ;;  %v11102_v57 = vadd.f32 %v5491_v29, %v10907_v6  ;;  %v5493_v60 = vpop.f32.mrb[83].mxu1 }
 0x47a   : > { %v11105_v35 = vadd.f32 %v4914_v25, %v10909_v20  ;;  %v11113_v9 = vadd.f32 %v5493_v60, %v10911_v22 }
 0x47b   : > { %6406 = vmatmul.mubr.bf16.gmra.mrb[188].mxu0 %v12252_v58  ;;  %6567 = vmatmul.mubr.bf16.gmra.mrb[188].mxu1 %v12255_v61 }
 0x47c   : > { %6607 = vmatprep.mubr.bf16.mxu0 %v5611_v32  ;;  %v5645_v60 = vpack.c.bf16 %v11113_v9, %v11108_v12  ;;  %6768 = vmatprep.mubr.bf16.mxu1 %v5613_v13 }
 0x47e   : > { %v4918_v56 = vpop.f32.mrb[84].mxu0  ;;  %v5497_v52 = vpop.f32.mrb[84].mxu1 }
 0x47f   : > { %v4920_v58 = vpop.f32.mrb[85].mxu0  ;;  %v5499_v29 = vpop.f32.mrb[85].mxu1  ;;  %v11134_v25 = vadd.f32 %v4918_v56, %v10905_v5  ;;  %v11140_v32 = vadd.f32 %v5497_v52, %v10907_v6 }
 0x480   : > { %v4922_v3 = vpop.f32.mrb[86].mxu0  ;;  %v5501_v19 = vpop.f32.mrb[86].mxu1  ;;  %v11143_v18 = vadd.f32 %v4920_v58, %v10909_v20  ;;  %v11152_v61 = vadd.f32 %v5499_v29, %v10911_v22 }
 0x481   : > { %v11137_v23 = vadd.f32 %v4922_v3, %v10905_v5  ;;  %v4924_v42 = vpop.f32.mrb[87].mxu0  ;;  %v11146_v46 = vadd.f32 %v5501_v19, %v10907_v6  ;;  %v5503_v13 = vpop.f32.mrb[87].mxu1 }
 0x482   : > { %v11149_v36 = vadd.f32 %v4924_v42, %v10909_v20  ;;  %v11157_v56 = vadd.f32 %v5503_v13, %v10911_v22 }
 0x483   : > { %v5650_v3 = vpack.c.bf16 %v11137_v23, %v11134_v25  ;;  %6608 = vmatmul.mubr.bf16.vlgmr.msra.gmra.mrb[192].mxu0 %v5610_v48  ;;  %v5652_v52 = vpack.c.bf16 %v11146_v46, %v11140_v32  ;;  %6769 = vmatmul.mubr.bf16.vlgmr.msra.gmra.mrb[192].mxu1 %v5612_v8 }
 0x484   : > { %v5651_v58 = vpack.c.bf16 %v11149_v36, %v11143_v18  ;;  %6615 = vmatprep.mubr.bf16.mxu0 %v5619_v27  ;;  %v5653_v29 = vpack.c.bf16 %v11157_v56, %v11152_v61  ;;  %6776 = vmatprep.mubr.bf16.mxu1 %v5621_v63 }
 0x486   : > { %v4928_v24 = vpop.f32.mrb[88].mxu0  ;;  %v5507_v26 = vpop.f32.mrb[88].mxu1 }
 0x487   : > { %v4930_v48 = vpop.f32.mrb[89].mxu0  ;;  %v5509_v19 = vpop.f32.mrb[89].mxu1  ;;  %v11178_v13 = vadd.f32 %v4928_v24, %v10905_v5  ;;  %v11184_v11 = vadd.f32 %v5507_v26, %v10907_v6 }
 0x488   : > { %v4932_v42 = vpop.f32.mrb[90].mxu0  ;;  %v5511_v21 = vpop.f32.mrb[90].mxu1  ;;  %v11187_v28 = vadd.f32 %v4930_v48, %v10909_v20  ;;  %v11196_v63 = vadd.f32 %v5509_v19, %v10911_v22 }
 0x489   : > { %v11181_v31 = vadd.f32 %v4932_v42, %v10905_v5  ;;  %v4934_v8 = vpop.f32.mrb[91].mxu0  ;;  %v11190_v4 = vadd.f32 %v5511_v21, %v10907_v6  ;;  %v5513_v27 = vpop.f32.mrb[91].mxu1 }
 0x48a   : > { %v11193_v33 = vadd.f32 %v4934_v8, %v10909_v20  ;;  %v11201_v42 = vadd.f32 %v5513_v27, %v10911_v22 }
 0x48b   : > { %v5658_v24 = vpack.c.bf16 %v11181_v31, %v11178_v13  ;;  %6616 = vmatmul.mubr.bf16.gmra.mrb[196].mxu0 %v5618_v14  ;;  %6777 = vmatmul.mubr.bf16.gmra.mrb[196].mxu1 %v5620_v55 }
 0x48c   : > { %v5659_v48 = vpack.c.bf16 %v11193_v33, %v11187_v28  ;;  %6623 = vmatprep.mubr.bf16.mxu0 %v5627_v54  ;;  %v5661_v19 = vpack.c.bf16 %v11201_v42, %v11196_v63  ;;  %6784 = vmatprep.mubr.bf16.mxu1 %v5629_v1 }
 0x48e   : > { %v4938_v45 = vpop.f32.mrb[92].mxu0  ;;  %v5517_v34 = vpop.f32.mrb[92].mxu1 }
 0x48f   : > { %v4940_v14 = vpop.f32.mrb[93].mxu0  ;;  %v5519_v21 = vpop.f32.mrb[93].mxu1  ;;  %v11222_v27 = vadd.f32 %v4938_v45, %v10905_v5  ;;  %v11228_v41 = vadd.f32 %v5517_v34, %v10907_v6  ;;  %v12256_v34 = vpack.c.bf16 %v11005_v30, %v11002_v38  ;;  %v12259_v38 = vpack.c.bf16 %v11069_v0, %v11064_v2 }
 0x490   : > { %v4942_v8 = vpop.f32.mrb[94].mxu0  ;;  %v5521_v50 = vpop.f32.mrb[94].mxu1  ;;  %v11231_v43 = vadd.f32 %v4940_v14, %v10909_v20  ;;  %v11240_v1 = vadd.f32 %v5519_v21, %v10911_v22  ;;  %v12257_v21 = vpack.c.bf16 %v11014_v40, %v11008_v51 }
 0x491   : > { %v11225_v7 = vadd.f32 %v4942_v8, %v10905_v5  ;;  %v4944_v55 = vpop.f32.mrb[95].mxu0  ;;  %v11234_v17 = vadd.f32 %v5521_v50, %v10907_v6  ;;  %v5523_v54 = vpop.f32.mrb[95].mxu1 }
 0x492   : > { %v11237_v39 = vadd.f32 %v4944_v55, %v10909_v20  ;;  %v11245_v8 = vadd.f32 %v5523_v54, %v10911_v22  ;;  %v12258_v55 = vpack.c.bf16 %v11061_v49, %v11055_v10 }
 0x493   : > { %6624 = vmatmul.mubr.bf16.gmra.mrb[200].mxu0 %v12256_v34  ;;  %6785 = vmatmul.mubr.bf16.gmra.mrb[200].mxu1 %v12257_v21 }
 0x494   : > { %6631 = vmatprep.mubr.bf16.mxu0 %v12258_v55  ;;  %v5669_v54 = vpack.c.bf16 %v11245_v8, %v11240_v1  ;;  %6792 = vmatprep.mubr.bf16.mxu1 %v12259_v38 }
 0x496   : > { %v4948_v30 = vpop.f32.mrb[96].mxu0  ;;  %v5527_v34 = vpop.f32.mrb[96].mxu1 }
 0x497   : > { %v4950_v14 = vpop.f32.mrb[97].mxu0  ;;  %v5529_v45 = vpop.f32.mrb[97].mxu1  ;;  %v11266_v26 = vadd.f32 %v4948_v30, %v10905_v5  ;;  %v11272_v49 = vadd.f32 %v5527_v34, %v10907_v6 }
 0x498   : > { %v4952_v50 = vpop.f32.mrb[98].mxu0  ;;  %v5531_v40 = vpop.f32.mrb[98].mxu1  ;;  %v11275_v21 = vadd.f32 %v4950_v14, %v10909_v20  ;;  %v11284_v38 = vadd.f32 %v5529_v45, %v10911_v22  ;;  %v12260_v14 = vpack.c.bf16 %v11049_v47, %v11046_v37  ;;  %v12261_v45 = vpack.c.bf16 %v11058_v59, %v11052_v62 }
 0x499   : > { %v11269_v51 = vadd.f32 %v4952_v50, %v10905_v5  ;;  %v4954_v10 = vpop.f32.mrb[99].mxu0  ;;  %v11278_v2 = vadd.f32 %v5531_v40, %v10907_v6  ;;  %v5533_v55 = vpop.f32.mrb[99].mxu1 }
 0x49a   : > { %v11281_v0 = vadd.f32 %v4954_v10, %v10909_v20  ;;  %v11289_v30 = vadd.f32 %v5533_v55, %v10911_v22  ;;  %v12262_v10 = vpack.c.bf16 %v11105_v35, %v11099_v44 }
 0x49b   : > { %6632 = vmatmul.mubr.bf16.gmra.mrb[204].mxu0 %v12260_v14  ;;  %6793 = vmatmul.mubr.bf16.gmra.mrb[204].mxu1 %v12261_v45 }
 0x49c   : > { %6639 = vmatprep.mubr.bf16.mxu0 %v12262_v10  ;;  %v5677_v55 = vpack.c.bf16 %v11289_v30, %v11284_v38  ;;  %6800 = vmatprep.mubr.bf16.mxu1 %v5645_v60 }
 0x49e   : > { %v4958_v37 = vpop.f32.mrb[100].mxu0  ;;  %v5537_v47 = vpop.f32.mrb[100].mxu1 }
 0x49f   : > { %v4960_v14 = vpop.f32.mrb[101].mxu0  ;;  %v5539_v34 = vpop.f32.mrb[101].mxu1  ;;  %v11310_v40 = vadd.f32 %v4958_v37, %v10905_v5  ;;  %v11316_v35 = vadd.f32 %v5537_v47, %v10907_v6  ;;  %v12263_v47 = vpack.c.bf16 %v11093_v15, %v11090_v53 }
 0x4a0   : > { %v4962_v50 = vpop.f32.mrb[102].mxu0  ;;  %v5541_v59 = vpop.f32.mrb[102].mxu1  ;;  %v11319_v45 = vadd.f32 %v4960_v14, %v10909_v20  ;;  %v11328_v10 = vadd.f32 %v5539_v34, %v10911_v22  ;;  %v12264_v34 = vpack.c.bf16 %v11102_v57, %v11096_v16 }
 0x4a1   : > { %v11313_v62 = vadd.f32 %v4962_v50, %v10905_v5  ;;  %v4964_v44 = vpop.f32.mrb[103].mxu0  ;;  %v11322_v12 = vadd.f32 %v5541_v59, %v10907_v6  ;;  %v5543_v60 = vpop.f32.mrb[103].mxu1 }
 0x4a2   : > { %v11325_v9 = vadd.f32 %v4964_v44, %v10909_v20  ;;  %v11333_v37 = vadd.f32 %v5543_v60, %v10911_v22 }
 0x4a3   : > { %6640 = vmatmul.mubr.bf16.gmra.mrb[208].mxu0 %v12263_v47  ;;  %6801 = vmatmul.mubr.bf16.gmra.mrb[208].mxu1 %v12264_v34 }
 0x4a4   : > { %v5683_v59 = vpack.c.bf16 %v11325_v9, %v11319_v45  ;;  %6647 = vmatprep.mubr.bf16.mxu0 %v5651_v58  ;;  %v5685_v44 = vpack.c.bf16 %v11333_v37, %v11328_v10  ;;  %6808 = vmatprep.mubr.bf16.mxu1 %v5653_v29 }
 0x4a6   : > { %v4968_v53 = vpop.f32.mrb[104].mxu0  ;;  %v5547_v15 = vpop.f32.mrb[104].mxu1 }
 0x4a7   : > { %v4970_v60 = vpop.f32.mrb[105].mxu0  ;;  %v5549_v47 = vpop.f32.mrb[105].mxu1  ;;  %v11354_v50 = vadd.f32 %v4968_v53, %v10905_v5  ;;  %v11360_v36 = vadd.f32 %v5547_v15, %v10907_v6 }
 0x4a8   : > { %v4972_v14 = vpop.f32.mrb[106].mxu0  ;;  %v5551_v57 = vpop.f32.mrb[106].mxu1  ;;  %v11363_v58 = vadd.f32 %v4970_v60, %v10909_v20  ;;  %v11372_v34 = vadd.f32 %v5549_v47, %v10911_v22 }
 0x4a9   : > { %v11357_v16 = vadd.f32 %v4972_v14, %v10905_v5  ;;  %v4974_v18 = vpop.f32.mrb[107].mxu0  ;;  %v11366_v61 = vadd.f32 %v5551_v57, %v10907_v6  ;;  %v5553_v29 = vpop.f32.mrb[107].mxu1 }
 0x4aa   : > { %v11369_v56 = vadd.f32 %v4974_v18, %v10909_v20  ;;  %v11377_v53 = vadd.f32 %v5553_v29, %v10911_v22 }
 0x4ab   : > { %v5690_v14 = vpack.c.bf16 %v11357_v16, %v11354_v50  ;;  %6648 = vmatmul.mubr.bf16.gmra.mrb[212].mxu0 %v5650_v3  ;;  %v5692_v15 = vpack.c.bf16 %v11366_v61, %v11360_v36  ;;  %6809 = vmatmul.mubr.bf16.gmra.mrb[212].mxu1 %v5652_v52 }
 0x4ac   : > { %v5691_v60 = vpack.c.bf16 %v11369_v56, %v11363_v58  ;;  %6655 = vmatprep.mubr.bf16.mxu0 %v5659_v48  ;;  %v5693_v47 = vpack.c.bf16 %v11377_v53, %v11372_v34  ;;  %6816 = vmatprep.mubr.bf16.mxu1 %v5661_v19 }
 0x4ae   : > { %v4978_v25 = vpop.f32.mrb[108].mxu0  ;;  %v5557_v23 = vpop.f32.mrb[108].mxu1 }
 0x4af   : > { %v4980_v3 = vpop.f32.mrb[109].mxu0  ;;  %v5559_v57 = vpop.f32.mrb[109].mxu1  ;;  %v11398_v29 = vadd.f32 %v4978_v25, %v10905_v5  ;;  %v11404_v28 = vadd.f32 %v5557_v23, %v10907_v6 }
 0x4b0   : > { %v4982_v18 = vpop.f32.mrb[110].mxu0  ;;  %v5561_v46 = vpop.f32.mrb[110].mxu1  ;;  %v11407_v33 = vadd.f32 %v4980_v3, %v10909_v20  ;;  %v11416_v19 = vadd.f32 %v5559_v57, %v10911_v22  ;;  %v12265_v57 = vpack.c.bf16 %v11190_v4, %v11184_v11 }
 0x4b1   : > { %v11401_v32 = vadd.f32 %v4982_v18, %v10905_v5  ;;  %v4984_v52 = vpop.f32.mrb[111].mxu0  ;;  %v11410_v63 = vadd.f32 %v5561_v46, %v10907_v6  ;;  %v5563_v48 = vpop.f32.mrb[111].mxu1  ;;  %v12266_v46 = vpack.c.bf16 %v11237_v39, %v11231_v43 }
 0x4b2   : > { %v11413_v42 = vadd.f32 %v4984_v52, %v10909_v20  ;;  %v11421_v18 = vadd.f32 %v5563_v48, %v10911_v22 }
 0x4b3   : > { %6656 = vmatmul.mubr.bf16.gmra.mrb[216].mxu0 %v5658_v24  ;;  %6817 = vmatmul.mubr.bf16.gmra.mrb[216].mxu1 %v12265_v57 }
 0x4b4   : > { %v5699_v3 = vpack.c.bf16 %v11413_v42, %v11407_v33  ;;  %6663 = vmatprep.mubr.bf16.mxu0 %v12266_v46  ;;  %v5701_v52 = vpack.c.bf16 %v11421_v18, %v11416_v19  ;;  %6824 = vmatprep.mubr.bf16.mxu1 %v5669_v54  ;;  %v12274_v19 = vpack.c.bf16 %v11401_v32, %v11398_v29 }
 0x4b6   : > { %v4988_v13 = vpop.f32.mrb[112].mxu0  ;;  %v5567_v31 = vpop.f32.mrb[112].mxu1 }
 0x4b7   : > { %v4990_v24 = vpop.f32.mrb[113].mxu0  ;;  %v5569_v48 = vpop.f32.mrb[113].mxu1  ;;  %v11442_v25 = vadd.f32 %v4988_v13, %v10905_v5  ;;  %v11448_v39 = vadd.f32 %v5567_v31, %v10907_v6  ;;  %v12267_v31 = vpack.c.bf16 %v11225_v7, %v11222_v27 }
 0x4b8   : > { %v4992_v23 = vpop.f32.mrb[114].mxu0  ;;  %v5571_v4 = vpop.f32.mrb[114].mxu1  ;;  %v11451_v57 = vadd.f32 %v4990_v24, %v10909_v20  ;;  %v11460_v46 = vadd.f32 %v5569_v48, %v10911_v22  ;;  %v12268_v48 = vpack.c.bf16 %v11234_v17, %v11228_v41 }
 0x4b9   : > { %v11445_v11 = vadd.f32 %v4992_v23, %v10905_v5  ;;  %v4994_v43 = vpop.f32.mrb[115].mxu0  ;;  %v11454_v1 = vadd.f32 %v5571_v4, %v10907_v6  ;;  %v5573_v54 = vpop.f32.mrb[115].mxu1 }
 0x4ba   : > { %v11457_v8 = vadd.f32 %v4994_v43, %v10909_v20  ;;  %v11465_v13 = vadd.f32 %v5573_v54, %v10911_v22  ;;  %v12269_v43 = vpack.c.bf16 %v11281_v0, %v11275_v21 }
 0x4bb   : > { %6664 = vmatmul.mubr.bf16.gmra.mrb[220].mxu0 %v12267_v31  ;;  %6825 = vmatmul.mubr.bf16.gmra.mrb[220].mxu1 %v12268_v48 }
 0x4bc   : > { %6671 = vmatprep.mubr.bf16.mxu0 %v12269_v43  ;;  %v5709_v54 = vpack.c.bf16 %v11465_v13, %v11460_v46  ;;  %6832 = vmatprep.mubr.bf16.mxu1 %v5677_v55  ;;  %v12277_v46 = vpack.c.bf16 %v11445_v11, %v11442_v25 }
 0x4be   : > { %v4998_v27 = vpop.f32.mrb[116].mxu0  ;;  %v5577_v7 = vpop.f32.mrb[116].mxu1 }
 0x4bf   : > { %v5000_v31 = vpop.f32.mrb[117].mxu0  ;;  %v5579_v24 = vpop.f32.mrb[117].mxu1  ;;  %v11486_v4 = vadd.f32 %v4998_v27, %v10905_v5  ;;  %v11492_v0 = vadd.f32 %v5577_v7, %v10907_v6  ;;  %v12270_v7 = vpack.c.bf16 %v11269_v51, %v11266_v26 }
 0x4c0   : > { %v5002_v23 = vpop.f32.mrb[118].mxu0  ;;  %v5581_v17 = vpop.f32.mrb[118].mxu1  ;;  %v11495_v48 = vadd.f32 %v5000_v31, %v10909_v20  ;;  %v11504_v43 = vadd.f32 %v5579_v24, %v10911_v22  ;;  %v12271_v24 = vpack.c.bf16 %v11278_v2, %v11272_v49 }
 0x4c1   : > { %v11489_v41 = vadd.f32 %v5002_v23, %v10905_v5  ;;  %v5004_v21 = vpop.f32.mrb[119].mxu0  ;;  %v11498_v38 = vadd.f32 %v5581_v17, %v10907_v6  ;;  %v5583_v55 = vpop.f32.mrb[119].mxu1 }
 0x4c2   : > { %v11501_v30 = vadd.f32 %v5004_v21, %v10909_v20  ;;  %v11509_v27 = vadd.f32 %v5583_v55, %v10911_v22 }
 0x4c3   : > { %6672 = vmatmul.mubr.bf16.gmra.mrb[224].mxu0 %v12270_v7  ;;  %6833 = vmatmul.mubr.bf16.gmra.mrb[224].mxu1 %v12271_v24 }
 0x4c4   : > { %v5715_v17 = vpack.c.bf16 %v11501_v30, %v11495_v48  ;;  %6679 = vmatprep.mubr.bf16.mxu0 %v5683_v59  ;;  %v5717_v21 = vpack.c.bf16 %v11509_v27, %v11504_v43  ;;  %6840 = vmatprep.mubr.bf16.mxu1 %v5685_v44  ;;  %v12279_v43 = vpack.c.bf16 %v11489_v41, %v11486_v4 }
 0x4c6   : > { %v5008_v26 = vpop.f32.mrb[120].mxu0  ;;  %v5587_v51 = vpop.f32.mrb[120].mxu1 }
 0x4c7   : > { %v5010_v55 = vpop.f32.mrb[121].mxu0  ;;  %v5589_v7 = vpop.f32.mrb[121].mxu1  ;;  %v11530_v23 = vadd.f32 %v5008_v26, %v10905_v5  ;;  %v11536_v9 = vadd.f32 %v5587_v51, %v10907_v6  ;;  %v12272_v51 = vpack.c.bf16 %v11313_v62, %v11310_v40 }
 0x4c8   : > { %v5012_v31 = vpop.f32.mrb[122].mxu0  ;;  %v5591_v2 = vpop.f32.mrb[122].mxu1  ;;  %v11539_v59 = vadd.f32 %v5010_v55, %v10909_v20  ;;  %v11548_v24 = vadd.f32 %v5589_v7, %v10911_v22  ;;  %v12273_v7 = vpack.c.bf16 %v11322_v12, %v11316_v35 }
 0x4c9   : > { %v11533_v49 = vadd.f32 %v5012_v31, %v10905_v5  ;;  %v5014_v45 = vpop.f32.mrb[123].mxu0  ;;  %v11542_v10 = vadd.f32 %v5591_v2, %v10907_v6  ;;  %v5593_v44 = vpop.f32.mrb[123].mxu1 }
 0x4ca   : > { %v11545_v37 = vadd.f32 %v5014_v45, %v10909_v20  ;;  %v11553_v26 = vadd.f32 %v5593_v44, %v10911_v22 }
 0x4cb   : > { %6680 = vmatmul.mubr.bf16.gmra.mrb[228].mxu0 %v12272_v51  ;;  %6841 = vmatmul.mubr.bf16.gmra.mrb[228].mxu1 %v12273_v7 }
 0x4cc   : > { %v5723_v2 = vpack.c.bf16 %v11545_v37, %v11539_v59  ;;  %6687 = vmatprep.mubr.bf16.mxu0 %v5691_v60  ;;  %v5725_v45 = vpack.c.bf16 %v11553_v26, %v11548_v24  ;;  %6848 = vmatprep.mubr.bf16.mxu1 %v5693_v47  ;;  %v12281_v24 = vpack.c.bf16 %v11533_v49, %v11530_v23 }
 0x4ce   : > { %v5018_v40 = vpop.f32.mrb[124].mxu0  ;;  %v5597_v62 = vpop.f32.mrb[124].mxu1 }
 0x4cf   : > { %v5020_v44 = vpop.f32.mrb[125].mxu0  ;;  %v5599_v51 = vpop.f32.mrb[125].mxu1  ;;  %v11574_v31 = vadd.f32 %v5018_v40, %v10905_v5  ;;  %v11580_v56 = vadd.f32 %v5597_v62, %v10907_v6 }
 0x4d0   : > { %v5022_v55 = vpop.f32.mrb[126].mxu0  ;;  %v5601_v12 = vpop.f32.mrb[126].mxu1  ;;  %v11583_v60 = vadd.f32 %v5020_v44, %v10909_v20  ;;  %v11592_v7 = vadd.f32 %v5599_v51, %v10911_v22 }
 0x4d1   : > { %v11577_v35 = vadd.f32 %v5022_v55, %v10905_v5  ;;  %v5024_v58 = vpop.f32.mrb[127].mxu0  ;;  %v11586_v34 = vadd.f32 %v5601_v12, %v10907_v6  ;;  %v5603_v47 = vpop.f32.mrb[127].mxu1 }
 0x4d2   : > { %v11589_v53 = vadd.f32 %v5024_v58, %v10909_v20  ;;  %v11597_v55 = vadd.f32 %v5603_v47, %v10911_v22  ;;  %v12275_v58 = vpack.c.bf16 %v11410_v63, %v11404_v28  ;;  %v12276_v47 = vpack.c.bf16 %v11457_v8, %v11451_v57 }
 0x4d3   : > { %v5730_v5 = vpack.c.bf16 %v11577_v35, %v11574_v31  ;;  %6688 = vmatmul.mubr.bf16.gmra.mrb[232].mxu0 %v5690_v14  ;;  %v5732_v6 = vpack.c.bf16 %v11586_v34, %v11580_v56  ;;  %6849 = vmatmul.mubr.bf16.gmra.mrb[232].mxu1 %v5692_v15  ;;  %v11617_v14 = vld [vmem:[#allocation11] ss:$0 sm:$0xff] }
 0x4d4   : > { %v5731_v20 = vpack.c.bf16 %v11589_v53, %v11583_v60  ;;  %6695 = vmatprep.mubr.bf16.mxu0 %v5699_v3  ;;  %v5733_v22 = vpack.c.bf16 %v11597_v55, %v11592_v7  ;;  %6856 = vmatprep.mubr.bf16.mxu1 %v5701_v52 }
 0x4d6   : > { %v7677_v50 = vpop.f32.mrb[128].mxu0  ;;  %v7789_v16 = vpop.f32.mrb[128].mxu1 }
 0x4d7   : > { %v7678_v40 = vpop.f32.mrb[129].mxu0  ;;  %v7790_v44 = vpop.f32.mrb[129].mxu1 }
 0x4d8   : > { %v7679_v62 = vadd.f32 %v7678_v40, %v7677_v50  ;;  %v7680_v36 = vpop.f32.mrb[130].mxu0  ;;  %v7791_v61 = vadd.f32 %v7790_v44, %v7789_v16  ;;  %v7792_v15 = vpop.f32.mrb[130].mxu1 }
 0x4d9   : > { %v7681_v51 = vpop.f32.mrb[131].mxu0  ;;  %v7793_v3 = vpop.f32.mrb[131].mxu1 }
 0x4da   : > { %v6288_v33 = vadd.f32 %v7679_v62, %v11617_v14  ;;  %v7682_v42 = vadd.f32 %v7681_v51, %v7680_v36  ;;  %v7794_v12 = vadd.f32 %v7793_v3, %v7792_v15  ;;  %v12278_v51 = vpack.c.bf16 %v11454_v1, %v11448_v39 }
 0x4db   : > { %6696 = vmatmul.mubr.bf16.gmra.mrb[236].mxu0 %v12274_v19  ;;  %6857 = vmatmul.mubr.bf16.gmra.mrb[236].mxu1 %v12275_v58 }
 0x4dc   : > { %v11623_v18 = vadd.f32 %v7791_v61, %v6288_v33  ;;  %v6291_v52 = vadd.f32 %v7682_v42, %v11617_v14  ;;  %6703 = vmatprep.mubr.bf16.mxu0 %v12276_v47  ;;  %6864 = vmatprep.mubr.bf16.mxu1 %v5709_v54 }
 0x4de   : > { %v11635_v50 = vadd.f32 %v7794_v12, %v6291_v52  ;;  %v7683_v29 = vpop.f32.mrb[132].mxu0  ;;  %v7795_v32 = vpop.f32.mrb[132].mxu1 }
 0x4df   : > { %v7684_v16 = vpop.f32.mrb[133].mxu0  ;;  %v7796_v62 = vpop.f32.mrb[133].mxu1 }
 0x4e0   : > { %v7685_v40 = vadd.f32 %v7684_v16, %v7683_v29  ;;  %v7686_v44 = vpop.f32.mrb[134].mxu0  ;;  %v7797_v36 = vadd.f32 %v7796_v62, %v7795_v32  ;;  %v7798_v61 = vpop.f32.mrb[134].mxu1 }
 0x4e1   : > { %v7687_v28 = vpop.f32.mrb[135].mxu0  ;;  %v7799_v57 = vpop.f32.mrb[135].mxu1 }
 0x4e2   : > { %v6296_v63 = vadd.f32 %v7685_v40, %v11617_v14  ;;  %v7688_v15 = vadd.f32 %v7687_v28, %v7686_v44  ;;  %v7800_v8 = vadd.f32 %v7799_v57, %v7798_v61 }
 0x4e3   : > { %6704 = vmatmul.mubr.bf16.gmra.mrb[240].mxu0 %v12277_v46  ;;  %6865 = vmatmul.mubr.bf16.gmra.mrb[240].mxu1 %v12278_v51 }
 0x4e4   : > { %v11641_v13 = vadd.f32 %v7797_v36, %v6296_v63  ;;  %v6299_v54 = vadd.f32 %v7688_v15, %v11617_v14  ;;  %6711 = vmatprep.mubr.bf16.mxu0 %v5715_v17  ;;  %6872 = vmatprep.mubr.bf16.mxu1 %v5717_v21  ;;  %v12280_v21 = vpack.c.bf16 %v11498_v38, %v11492_v0 }
 0x4e6   : > { %v11653_v33 = vadd.f32 %v7800_v8, %v6299_v54  ;;  %v7689_v25 = vpop.f32.mrb[136].mxu0  ;;  %v7801_v11 = vpop.f32.mrb[136].mxu1 }
 0x4e7   : > { %v7690_v42 = vpop.f32.mrb[137].mxu0  ;;  %v7802_v12 = vpop.f32.mrb[137].mxu1 }
 0x4e8   : > { %v7691_v3 = vadd.f32 %v7690_v42, %v7689_v25  ;;  %v7692_v19 = vpop.f32.mrb[138].mxu0  ;;  %v7803_v52 = vadd.f32 %v7802_v12, %v7801_v11  ;;  %v7804_v58 = vpop.f32.mrb[138].mxu1 }
 0x4e9   : > { %v7693_v39 = vpop.f32.mrb[139].mxu0  ;;  %v7805_v48 = vpop.f32.mrb[139].mxu1 }
 0x4ea   : > { %v6304_v1 = vadd.f32 %v7691_v3, %v11617_v14  ;;  %v7694_v47 = vadd.f32 %v7693_v39, %v7692_v19  ;;  %v7806_v30 = vadd.f32 %v7805_v48, %v7804_v58 }
 0x4eb   : > { %6712 = vmatmul.mubr.bf16.gmra.mrb[244].mxu0 %v12279_v43  ;;  %6873 = vmatmul.mubr.bf16.gmra.mrb[244].mxu1 %v12280_v21 }
 0x4ec   : > { %v11659_v27 = vadd.f32 %v7803_v52, %v6304_v1  ;;  %v6307_v17 = vadd.f32 %v7694_v47, %v11617_v14  ;;  %6719 = vmatprep.mubr.bf16.mxu0 %v5723_v2  ;;  %6880 = vmatprep.mubr.bf16.mxu1 %v5725_v45  ;;  %v12282_v45 = vpack.c.bf16 %v11542_v10, %v11536_v9 }
 0x4ee   : > { %v11671_v29 = vadd.f32 %v7806_v30, %v6307_v17  ;;  %v7695_v4 = vpop.f32.mrb[140].mxu0  ;;  %v7807_v41 = vpop.f32.mrb[140].mxu1 }
 0x4ef   : > { %v7696_v32 = vpop.f32.mrb[141].mxu0  ;;  %v7808_v40 = vpop.f32.mrb[141].mxu1 }
 0x4f0   : > { %v7697_v16 = vadd.f32 %v7696_v32, %v7695_v4  ;;  %v7698_v62 = vpop.f32.mrb[142].mxu0  ;;  %v7809_v44 = vadd.f32 %v7808_v40, %v7807_v41  ;;  %v7810_v36 = vpop.f32.mrb[142].mxu1 }
 0x4f1   : > { %v7699_v0 = vpop.f32.mrb[143].mxu0  ;;  %v7811_v59 = vpop.f32.mrb[143].mxu1 }
 0x4f2   : > { %v6312_v38 = vadd.f32 %v7697_v16, %v11617_v14  ;;  %v7700_v61 = vadd.f32 %v7699_v0, %v7698_v62  ;;  %v7812_v37 = vadd.f32 %v7811_v59, %v7810_v36 }
 0x4f3   : > { %6720 = vmatmul.mubr.bf16.gmra.mrb[248].mxu0 %v12281_v24  ;;  %6881 = vmatmul.mubr.bf16.gmra.mrb[248].mxu1 %v12282_v45 }
 0x4f4   : > { %v11677_v26 = vadd.f32 %v7809_v44, %v6312_v38  ;;  %v6315_v2 = vadd.f32 %v7700_v61, %v11617_v14  ;;  %6727 = vmatprep.mubr.bf16.mxu0 %v5731_v20  ;;  %6888 = vmatprep.mubr.bf16.mxu1 %v5733_v22 }
 0x4f6   : > { %v11689_v28 = vadd.f32 %v7812_v37, %v6315_v2  ;;  %v7701_v23 = vpop.f32.mrb[144].mxu0  ;;  %v7813_v49 = vpop.f32.mrb[144].mxu1 }
 0x4f7   : > { %v7702_v63 = vpop.f32.mrb[145].mxu0  ;;  %v7814_v57 = vpop.f32.mrb[145].mxu1 }
 0x4f8   : > { %v7703_v15 = vadd.f32 %v7702_v63, %v7701_v23  ;;  %v7704_v8 = vpop.f32.mrb[146].mxu0  ;;  %v7815_v46 = vadd.f32 %v7814_v57, %v7813_v49  ;;  %v7816_v54 = vpop.f32.mrb[146].mxu1 }
 0x4f9   : > { %v7705_v9 = vpop.f32.mrb[147].mxu0  ;;  %v7817_v60 = vpop.f32.mrb[147].mxu1 }
 0x4fa   : > { %v6320_v10 = vadd.f32 %v7703_v15, %v11617_v14  ;;  %v7706_v51 = vadd.f32 %v7705_v9, %v7704_v8  ;;  %v7818_v53 = vadd.f32 %v7817_v60, %v7816_v54 }
 0x4fb   : > { %6728 = vmatmul.mubr.bf16.gmra.mrb[252].mxu0 %v5730_v5  ;;  %6889 = vmatmul.mubr.bf16.gmra.mrb[252].mxu1 %v5732_v6 }
 0x4fc   : > { %v11695_v7 = vadd.f32 %v7815_v46, %v6320_v10  ;;  %v6323_v55 = vadd.f32 %v7706_v51, %v11617_v14 }
 0x4fe   : > { %v11701_v20 = vadd.f32 %v7818_v53, %v6323_v55  ;;  %v7707_v22 = vpop.f32.mrb[148].mxu0  ;;  %v7819_v25 = vpop.f32.mrb[148].mxu1 }
 0x4ff   : > { %v7708_v11 = vpop.f32.mrb[149].mxu0  ;;  %v7820_v3 = vpop.f32.mrb[149].mxu1 }
 0x500   : > { %v7709_v42 = vadd.f32 %v7708_v11, %v7707_v22  ;;  %v7710_v12 = vpop.f32.mrb[150].mxu0  ;;  %v7821_v19 = vadd.f32 %v7820_v3, %v7819_v25  ;;  %v7822_v52 = vpop.f32.mrb[150].mxu1 }
 0x501   : > { %v7711_v31 = vpop.f32.mrb[151].mxu0  ;;  %v7823_v58 = vpop.f32.mrb[151].mxu1 }
 0x502   : > { %v6328_v35 = vadd.f32 %v7709_v42, %v11617_v14  ;;  %v7712_v5 = vadd.f32 %v7711_v31, %v7710_v12  ;;  %v7824_v39 = vadd.f32 %v7823_v58, %v7822_v52 }
 0x504   : > { %v11704_v1 = vadd.f32 %v7821_v19, %v6328_v35  ;;  %v6331_v56 = vadd.f32 %v7712_v5, %v11617_v14 }
 0x506   : > { %v11707_v34 = vadd.f32 %v7824_v39, %v6331_v56  ;;  %v7713_v6 = vpop.f32.mrb[152].mxu0  ;;  %v7825_v47 = vpop.f32.mrb[152].mxu1 }
 0x507   : > { %v7714_v48 = vpop.f32.mrb[153].mxu0  ;;  %v7826_v43 = vpop.f32.mrb[153].mxu1 }
 0x508   : > { %v7715_v30 = vadd.f32 %v7714_v48, %v7713_v6  ;;  %v7716_v17 = vpop.f32.mrb[154].mxu0  ;;  %v7827_v21 = vadd.f32 %v7826_v43, %v7825_v47  ;;  %v7828_v4 = vpop.f32.mrb[154].mxu1 }
 0x509   : > { %v7717_v41 = vpop.f32.mrb[155].mxu0  ;;  %v7829_v40 = vpop.f32.mrb[155].mxu1 }
 0x50a   : > { %v6336_v32 = vadd.f32 %v7715_v30, %v11617_v14  ;;  %v7718_v16 = vadd.f32 %v7717_v41, %v7716_v17  ;;  %v7830_v62 = vadd.f32 %v7829_v40, %v7828_v4 }
 0x50c   : > { %v11710_v44 = vadd.f32 %v7827_v21, %v6336_v32  ;;  %v6339_v36 = vadd.f32 %v7718_v16, %v11617_v14 }
 0x50e   : > { %v11713_v0 = vadd.f32 %v7830_v62, %v6339_v36  ;;  %v7719_v38 = vpop.f32.mrb[156].mxu0  ;;  %v7831_v61 = vpop.f32.mrb[156].mxu1 }
 0x50f   : > { %v7720_v59 = vpop.f32.mrb[157].mxu0  ;;  %v7832_v24 = vpop.f32.mrb[157].mxu1 }
 0x510   : > { %v7721_v37 = vadd.f32 %v7720_v59, %v7719_v38  ;;  %v7722_v2 = vpop.f32.mrb[158].mxu0  ;;  %v7833_v45 = vadd.f32 %v7832_v24, %v7831_v61  ;;  %v7834_v23 = vpop.f32.mrb[158].mxu1 }
 0x511   : > { %v7723_v49 = vpop.f32.mrb[159].mxu0  ;;  %v7835_v57 = vpop.f32.mrb[159].mxu1 }
 0x512   : > { %v6344_v63 = vadd.f32 %v7721_v37, %v11617_v14  ;;  %v7724_v15 = vadd.f32 %v7723_v49, %v7722_v2  ;;  %v7836_v8 = vadd.f32 %v7835_v57, %v7834_v23 }
 0x514   : > { %v11716_v46 = vadd.f32 %v7833_v45, %v6344_v63  ;;  %v6347_v54 = vadd.f32 %v7724_v15, %v11617_v14 }
 0x516   : > { %v11719_v9 = vadd.f32 %v7836_v8, %v6347_v54  ;;  %v7725_v10 = vpop.f32.mrb[160].mxu0  ;;  %v7837_v51 = vpop.f32.mrb[160].mxu1 }
 0x517   : > { %v7726_v60 = vpop.f32.mrb[161].mxu0  ;;  %v7838_v55 = vpop.f32.mrb[161].mxu1 }
 0x518   : > { %v7727_v53 = vadd.f32 %v7726_v60, %v7725_v10  ;;  %v7728_v22 = vpop.f32.mrb[162].mxu0  ;;  %v7839_v25 = vadd.f32 %v7838_v55, %v7837_v51  ;;  %v7840_v11 = vpop.f32.mrb[162].mxu1 }
 0x519   : > { %v7729_v42 = vpop.f32.mrb[163].mxu0  ;;  %v7841_v19 = vpop.f32.mrb[163].mxu1 }
 0x51a   : > { %v6352_v3 = vadd.f32 %v7727_v53, %v11617_v14  ;;  %v7730_v12 = vadd.f32 %v7729_v42, %v7728_v22  ;;  %v7842_v52 = vadd.f32 %v7841_v19, %v7840_v11 }
 0x51c   : > { %v11722_v31 = vadd.f32 %v7839_v25, %v6352_v3  ;;  %v6355_v35 = vadd.f32 %v7730_v12, %v11617_v14 }
 0x51e   : > { %v11725_v5 = vadd.f32 %v7842_v52, %v6355_v35  ;;  %v7731_v58 = vpop.f32.mrb[164].mxu0  ;;  %v7843_v39 = vpop.f32.mrb[164].mxu1 }
 0x51f   : > { %v7732_v56 = vpop.f32.mrb[165].mxu0  ;;  %v7844_v47 = vpop.f32.mrb[165].mxu1 }
 0x520   : > { %v7733_v6 = vadd.f32 %v7732_v56, %v7731_v58  ;;  %v7734_v48 = vpop.f32.mrb[166].mxu0  ;;  %v7845_v30 = vadd.f32 %v7844_v47, %v7843_v39  ;;  %v7846_v43 = vpop.f32.mrb[166].mxu1 }
 0x521   : > { %v7735_v17 = vpop.f32.mrb[167].mxu0  ;;  %v7847_v41 = vpop.f32.mrb[167].mxu1 }
 0x522   : > { %v6360_v21 = vadd.f32 %v7733_v6, %v11617_v14  ;;  %v7736_v4 = vadd.f32 %v7735_v17, %v7734_v48  ;;  %v7848_v32 = vadd.f32 %v7847_v41, %v7846_v43 }
 0x524   : > { %v11728_v16 = vadd.f32 %v7845_v30, %v6360_v21  ;;  %v6363_v40 = vadd.f32 %v7736_v4, %v11617_v14 }
 0x526   : > { %v11731_v62 = vadd.f32 %v7848_v32, %v6363_v40  ;;  %v7737_v36 = vpop.f32.mrb[168].mxu0  ;;  %v7849_v38 = vpop.f32.mrb[168].mxu1 }
 0x527   : > { %v7738_v61 = vpop.f32.mrb[169].mxu0  ;;  %v7850_v37 = vpop.f32.mrb[169].mxu1 }
 0x528   : > { %v7739_v59 = vadd.f32 %v7738_v61, %v7737_v36  ;;  %v7740_v24 = vpop.f32.mrb[170].mxu0  ;;  %v7851_v2 = vadd.f32 %v7850_v37, %v7849_v38  ;;  %v7852_v45 = vpop.f32.mrb[170].mxu1 }
 0x529   : > { %v7741_v23 = vpop.f32.mrb[171].mxu0  ;;  %v7853_v15 = vpop.f32.mrb[171].mxu1 }
 0x52a   : > { %v6368_v49 = vadd.f32 %v7739_v59, %v11617_v14  ;;  %v7742_v63 = vadd.f32 %v7741_v23, %v7740_v24  ;;  %v7854_v57 = vadd.f32 %v7853_v15, %v7852_v45 }
 0x52c   : > { %v11734_v8 = vadd.f32 %v7851_v2, %v6368_v49  ;;  %v6371_v54 = vadd.f32 %v7742_v63, %v11617_v14 }
 0x52e   : > { %v11737_v10 = vadd.f32 %v7854_v57, %v6371_v54  ;;  %v7743_v51 = vpop.f32.mrb[172].mxu0  ;;  %v7855_v60 = vpop.f32.mrb[172].mxu1 }
 0x52f   : > { %v7744_v53 = vpop.f32.mrb[173].mxu0  ;;  %v7856_v22 = vpop.f32.mrb[173].mxu1 }
 0x530   : > { %v7745_v55 = vadd.f32 %v7744_v53, %v7743_v51  ;;  %v7746_v25 = vpop.f32.mrb[174].mxu0  ;;  %v7857_v11 = vadd.f32 %v7856_v22, %v7855_v60  ;;  %v7858_v42 = vpop.f32.mrb[174].mxu1 }
 0x531   : > { %v7747_v3 = vpop.f32.mrb[175].mxu0  ;;  %v7859_v52 = vpop.f32.mrb[175].mxu1 }
 0x532   : > { %v6376_v12 = vadd.f32 %v7745_v55, %v11617_v14  ;;  %v7748_v19 = vadd.f32 %v7747_v3, %v7746_v25  ;;  %v7860_v35 = vadd.f32 %v7859_v52, %v7858_v42 }
 0x534   : > { %v11740_v58 = vadd.f32 %v7857_v11, %v6376_v12  ;;  %v6379_v39 = vadd.f32 %v7748_v19, %v11617_v14 }
 0x536   : > { %v11743_v56 = vadd.f32 %v7860_v35, %v6379_v39  ;;  %v7749_v6 = vpop.f32.mrb[176].mxu0  ;;  %v7861_v47 = vpop.f32.mrb[176].mxu1 }
 0x537   : > { %v7750_v48 = vpop.f32.mrb[177].mxu0  ;;  %v7862_v43 = vpop.f32.mrb[177].mxu1 }
 0x538   : > { %v7751_v30 = vadd.f32 %v7750_v48, %v7749_v6  ;;  %v7752_v17 = vpop.f32.mrb[178].mxu0  ;;  %v7863_v21 = vadd.f32 %v7862_v43, %v7861_v47  ;;  %v7864_v4 = vpop.f32.mrb[178].mxu1 }
 0x539   : > { %v7753_v41 = vpop.f32.mrb[179].mxu0  ;;  %v7865_v36 = vpop.f32.mrb[179].mxu1 }
 0x53a   : > { %v6384_v32 = vadd.f32 %v7751_v30, %v11617_v14  ;;  %v7754_v40 = vadd.f32 %v7753_v41, %v7752_v17  ;;  %v7866_v38 = vadd.f32 %v7865_v36, %v7864_v4 }
 0x53c   : > { %v11746_v61 = vadd.f32 %v7863_v21, %v6384_v32  ;;  %v6387_v59 = vadd.f32 %v7754_v40, %v11617_v14 }
 0x53e   : > { %v11749_v37 = vadd.f32 %v7866_v38, %v6387_v59  ;;  %v7755_v24 = vpop.f32.mrb[180].mxu0  ;;  %v7867_v2 = vpop.f32.mrb[180].mxu1 }
 0x53f   : > { %v7756_v45 = vpop.f32.mrb[181].mxu0  ;;  %v7868_v49 = vpop.f32.mrb[181].mxu1 }
 0x540   : > { %v7757_v23 = vadd.f32 %v7756_v45, %v7755_v24  ;;  %v7758_v63 = vpop.f32.mrb[182].mxu0  ;;  %v7869_v15 = vadd.f32 %v7868_v49, %v7867_v2  ;;  %v7870_v57 = vpop.f32.mrb[182].mxu1 }
 0x541   : > { %v7759_v54 = vpop.f32.mrb[183].mxu0  ;;  %v7871_v53 = vpop.f32.mrb[183].mxu1 }
 0x542   : > { %v6392_v51 = vadd.f32 %v7757_v23, %v11617_v14  ;;  %v7760_v60 = vadd.f32 %v7759_v54, %v7758_v63  ;;  %v7872_v55 = vadd.f32 %v7871_v53, %v7870_v57 }
 0x544   : > { %v11752_v22 = vadd.f32 %v7869_v15, %v6392_v51  ;;  %v6395_v25 = vadd.f32 %v7760_v60, %v11617_v14 }
 0x546   : > { %v11755_v11 = vadd.f32 %v7872_v55, %v6395_v25  ;;  %v7761_v42 = vpop.f32.mrb[184].mxu0  ;;  %v7873_v3 = vpop.f32.mrb[184].mxu1 }
 0x547   : > { %v7762_v12 = vpop.f32.mrb[185].mxu0  ;;  %v7874_v52 = vpop.f32.mrb[185].mxu1 }
 0x548   : > { %v7763_v19 = vadd.f32 %v7762_v12, %v7761_v42  ;;  %v7764_v35 = vpop.f32.mrb[186].mxu0  ;;  %v7875_v39 = vadd.f32 %v7874_v52, %v7873_v3  ;;  %v7876_v6 = vpop.f32.mrb[186].mxu1 }
 0x549   : > { %v7765_v47 = vpop.f32.mrb[187].mxu0  ;;  %v7877_v43 = vpop.f32.mrb[187].mxu1 }
 0x54a   : > { %v6400_v48 = vadd.f32 %v7763_v19, %v11617_v14  ;;  %v7766_v30 = vadd.f32 %v7765_v47, %v7764_v35  ;;  %v7878_v17 = vadd.f32 %v7877_v43, %v7876_v6 }
 0x54c   : > { %v11758_v21 = vadd.f32 %v7875_v39, %v6400_v48  ;;  %v6403_v4 = vadd.f32 %v7766_v30, %v11617_v14  ;;  %v11770_v30 = vld [vmem:[#allocation12] sm:$0xf] }
 0x54d   : > { %8125 = vmatprep.mubr.bf16.mxu0 %v11770_v30 }
 0x54e   : > { %v11761_v41 = vadd.f32 %v7878_v17, %v6403_v4  ;;  %v7767_v32 = vpop.f32.mrb[188].mxu0  ;;  %v7879_v40 = vpop.f32.mrb[188].mxu1 }
 0x54f   : > { %v7768_v36 = vpop.f32.mrb[189].mxu0  ;;  %v7880_v59 = vpop.f32.mrb[189].mxu1 }
 0x550   : > { %v7769_v38 = vadd.f32 %v7768_v36, %v7767_v32  ;;  %v7770_v24 = vpop.f32.mrb[190].mxu0  ;;  %v7881_v2 = vadd.f32 %v7880_v59, %v7879_v40  ;;  %v7882_v45 = vpop.f32.mrb[190].mxu1 }
 0x551   : > { %v7771_v23 = vpop.f32.mrb[191].mxu0  ;;  %v7883_v15 = vpop.f32.mrb[191].mxu1 }
 0x552   : > { %v6408_v49 = vadd.f32 %v7769_v38, %v11617_v14  ;;  %v7772_v63 = vadd.f32 %v7771_v23, %v7770_v24  ;;  %v7884_v57 = vadd.f32 %v7883_v15, %v7882_v45 }
 0x554   : > { %v11764_v54 = vadd.f32 %v7881_v2, %v6408_v49  ;;  %v6411_v51 = vadd.f32 %v7772_v63, %v11617_v14 }
 0x556   : > { %v11767_v60 = vadd.f32 %v7884_v57, %v6411_v51  ;;  %v7901_v53 = vpop.f32.mrb[192].mxu0  ;;  %v8013_v55 = vpop.f32.mrb[192].mxu1 }
 0x557   : > { %v7902_v25 = vpop.f32.mrb[193].mxu0  ;;  %v8014_v3 = vpop.f32.mrb[193].mxu1 }
 0x558   : > { %v7903_v42 = vadd.f32 %v7902_v25, %v7901_v53  ;;  %v7904_v12 = vpop.f32.mrb[194].mxu0  ;;  %v8015_v19 = vadd.f32 %v8014_v3, %v8013_v55  ;;  %v8016_v52 = vpop.f32.mrb[194].mxu1 }
 0x559   : > { %v7905_v35 = vpop.f32.mrb[195].mxu0  ;;  %v8017_v47 = vpop.f32.mrb[195].mxu1 }
 0x55a   : > { %v6610_v39 = vadd.f32 %v7903_v42, %v11623_v18  ;;  %v7906_v6 = vadd.f32 %v7905_v35, %v7904_v12  ;;  %v8018_v48 = vadd.f32 %v8017_v47, %v8016_v52 }
 0x55c   : > { %v11772_v43 = vadd.f32 %v8015_v19, %v6610_v39  ;;  %v6613_v14 = vadd.f32 %v7906_v6, %v11635_v50 }
 0x55e   : > { %v11776_v17 = vadd.f32 %v8018_v48, %v6613_v14  ;;  %v7907_v4 = vpop.f32.mrb[196].mxu0  ;;  %v8019_v32 = vpop.f32.mrb[196].mxu1 }
 0x55f   : > { %v7908_v40 = vpop.f32.mrb[197].mxu0  ;;  %v8020_v38 = vpop.f32.mrb[197].mxu1 }
 0x560   : > { %v6898_v36 = vpack.c.bf16 %v11776_v17, %v11772_v43  ;;  %v7909_v18 = vadd.f32 %v7908_v40, %v7907_v4  ;;  %v7910_v59 = vpop.f32.mrb[198].mxu0  ;;  %v8021_v24 = vadd.f32 %v8020_v38, %v8019_v32  ;;  %v8022_v2 = vpop.f32.mrb[198].mxu1 }
 0x561   : > { %v7911_v45 = vpop.f32.mrb[199].mxu0  ;;  %v8023_v50 = vpop.f32.mrb[199].mxu1 }
 0x562   : > { %v6618_v23 = vadd.f32 %v7909_v18, %v11641_v13  ;;  %v7912_v49 = vadd.f32 %v7911_v45, %v7910_v59  ;;  %v8024_v63 = vadd.f32 %v8023_v50, %v8022_v2 }
 0x564   : > { %v11781_v15 = vadd.f32 %v8021_v24, %v6618_v23  ;;  %v6621_v57 = vadd.f32 %v7912_v49, %v11653_v33 }
 0x566   : > { %v11784_v51 = vadd.f32 %v8024_v63, %v6621_v57  ;;  %v7913_v53 = vpop.f32.mrb[200].mxu0  ;;  %v8025_v55 = vpop.f32.mrb[200].mxu1 }
 0x567   : > { %v7914_v25 = vpop.f32.mrb[201].mxu0  ;;  %v8026_v12 = vpop.f32.mrb[201].mxu1 }
 0x568   : > { %v6899_v42 = vpack.c.bf16 %v11784_v51, %v11781_v15  ;;  %v7915_v3 = vadd.f32 %v7914_v25, %v7913_v53  ;;  %v7916_v19 = vpop.f32.mrb[202].mxu0  ;;  %v8027_v52 = vadd.f32 %v8026_v12, %v8025_v55  ;;  %v8028_v13 = vpop.f32.mrb[202].mxu1 }
 0x569   : > { %v7917_v35 = vpop.f32.mrb[203].mxu0  ;;  %v8029_v47 = vpop.f32.mrb[203].mxu1 }
 0x56a   : > { %v6626_v39 = vadd.f32 %v7915_v3, %v11659_v27  ;;  %v7918_v6 = vadd.f32 %v7917_v35, %v7916_v19  ;;  %v8030_v48 = vadd.f32 %v8029_v47, %v8028_v13 }
 0x56c   : > { %v11789_v33 = vadd.f32 %v8027_v52, %v6626_v39  ;;  %v6629_v14 = vadd.f32 %v7918_v6, %v11671_v29 }
 0x56e   : > { %v11792_v4 = vadd.f32 %v8030_v48, %v6629_v14  ;;  %v7919_v32 = vpop.f32.mrb[204].mxu0  ;;  %v8031_v40 = vpop.f32.mrb[204].mxu1 }
 0x56f   : > { %v7920_v18 = vpop.f32.mrb[205].mxu0  ;;  %v8032_v24 = vpop.f32.mrb[205].mxu1 }
 0x570   : > { %v6900_v38 = vpack.c.bf16 %v11792_v4, %v11789_v33  ;;  %v7921_v59 = vadd.f32 %v7920_v18, %v7919_v32  ;;  %v7922_v2 = vpop.f32.mrb[206].mxu0  ;;  %v8033_v45 = vadd.f32 %v8032_v24, %v8031_v40  ;;  %v8034_v27 = vpop.f32.mrb[206].mxu1 }
 0x571   : > { %v7923_v23 = vpop.f32.mrb[207].mxu0  ;;  %v8035_v63 = vpop.f32.mrb[207].mxu1 }
 0x572   : > { %v6634_v49 = vadd.f32 %v7921_v59, %v11677_v26  ;;  %v7924_v50 = vadd.f32 %v7923_v23, %v7922_v2  ;;  %v8036_v57 = vadd.f32 %v8035_v63, %v8034_v27 }
 0x574   : > { %v11797_v29 = vadd.f32 %v8033_v45, %v6634_v49  ;;  %v6637_v53 = vadd.f32 %v7924_v50, %v11689_v28 }
 0x576   : > { %v11800_v55 = vadd.f32 %v8036_v57, %v6637_v53  ;;  %v7925_v25 = vpop.f32.mrb[208].mxu0  ;;  %v8037_v3 = vpop.f32.mrb[208].mxu1 }
 0x577   : > { %v7926_v12 = vpop.f32.mrb[209].mxu0  ;;  %v8038_v13 = vpop.f32.mrb[209].mxu1 }
 0x578   : > { %v6901_v19 = vpack.c.bf16 %v11800_v55, %v11797_v29  ;;  %v7927_v52 = vadd.f32 %v7926_v12, %v7925_v25  ;;  %v7928_v35 = vpop.f32.mrb[210].mxu0  ;;  %v8039_v39 = vadd.f32 %v8038_v13, %v8037_v3  ;;  %v8040_v26 = vpop.f32.mrb[210].mxu1 }
 0x579   : > { %v7929_v6 = vpop.f32.mrb[211].mxu0  ;;  %v8041_v14 = vpop.f32.mrb[211].mxu1 }
 0x57a   : > { %v6642_v47 = vadd.f32 %v7927_v52, %v11695_v7  ;;  %v7930_v48 = vadd.f32 %v7929_v6, %v7928_v35  ;;  %v8042_v32 = vadd.f32 %v8041_v14, %v8040_v26 }
 0x57c   : > { %v11805_v28 = vadd.f32 %v8039_v39, %v6642_v47  ;;  %v6645_v40 = vadd.f32 %v7930_v48, %v11701_v20 }
 0x57e   : > { %v11808_v18 = vadd.f32 %v8042_v32, %v6645_v40  ;;  %v7931_v59 = vpop.f32.mrb[212].mxu0  ;;  %v8043_v24 = vpop.f32.mrb[212].mxu1 }
 0x57f   : > { %v7932_v2 = vpop.f32.mrb[213].mxu0  ;;  %v8044_v23 = vpop.f32.mrb[213].mxu1 }
 0x580   : > { %v6902_v45 = vpack.c.bf16 %v11808_v18, %v11805_v28  ;;  %v7933_v27 = vadd.f32 %v7932_v2, %v7931_v59  ;;  %v7934_v49 = vpop.f32.mrb[214].mxu0  ;;  %v8045_v50 = vadd.f32 %v8044_v23, %v8043_v24  ;;  %v8046_v7 = vpop.f32.mrb[214].mxu1 }
 0x581   : > { %v7935_v63 = vpop.f32.mrb[215].mxu0  ;;  %v8047_v25 = vpop.f32.mrb[215].mxu1 }
 0x582   : > { %v6650_v57 = vadd.f32 %v7933_v27, %v11704_v1  ;;  %v7936_v53 = vadd.f32 %v7935_v63, %v7934_v49  ;;  %v8048_v3 = vadd.f32 %v8047_v25, %v8046_v7 }
 0x584   : > { %v11813_v20 = vadd.f32 %v8045_v50, %v6650_v57  ;;  %v6653_v12 = vadd.f32 %v7936_v53, %v11707_v34 }
 0x586   : > { %v11816_v52 = vadd.f32 %v8048_v3, %v6653_v12  ;;  %v7937_v13 = vpop.f32.mrb[216].mxu0  ;;  %v8049_v35 = vpop.f32.mrb[216].mxu1 }
 0x587   : > { %v7938_v39 = vpop.f32.mrb[217].mxu0  ;;  %v8050_v47 = vpop.f32.mrb[217].mxu1 }
 0x588   : > { %v6903_v26 = vpack.c.bf16 %v11816_v52, %v11813_v20  ;;  %v7939_v6 = vadd.f32 %v7938_v39, %v7937_v13  ;;  %v7940_v48 = vpop.f32.mrb[218].mxu0  ;;  %v8051_v14 = vadd.f32 %v8050_v47, %v8049_v35  ;;  %v8052_v1 = vpop.f32.mrb[218].mxu1 }
 0x589   : > { %v7941_v32 = vpop.f32.mrb[219].mxu0  ;;  %v8053_v24 = vpop.f32.mrb[219].mxu1 }
 0x58a   : > { %v6658_v40 = vadd.f32 %v7939_v6, %v11710_v44  ;;  %v7942_v59 = vadd.f32 %v7941_v32, %v7940_v48  ;;  %v8054_v2 = vadd.f32 %v8053_v24, %v8052_v1 }
 0x58c   : > { %v11821_v34 = vadd.f32 %v8051_v14, %v6658_v40  ;;  %v6661_v27 = vadd.f32 %v7942_v59, %v11713_v0 }
 0x58e   : > { %v11824_v23 = vadd.f32 %v8054_v2, %v6661_v27  ;;  %v7943_v49 = vpop.f32.mrb[220].mxu0  ;;  %v8055_v50 = vpop.f32.mrb[220].mxu1 }
 0x58f   : > { %v7944_v7 = vpop.f32.mrb[221].mxu0  ;;  %v8056_v53 = vpop.f32.mrb[221].mxu1 }
 0x590   : > { %v6904_v63 = vpack.c.bf16 %v11824_v23, %v11821_v34  ;;  %v7945_v57 = vadd.f32 %v7944_v7, %v7943_v49  ;;  %v7946_v25 = vpop.f32.mrb[222].mxu0  ;;  %v8057_v3 = vadd.f32 %v8056_v53, %v8055_v50  ;;  %v8058_v44 = vpop.f32.mrb[222].mxu1 }
 0x591   : > { %v7947_v12 = vpop.f32.mrb[223].mxu0  ;;  %v8059_v39 = vpop.f32.mrb[223].mxu1 }
 0x592   : > { %v6666_v13 = vadd.f32 %v7945_v57, %v11716_v46  ;;  %v7948_v35 = vadd.f32 %v7947_v12, %v7946_v25  ;;  %v8060_v6 = vadd.f32 %v8059_v39, %v8058_v44 }
 0x594   : > { %v11829_v0 = vadd.f32 %v8057_v3, %v6666_v13  ;;  %v6669_v47 = vadd.f32 %v7948_v35, %v11719_v9 }
 0x596   : > { %v11832_v48 = vadd.f32 %v8060_v6, %v6669_v47  ;;  %v7949_v14 = vpop.f32.mrb[224].mxu0  ;;  %v8061_v1 = vpop.f32.mrb[224].mxu1 }
 0x597   : > { %v7950_v32 = vpop.f32.mrb[225].mxu0  ;;  %v8062_v24 = vpop.f32.mrb[225].mxu1 }
 0x598   : > { %v6905_v40 = vpack.c.bf16 %v11832_v48, %v11829_v0  ;;  %v7951_v59 = vadd.f32 %v7950_v32, %v7949_v14  ;;  %v7952_v2 = vpop.f32.mrb[226].mxu0  ;;  %v8063_v27 = vadd.f32 %v8062_v24, %v8061_v1  ;;  %v8064_v46 = vpop.f32.mrb[226].mxu1 }
 0x599   : > { %v7953_v49 = vpop.f32.mrb[227].mxu0  ;;  %v8065_v57 = vpop.f32.mrb[227].mxu1 }
 0x59a   : > { %v6674_v50 = vadd.f32 %v7951_v59, %v11722_v31  ;;  %v7954_v7 = vadd.f32 %v7953_v49, %v7952_v2  ;;  %v8066_v53 = vadd.f32 %v8065_v57, %v8064_v46 }
 0x59c   : > { %v6835_v9 = vadd.f32 %v8063_v27, %v6674_v50  ;;  %v6677_v25 = vadd.f32 %v7954_v7, %v11725_v5 }
 0x59e   : > { %v6838_v3 = vadd.f32 %v8066_v53, %v6677_v25  ;;  %v7955_v44 = vpop.f32.mrb[228].mxu0  ;;  %v8067_v12 = vpop.f32.mrb[228].mxu1 }
 0x59f   : > { %v7956_v13 = vpop.f32.mrb[229].mxu0  ;;  %v8068_v39 = vpop.f32.mrb[229].mxu1 }
 0x5a0   : > { %v7957_v35 = vadd.f32 %v7956_v13, %v7955_v44  ;;  %v7958_v6 = vpop.f32.mrb[230].mxu0  ;;  %v6906_v47 = vpack.c.bf16 %v6838_v3, %v6835_v9  ;;  %v8069_v14 = vadd.f32 %v8068_v39, %v8067_v12  ;;  %v8070_v1 = vpop.f32.mrb[230].mxu1 }
 0x5a1   : > { %v7959_v32 = vpop.f32.mrb[231].mxu0  ;;  %v8071_v59 = vpop.f32.mrb[231].mxu1 }
 0x5a2   : > { %v6682_v24 = vadd.f32 %v7957_v35, %v11728_v16  ;;  %v7960_v31 = vadd.f32 %v7959_v32, %v7958_v6  ;;  %8109 = vmatprep.subr.bf16.mxu0 %v6906_v47  ;;  %v8072_v2 = vadd.f32 %v8071_v59, %v8070_v1 }
 0x5a3   : > { %8110 = vmatpush3.bf16.xpose.msra.mxu0 %v6898_v36 }
 0x5a4   : > { %v6843_v5 = vadd.f32 %v8069_v14, %v6682_v24  ;;  %v6685_v27 = vadd.f32 %v7960_v31, %v11731_v62 }
 0x5a6   : > { %v6846_v46 = vadd.f32 %v8072_v2, %v6685_v27  ;;  %v7961_v49 = vpop.f32.mrb[232].mxu0  ;;  %v8073_v50 = vpop.f32.mrb[232].mxu1 }
 0x5a7   : > { %v7962_v7 = vpop.f32.mrb[233].mxu0  ;;  %v8074_v53 = vpop.f32.mrb[233].mxu1 }
 0x5a8   : > { %v7963_v57 = vadd.f32 %v7962_v7, %v7961_v49  ;;  %v7964_v9 = vpop.f32.mrb[234].mxu0  ;;  %v6907_v25 = vpack.c.bf16 %v6846_v46, %v6843_v5  ;;  %v8075_v16 = vadd.f32 %v8074_v53, %v8073_v50  ;;  %v8076_v3 = vpop.f32.mrb[234].mxu1 }
 0x5a9   : > { %v7965_v44 = vpop.f32.mrb[235].mxu0  ;;  %v8077_v35 = vpop.f32.mrb[235].mxu1 }
 0x5aa   : > { %v6690_v12 = vadd.f32 %v7963_v57, %v11734_v8  ;;  %v7966_v13 = vadd.f32 %v7965_v44, %v7964_v9  ;;  %8111 = vmatprep.subr.bf16.mxu0 %v6907_v25  ;;  %v8078_v43 = vadd.f32 %v8077_v35, %v8076_v3 }
 0x5ab   : > { %8112 = vmatpush3.bf16.xpose.msra.mxu0 %v6899_v42 }
 0x5ac   : > { %v6851_v62 = vadd.f32 %v8075_v16, %v6690_v12  ;;  %v6693_v17 = vadd.f32 %v7966_v13, %v11737_v10 }
 0x5ae   : > { %v6854_v36 = vadd.f32 %v8078_v43, %v6693_v17  ;;  %v7967_v39 = vpop.f32.mrb[236].mxu0  ;;  %v8079_v6 = vpop.f32.mrb[236].mxu1 }
 0x5af   : > { %v7968_v47 = vpop.f32.mrb[237].mxu0  ;;  %v8080_v1 = vpop.f32.mrb[237].mxu1 }
 0x5b0   : > { %v7969_v14 = vadd.f32 %v7968_v47, %v7967_v39  ;;  %v7970_v32 = vpop.f32.mrb[238].mxu0  ;;  %v6908_v24 = vpack.c.bf16 %v6854_v36, %v6851_v62  ;;  %v8081_v8 = vadd.f32 %v8080_v1, %v8079_v6  ;;  %v8082_v31 = vpop.f32.mrb[238].mxu1 }
 0x5b1   : > { %v7971_v59 = vpop.f32.mrb[239].mxu0  ;;  %v8083_v27 = vpop.f32.mrb[239].mxu1 }
 0x5b2   : > { %v6698_v2 = vadd.f32 %v7969_v14, %v11740_v58  ;;  %v7972_v5 = vadd.f32 %v7971_v59, %v7970_v32  ;;  %8113 = vmatprep.subr.bf16.mxu0 %v6908_v24  ;;  %v8084_v15 = vadd.f32 %v8083_v27, %v8082_v31 }
 0x5b3   : > { %8114 = vmatpush3.bf16.xpose.msra.mxu0 %v6900_v38 }
 0x5b4   : > { %v6859_v10 = vadd.f32 %v8081_v8, %v6698_v2  ;;  %v6701_v51 = vadd.f32 %v7972_v5, %v11743_v56 }
 0x5b6   : > { %v6862_v42 = vadd.f32 %v8084_v15, %v6701_v51  ;;  %v7973_v46 = vpop.f32.mrb[240].mxu0  ;;  %v8085_v49 = vpop.f32.mrb[240].mxu1 }
 0x5b7   : > { %v7974_v50 = vpop.f32.mrb[241].mxu0  ;;  %v8086_v57 = vpop.f32.mrb[241].mxu1 }
 0x5b8   : > { %v7975_v7 = vadd.f32 %v7974_v50, %v7973_v46  ;;  %v7976_v53 = vpop.f32.mrb[242].mxu0  ;;  %v6909_v9 = vpack.c.bf16 %v6862_v42, %v6859_v10  ;;  %v8087_v58 = vadd.f32 %v8086_v57, %v8085_v49  ;;  %v8088_v25 = vpop.f32.mrb[242].mxu1 }
 0x5b9   : > { %v7977_v16 = vpop.f32.mrb[243].mxu0  ;;  %v8089_v12 = vpop.f32.mrb[243].mxu1 }
 0x5ba   : > { %v6706_v3 = vadd.f32 %v7975_v7, %v11746_v61  ;;  %v7978_v44 = vadd.f32 %v7977_v16, %v7976_v53  ;;  %8115 = vmatprep.subr.bf16.mxu0 %v6909_v9  ;;  %v8090_v33 = vadd.f32 %v8089_v12, %v8088_v25 }
 0x5bb   : > { %8116 = vmatpush3.bf16.xpose.msra.mxu0 %v6901_v19 }
 0x5bc   : > { %v6867_v56 = vadd.f32 %v8087_v58, %v6706_v3  ;;  %v6709_v4 = vadd.f32 %v7978_v44, %v11749_v37 }
 0x5be   : > { %v6870_v38 = vadd.f32 %v8090_v33, %v6709_v4  ;;  %v7979_v13 = vpop.f32.mrb[244].mxu0  ;;  %v8091_v35 = vpop.f32.mrb[244].mxu1 }
 0x5bf   : > { %v7980_v43 = vpop.f32.mrb[245].mxu0  ;;  %v8092_v17 = vpop.f32.mrb[245].mxu1 }
 0x5c0   : > { %v7981_v62 = vadd.f32 %v7980_v43, %v7979_v13  ;;  %v7982_v36 = vpop.f32.mrb[246].mxu0  ;;  %v6910_v39 = vpack.c.bf16 %v6870_v38, %v6867_v56  ;;  %v8093_v61 = vadd.f32 %v8092_v17, %v8091_v35  ;;  %v8094_v6 = vpop.f32.mrb[246].mxu1 }
 0x5c1   : > { %v7983_v47 = vpop.f32.mrb[247].mxu0  ;;  %v8095_v32 = vpop.f32.mrb[247].mxu1 }
 0x5c2   : > { %v6714_v14 = vadd.f32 %v7981_v62, %v11752_v22  ;;  %v7984_v1 = vadd.f32 %v7983_v47, %v7982_v36  ;;  %8117 = vmatprep.subr.bf16.mxu0 %v6910_v39  ;;  %v8096_v29 = vadd.f32 %v8095_v32, %v8094_v6 }
 0x5c3   : > { %8118 = vmatpush3.bf16.xpose.msra.mxu0 %v6902_v45 }
 0x5c4   : > { %v6875_v37 = vadd.f32 %v8093_v61, %v6714_v14  ;;  %v6717_v55 = vadd.f32 %v7984_v1, %v11755_v11 }
 0x5c6   : > { %v6878_v19 = vadd.f32 %v8096_v29, %v6717_v55  ;;  %v7985_v24 = vpop.f32.mrb[248].mxu0  ;;  %v8097_v8 = vpop.f32.mrb[248].mxu1 }
 0x5c7   : > { %v7986_v31 = vpop.f32.mrb[249].mxu0  ;;  %v8098_v2 = vpop.f32.mrb[249].mxu1 }
 0x5c8   : > { %v7987_v59 = vadd.f32 %v7986_v31, %v7985_v24  ;;  %v7988_v5 = vpop.f32.mrb[250].mxu0  ;;  %v6911_v27 = vpack.c.bf16 %v6878_v19, %v6875_v37  ;;  %v8099_v22 = vadd.f32 %v8098_v2, %v8097_v8  ;;  %v8100_v15 = vpop.f32.mrb[250].mxu1 }
 0x5c9   : > { %v7989_v10 = vpop.f32.mrb[251].mxu0  ;;  %v8101_v46 = vpop.f32.mrb[251].mxu1 }
 0x5ca   : > { %v6722_v51 = vadd.f32 %v7987_v59, %v11758_v21  ;;  %v7990_v42 = vadd.f32 %v7989_v10, %v7988_v5  ;;  %8119 = vmatprep.subr.bf16.mxu0 %v6911_v27  ;;  %v8102_v28 = vadd.f32 %v8101_v46, %v8100_v15 }
 0x5cb   : > { %8120 = vmatpush3.bf16.xpose.msra.mxu0 %v6903_v26 }
 0x5cc   : > { %v6883_v11 = vadd.f32 %v8099_v22, %v6722_v51  ;;  %v6725_v18 = vadd.f32 %v7990_v42, %v11761_v41 }
 0x5ce   : > { %v6886_v45 = vadd.f32 %v8102_v28, %v6725_v18  ;;  %v7991_v49 = vpop.f32.mrb[252].mxu0  ;;  %v8103_v50 = vpop.f32.mrb[252].mxu1 }
 0x5cf   : > { %v7992_v7 = vpop.f32.mrb[253].mxu0  ;;  %v8104_v53 = vpop.f32.mrb[253].mxu1 }
 0x5d0   : > { %v7993_v57 = vadd.f32 %v7992_v7, %v7991_v49  ;;  %v7994_v9 = vpop.f32.mrb[254].mxu0  ;;  %v6912_v58 = vpack.c.bf16 %v6886_v45, %v6883_v11  ;;  %v8105_v21 = vadd.f32 %v8104_v53, %v8103_v50  ;;  %v8106_v25 = vpop.f32.mrb[254].mxu1 }
 0x5d1   : > { %v7995_v16 = vpop.f32.mrb[255].mxu0  ;;  %v8107_v52 = vpop.f32.mrb[255].mxu1 }
 0x5d2   : > { %v6730_v3 = vadd.f32 %v7993_v57, %v11764_v54  ;;  %v7996_v20 = vadd.f32 %v7995_v16, %v7994_v9  ;;  %8121 = vmatprep.subr.bf16.mxu0 %v6912_v58  ;;  %v8108_v26 = vadd.f32 %v8107_v52, %v8106_v25  ;;  %v6915_v54 = vstv %s6914_s9 }
 0x5d3   : > { %8122 = vmatpush3.bf16.xpose.msra.mxu0 %v6904_v63 }
 0x5d4   : > { %v6891_v41 = vadd.f32 %v8105_v21, %v6730_v3  ;;  %v6733_v44 = vadd.f32 %v7996_v20, %v11767_v60 }
 0x5d6   : > { %v6894_v12 = vadd.f32 %v8108_v26, %v6733_v44 }
 0x5d8   : > { %v6913_v33 = vpack.c.bf16 %v6894_v12, %v6891_v41 }
 0x5da   : > { %8123 = vmatprep.subr.bf16.mxu0 %v6913_v33 }
 0x5db   : > { %8124 = vmatpush3.bf16.xpose.msra.mxu0 %v6905_v40 }
 0x5e2   : > { %8126 = vmatmul.mubr.bf16.vlgmr.msra.gmra.mrb[0].mxu0 %v11770_v30 }
 0x6b5   : > { %v6950_v34 = vpop.f32.mrb[0].mxu0 }
 0x6b6   : > { %v6951_v23 = vadd.f32 %v6950_v34, %v6915_v54  ;;  %v6952_v60 = vpop.f32.mrb[1].mxu0 }
 0x6b7   : > { %v6953_v63 = vadd.f32 %v6952_v60, %v6915_v54  ;;  %v6954_v56 = vpop.f32.mrb[2].mxu0 }
 0x6b8   : > { %6957 = vst [vmem:[%s365_s13] sm:$0xff] %v6951_v23  ;;  %v6955_v30 = vpop.f32.mrb[3].mxu0 }
 0x6b9   : > { %6958 = vst [vmem:[%s365_s13 + $0x8] sm:$0xff] %v6953_v63 }
 0x6ba   : > { %9489 = shalt.err (!%p9486_p8)
}
 0x6bb   : > { %s9490_s25 = scalar_lea.hbm %s11882_s15, 256  ;;  %s9494_s9 = scalar_lea.hbm %s11933_s7, 512 }
 0x6bc   : > { %p9491_p6 = scmp.ne.s32.totalorder %s11882_s15, %s9490_s25  ;;  %p9495_p3 = scmp.lt.u32.totalorder %s11882_s15, %s11933_s7 }
 0x6bd   : > { %p9496_p0 = scmp.lt.u32.totalorder %s9494_s9, %s9490_s25  ;;  %p9498_p2 = scmp.lt.u32.totalorder %s9490_s25, %s11882_s15 }
 0x6be   : > { %p9492_p9 = pnand %p9491_p6, %p12283_p7 }
 0x6bf   : > { %p9497_p5 = por %p9496_p0, %p9495_p3 }
 0x6c0   : > { %p9493_p4 = pneg %p9492_p9 }
 0x6c1   : > { %p9499_p10 = por %p9498_p2, %p9497_p5 }
 0x6c3   : > { %p9500_p1 = pnand %p9499_p10, %p9493_p4 }
 0x6c5   : > { %9503 = shalt.err (!%p9500_p1)
}
 0x6c6   : > { %8920 = dma.vmem_to_hbm [thread:$0]  (%p12283_p7), %s11884_s22, 256, %s11882_s15, %s6960_s8  }
 0x6c7 PF: > { %s6986_s13 = sand.u32 1, %s9542_s26   ;;  %p12284_p11 = scmp.ne.s32.totalorder %s12023_s21, 0 }
 0x6c8   : > { %p12285_p12 = scmp.ge.s32.totalorder %s9554_s29, 2  ;;  %s6987_s16 = scalar_lea.sflag [#allocation5], %s6986_s13 }
 0x6ca   : > { %p8943_p13 = pnand %p12285_p12, %p12284_p11 }
 0x6cc   : > { %9537 = dma.done.wait (!%p8943_p13), %s6987_s16, 256  }
 0x6cd   : > { %9539 = vsyncadd (!%p8943_p13), %s6987_s16, 4294967040  ;;  %p24_p8 = scmp.ge.s32.totalorder %s9766_s12, 4   ;;  %s12286_s26 = smov %s9546_s27 }
 0x6ce   : > { %s12287_s27 = smov %s9550_s28  ;;  %s12288_s28 = smov %s9778_s18 }
 0x6cf   : > { %s12289_s29 = smov %s9766_s12  ;;  %26 = sbr.rel (!%p24_p8) target bundleno = 10 (0xa), region = 113 }
 0x6d6   :  { %6992 = vsyncpa [#allocation4], 1 }
 0x6d7   :  { %6994 = vsyncpa [#allocation4 + $0x1], 1 }
 0x6d8   :  { %6995 = vsyncpa [#allocation7], 1 }
 0x6d9   :  { %6996 = vsyncpa [#allocation10], 1 }
 0x6da   :  { %6997 = vsyncpa [#allocation13], 1 }
 0x6db   :  { %6998 = vsyncpa [#allocation5], 1 }
 0x6dc   :  { %7000 = vsyncpa [#allocation5 + $0x1], 1 }

</bundles_post_ra>
